<compile_context>
chip_gen: v7x
topology: tpu7x:2x2x1
jax: 0.10.0
libtpu: 0.0.40
codegen_flags: <defaults>
</compile_context>

<pallas_src>
import functools

import jax
import jax.numpy as jnp
from jax.experimental import pallas as pl
from jax.experimental.pallas import tpu as pltpu


def _round_up(x, m):
    return (x + m - 1) // m * m


def _lane(n):
    return _round_up(max(int(n), 1), 128)


def _tpu_hw_info():
    """(multi_tensorcore, vmem_capacity_bytes) with safe fallbacks (trace-time)."""
    kind = ""
    try:
        kind = jax.devices()[0].device_kind.lower()
    except Exception:
        pass
    multi_tc = "7" in kind                       # v7x: 2 TensorCores per chip
    vmem_cap = (64 << 20) if multi_tc else (128 << 20)
    try:
        vmem_cap = int(pltpu.get_tpu_info().vmem_capacity_bytes)
    except Exception:
        pass
    return multi_tc, vmem_cap


# ----------------------------------------------------------------------------
# Fused SetTransformerAggregation kernel (one whole stage, one tile of sets)
# ----------------------------------------------------------------------------
def _set_transformer_kernel(x_ref, len_ref,
                            wqkv_ref, bqkv_ref, wo_ref, bo_ref,
                            wff_ref, bff_ref,
                            pma_lw_ref, pma_lb_ref, pma_wkv_ref, pma_bkv_ref,
                            pma_q_ref, seed_ref, dec_w_ref, dec_b_ref,
                            o_ref, *, heads, num_sabs, bt, n_pad):
    C = x_ref.shape[-1]
    d = C // heads
    M = bt * n_pad                               # flattened rows for this tile of sets
    scale = jnp.float32(1.0 / float(d) ** 0.5)
    NEG = jnp.float32(-1e30)

    # Key-padding masks built in-kernel from per-set lengths (no mask DMA streams).
    lens = len_ref[...]                                               # (bt, 1, 1) int32
    kmask3 = jax.lax.broadcasted_iota(jnp.int32, (bt, 1, n_pad), 2) < lens
    kmask2 = (jax.lax.broadcasted_iota(jnp.int32, (bt, n_pad), 1)
              < lens.reshape(bt, 1))                                  # keys for the PMA

    def ff(layer, y):
        h = jnp.dot(y.astype(jnp.bfloat16), wff_ref[layer],
                    preferred_element_type=jnp.float32) + bff_ref[layer]
        return y + jnp.maximum(h, 0.0)

    # ---- encoder SABs: fused QKV matmul, per-head attention, single out-proj ----
    # NOTE: layer loops are Python-unrolled; for large num_sabs/C move them to a
    # fori_loop over a stacked layer axis to bound vreg live ranges.
    x = x_ref[...]                                                    # (M, C) f32
    for l in range(num_sabs):
        qkv = jnp.dot(x.astype(jnp.bfloat16), wqkv_ref[l],
                      preferred_element_type=jnp.float32) + bqkv_ref[l]   # (M, 3C)
        qkv3 = qkv.reshape(bt, n_pad, 3 * C)
        heads_out = []
        for h in range(heads):                    # static, small
            qh = qkv3[..., h * d:(h + 1) * d].astype(jnp.bfloat16)
            kh = qkv3[..., C + h * d:C + (h + 1) * d].astype(jnp.bfloat16)
            vh = qkv3[..., 2 * C + h * d:2 * C + (h + 1) * d].astype(jnp.bfloat16)
            s = jax.lax.dot_general(
                qh, kh, (((2,), (2,)), ((0,), (0,))),
                preferred_element_type=jnp.float32) * scale           # (bt,n_pad,n_pad)
            s = jnp.where(kmask3, s, NEG)
            s = s - jnp.max(s, axis=-1, keepdims=True)
            p = jnp.exp(s)
            p = p * pl.reciprocal(jnp.sum(p, axis=-1, keepdims=True), approx=True)
            heads_out.append(jax.lax.dot_general(
                p.astype(jnp.bfloat16), vh, (((2,), (1,)), ((0,), (0,))),
                preferred_element_type=jnp.float32))                  # (bt,n_pad,d)
        attn = jnp.concatenate(heads_out, axis=-1).reshape(M, C)
        y = jnp.dot(attn.astype(jnp.bfloat16), wo_ref[l],
                    preferred_element_type=jnp.float32) + bo_ref[l] + x
        # NOTE: PyTorch zeroes padded *query* rows here; padded rows never feed valid
        # outputs (always key-masked downstream), so skipping it is exact for the
        # returned aggregation.
        x = ff(l, y)

    # ---- PMA: relu(lin(x)); seed-query attention -> ONE pooled row per set ----
    xp = jnp.maximum(
        jnp.dot(x.astype(jnp.bfloat16), pma_lw_ref[...],
                preferred_element_type=jnp.float32) + pma_lb_ref[...], 0.0)   # (M, C)
    kv = jnp.dot(xp.astype(jnp.bfloat16), pma_wkv_ref[...],
                 preferred_element_type=jnp.float32) + pma_bkv_ref[...]       # (M, 2C)
    kv3 = kv.reshape(bt, n_pad, 2 * C)
    sq = pma_q_ref[...]                           # (1, C): seed @ Wq + bq, precomputed
    heads_out = []
    for h in range(heads):
        kh = kv3[..., h * d:(h + 1) * d]                              # (bt,n_pad,d) f32
        vh = kv3[..., C + h * d:C + (h + 1) * d]
        qh = sq[:, h * d:(h + 1) * d].reshape(1, 1, d)
        s = jnp.sum(kh * qh, axis=-1) * scale                         # (bt, n_pad)
        s = jnp.where(kmask2, s, NEG)
        s = s - jnp.max(s, axis=-1, keepdims=True)
        p = jnp.exp(s)
        p = p * pl.reciprocal(jnp.sum(p, axis=-1, keepdims=True), approx=True)
        heads_out.append(jnp.sum(p[:, :, None] * vh, axis=1))         # (bt, d)
    attn = jnp.concatenate(heads_out, axis=-1)                        # (bt, C)
    y = (jnp.dot(attn.astype(jnp.bfloat16), wo_ref[num_sabs],
                 preferred_element_type=jnp.float32)
         + bo_ref[num_sabs] + seed_ref[...])      # residual is the seed query
    pooled = ff(num_sabs, y)                                          # (bt, C)

    # ---- decoder SABs on the single pooled row per set ----
    # Sequence length is 1 => softmax over one key == 1 => attention == V exactly,
    # so each layer collapses to one precomputed (C,C) matmul + bias, plus the FF.
    for l in range(num_sabs):
        y = pooled + jnp.dot(pooled.astype(jnp.bfloat16), dec_w_ref[l],
                             preferred_element_type=jnp.float32) + dec_b_ref[l]
        pooled = ff(num_sabs + 1 + l, y)

    # nan_to_num (torch: nan->0, +/-inf -> f32 max/min); flatten(1,2) with 1 seed.
    pooled = jnp.where(jnp.isnan(pooled), jnp.float32(0.0), pooled)
    pooled = jnp.clip(pooled, jnp.float32(-3.4028235e38), jnp.float32(3.4028235e38))
    o_ref[...] = pooled.reshape(1, bt, C)


# ----------------------------------------------------------------------------
# JAX glue: to_dense_batch, stage wrapper
# ----------------------------------------------------------------------------
def _to_dense_batch(x, index, num_sets, max_per_set):
    """PyG to_dense_batch. Precondition: `index` is sorted (same requirement as
    SetTransformerAggregation)."""
    n, C = x.shape
    ar = jnp.arange(n, dtype=jnp.int32)
    starts = jnp.full((num_sets,), n, dtype=jnp.int32).at[index].min(ar)
    pos = ar - starts[index]
    dense = jnp.zeros((num_sets, max_per_set, C), jnp.float32).at[index, pos].set(x)
    lengths = jnp.zeros((num_sets,), jnp.int32).at[index].add(1)
    return dense, lengths


def _set_transformer_aggregation(x, index, params, *, heads, num_sabs,
                                 num_sets, max_per_set, sets_per_tile=None):
    C = x.shape[-1]
    Lm = 2 * num_sabs + 1

    # Pad set size to a sublane multiple so flattened <-> per-set reshapes are free.
    n_pad = max(8, _round_up(max_per_set, 8))
    xd, lens = _to_dense_batch(x.astype(jnp.float32), index, num_sets, n_pad)

    multi_tc, vmem_cap = _tpu_hw_info()
    weight_bytes = sum(int(v.size) * v.dtype.itemsize for v in params.values())

    # Sets per grid step sized from a VMEM activation budget (amortizes per-step
    # overhead). Force >=2 tiles only on 2-TC chips (v7x) so ("parallel",) grid
    # semantics spread sets across both TensorCores; single-TC v5e/v6e run one step.
    per_set = 4 * n_pad * (8 * _lane(3 * C)) + 4 * 2 * n_pad * _lane(n_pad)
    act_budget = max((24 << 20) - 2 * weight_bytes, 2 << 20)
    cap = sets_per_tile if sets_per_tile is not None else int(act_budget // per_set)
    cap = max(1, min(cap, 1024, num_sets))
    num_tiles = -(-num_sets // cap)
    if multi_tc and num_sets > 1:
        num_tiles = max(num_tiles, 2)
    num_tiles = min(num_tiles, num_sets)
    bt = -(-num_sets // num_tiles)
    b_pad = bt * num_tiles
    if b_pad != num_sets:
        xd = jnp.pad(xd, ((0, b_pad - num_sets), (0, 0), (0, 0)))
        lens = jnp.pad(lens, (0, b_pad - num_sets))

    xd_flat = xd.reshape(b_pad * n_pad, C)       # row slab per tile of sets
    lens3 = lens.reshape(b_pad, 1, 1)

    def _const(shape):
        zeros = (0,) * len(shape)
        return pl.BlockSpec(shape, lambda i, _z=zeros: _z)

    # Generation-aware VMEM limit: cap at 40 MiB on 64-MiB-VMEM parts (v7x), 48 MiB
    # otherwise. (Constant-index weight blocks are fetched once but double-buffered
    # by default — they are tiny here, so we simply account for 2x.)
    vmem_needed = (2 * weight_bytes + 2 * 4 * bt * n_pad * _lane(C)
                   + bt * per_set + (8 << 20))
    gen_cap = (40 << 20) if vmem_cap <= (64 << 20) else (48 << 20)
    vmem_limit = int(min(max(vmem_needed, 20 << 20), gen_cap))

    kernel = functools.partial(_set_transformer_kernel, heads=heads,
                               num_sabs=num_sabs, bt=bt, n_pad=n_pad)

    out = pl.pallas_call(
        kernel,
        out_shape=jax.ShapeDtypeStruct((num_tiles, bt, C), jnp.float32),
        grid=(num_tiles,),
        in_specs=[
            pl.BlockSpec((bt * n_pad, C), lambda i: (i, 0)),   # dense node features
            pl.BlockSpec((bt, 1, 1), lambda i: (i, 0, 0)),     # per-set lengths
            _const((num_sabs, C, 3 * C)),                      # fused QKV weight (bf16)
            _const((num_sabs, 1, 3 * C)),                      # fused QKV bias (f32)
            _const((num_sabs + 1, C, C)),                      # out-proj W (enc + PMA)
            _const((num_sabs + 1, 1, C)),                      # out-proj b
            _const((Lm, C, C)),                                # FF weight (all MABs)
            _const((Lm, 1, C)),                                # FF bias
            _const((C, C)),                                    # PMA lin weight
            _const((1, C)),                                    # PMA lin bias
            _const((C, 2 * C)),                                # PMA fused K/V weight
            _const((1, 2 * C)),                                # PMA fused K/V bias
            _const((1, C)),                                    # seed @ Wq + bq
            _const((1, C)),                                    # raw seed (residual)
            _const((num_sabs, C, C)),                          # merged decoder attn W
            _const((num_sabs, 1, C)),                          # merged decoder attn b
        ],
        out_specs=pl.BlockSpec((1, bt, C), lambda i: (i, 0, 0)),
        compiler_params=pltpu.CompilerParams(
            dimension_semantics=("parallel",),
            vmem_limit_bytes=vmem_limit),
    )(xd_flat, lens3, params["wqkv"], params["bqkv"], params["wo"], params["bo"],
      params["wff"], params["bff"], params["pma_lw"], params["pma_lb"],
      params["pma_wkv"], params["pma_bkv"], params["pma_q"], params["seed"],
      params["dec_w"], params["dec_b"])

    # Only the pooled row per set is written; flatten tiles and drop padding.
    return out.reshape(num_tiles * bt, C)[:num_sets]


# ----------------------------------------------------------------------------
# Parameters: PyTorch-layout random init, packed into the fused kernel layout
# ----------------------------------------------------------------------------
def _pack_stage_params(mabs, pma_lin_w, pma_lin_b, seed, num_sabs):
    C = mabs[0]["lin_w"].shape[0]
    assert num_sabs >= 1
    enc = mabs[:num_sabs]
    pma = mabs[num_sabs]
    dec = mabs[num_sabs + 1:]

    seed2 = seed.reshape(1, C)
    # Seed query projection is constant -> precompute (exact): seed @ Wq^T + bq.
    pma_q = seed2 @ pma["in_proj_w"][0:C].T + pma["in_proj_b"][0:C].reshape(1, C)
    # Decoder SABs act on a length-1 sequence -> attention == V exactly:
    #   attn_out = q @ (Wv^T Wo^T) + (bv Wo^T + bo).
    dec_w = jnp.stack([m["in_proj_w"][2 * C:3 * C].T @ m["out_proj_w"].T
                       for m in dec], 0)
    dec_b = jnp.stack([m["in_proj_b"][2 * C:3 * C].reshape(1, C) @ m["out_proj_w"].T
                       + m["out_proj_b"].reshape(1, C) for m in dec], 0)

    return dict(
        wqkv=jnp.stack([m["in_proj_w"].T for m in enc], 0).astype(jnp.bfloat16),
        bqkv=jnp.stack([m["in_proj_b"].reshape(1, 3 * C) for m in enc], 0),
        wo=jnp.stack([m["out_proj_w"].T for m in enc + [pma]], 0).astype(jnp.bfloat16),
        bo=jnp.stack([m["out_proj_b"].reshape(1, C) for m in enc + [pma]], 0),
        wff=jnp.stack([m["lin_w"].T for m in mabs], 0).astype(jnp.bfloat16),
        bff=jnp.stack([m["lin_b"].reshape(1, C) for m in mabs], 0),
        pma_lw=pma_lin_w.T.astype(jnp.bfloat16),
        pma_lb=pma_lin_b.reshape(1, C),
        pma_wkv=pma["in_proj_w"][C:3 * C].T.astype(jnp.bfloat16),
        pma_bkv=pma["in_proj_b"][C:3 * C].reshape(1, 2 * C),
        pma_q=pma_q,
        seed=seed2,
        dec_w=dec_w.astype(jnp.bfloat16),
        dec_b=dec_b,
    )


def _init_stage_params(key, C, heads, num_sabs):
    del heads  # head split happens in-kernel via lane slices

    def mab_params(k):
        ks = jax.random.split(k, 6)
        s = 0.1
        return dict(
            in_proj_w=s * jax.random.normal(ks[0], (3 * C, C), jnp.float32),
            in_proj_b=0.02 * jax.random.normal(ks[1], (3 * C,), jnp.float32),
            out_proj_w=s * jax.random.normal(ks[2], (C, C), jnp.float32),
            out_proj_b=0.02 * jax.random.normal(ks[3], (C,), jnp.float32),
            lin_w=s * jax.random.normal(ks[4], (C, C), jnp.float32),
            lin_b=0.02 * jax.random.normal(ks[5], (C,), jnp.float32),
        )

    n_mab = 2 * num_sabs + 1                     # encoders, PMA MAB, decoders
    keys = jax.random.split(key, n_mab + 3)
    mabs = [mab_params(keys[i]) for i in range(n_mab)]
    pma_lin_w = 0.1 * jax.random.normal(keys[-3], (C, C), jnp.float32)
    pma_lin_b = 0.02 * jax.random.normal(keys[-2], (C,), jnp.float32)
    seed = 0.5 * jax.random.normal(keys[-1], (1, 1, C), jnp.float32)
    return _pack_stage_params(mabs, pma_lin_w, pma_lin_b, seed, num_sabs)


# ----------------------------------------------------------------------------
# TwoStageAggregator
# ----------------------------------------------------------------------------
@functools.partial(jax.jit, static_argnames=(
    "heads", "num_sabs", "num_mols", "max_nodes_per_mol",
    "num_blends", "max_mols_per_blend"))
def _two_stage_forward(params, x, mol_batch, blend_batch, *, heads, num_sabs,
                       num_mols, max_nodes_per_mol, num_blends, max_mols_per_blend):
    mols = _set_transformer_aggregation(
        x, mol_batch, params["mol"], heads=heads, num_sabs=num_sabs,
        num_sets=num_mols, max_per_set=max_nodes_per_mol)
    return _set_transformer_aggregation(
        mols, blend_batch, params["blend"], heads=heads, num_sabs=num_sabs,
        num_sets=num_blends, max_per_set=max_mols_per_blend)


class TwoStageAggregator:
    """JAX/Pallas mirror of the PyTorch TwoStageAggregator (eval mode)."""

    def __init__(self, in_channels, heads, num_sabs, dropout, key):
        del dropout  # eval-mode forward: attention dropout is identity
        assert in_channels % heads == 0 and num_sabs >= 1
        self.in_channels = in_channels
        self.heads = heads
        self.num_sabs = num_sabs
        k_mol, k_blend = jax.random.split(key)
        self.params = {
            "mol": _init_stage_params(k_mol, in_channels, heads, num_sabs),
            "blend": _init_stage_params(k_blend, in_channels, heads, num_sabs),
        }

    def __call__(self, x, mol_batch, blend_batch, *, num_mols, max_nodes_per_mol,
                 num_blends, max_mols_per_blend):
        # Segment sizes are static host-side ints: no device->host sync in the forward.
        # TODO(synk): genuinely empty sets would give finite (uniform-softmax) values
        # instead of PyTorch's NaN-then-nan_to_num zeros; to_dense_batch of real graphs
        # never yields empty sets, so results match.
        return _two_stage_forward(
            self.params, x, mol_batch, blend_batch,
            heads=self.heads, num_sabs=self.num_sabs,
            num_mols=num_mols, max_nodes_per_mol=max_nodes_per_mol,
            num_blends=num_blends, max_mols_per_blend=max_mols_per_blend)


# ----------------------------------------------------------------------------
if __name__ == "__main__":
    key = jax.random.PRNGKey(0)
    k_x, k_params = jax.random.split(key)

    C, heads, num_sabs = 32, 2, 1
    # 24 nodes over 6 molecules, 6 molecules over 2 blends (indices sorted).
    counts = [5, 3, 4, 6, 2, 4]
    mols_per_blend = [3, 3]
    mol_batch = jnp.array(sum([[i] * c for i, c in enumerate(counts)], []), jnp.int32)
    blend_batch = jnp.array(sum([[i] * c for i, c in enumerate(mols_per_blend)], []),
                            jnp.int32)

    # Static segment info computed on the host from the raw Python counts.
    num_mols, max_nodes = len(counts), max(counts)
    num_blends, max_mols = len(mols_per_blend), max(mols_per_blend)

    x = jax.random.normal(k_x, (int(sum(counts)), C), jnp.float32)

    agg = TwoStageAggregator(in_channels=C, heads=heads, num_sabs=num_sabs,
                             dropout=0.1, key=k_params)
    out = agg(x, mol_batch, blend_batch,
              num_mols=num_mols, max_nodes_per_mol=max_nodes,
              num_blends=num_blends, max_mols_per_blend=max_mols)
    out = jax.block_until_ready(out)

    assert out.shape == (num_blends, C), out.shape
    assert bool(jnp.all(jnp.isfinite(out)))
    print("KERNEL_OK")
</pallas_src>

<mosaic_0001>
module attributes {stable_mosaic.version = 11 : i64} {
  func.func @_set_transformer_kernel(%arg0: i32, %arg1: memref<48x32xf32, #tpu.memory_space<vmem>>, %arg2: memref<6x1x1xi32, #tpu.memory_space<vmem>>, %arg3: memref<1x32x96xbf16, #tpu.memory_space<vmem>>, %arg4: memref<1x1x96xf32, #tpu.memory_space<vmem>>, %arg5: memref<2x32x32xbf16, #tpu.memory_space<vmem>>, %arg6: memref<2x1x32xf32, #tpu.memory_space<vmem>>, %arg7: memref<3x32x32xbf16, #tpu.memory_space<vmem>>, %arg8: memref<3x1x32xf32, #tpu.memory_space<vmem>>, %arg9: memref<32x32xbf16, #tpu.memory_space<vmem>>, %arg10: memref<1x32xf32, #tpu.memory_space<vmem>>, %arg11: memref<32x64xbf16, #tpu.memory_space<vmem>>, %arg12: memref<1x64xf32, #tpu.memory_space<vmem>>, %arg13: memref<1x32xf32, #tpu.memory_space<vmem>>, %arg14: memref<1x32xf32, #tpu.memory_space<vmem>>, %arg15: memref<1x32x32xbf16, #tpu.memory_space<vmem>>, %arg16: memref<1x1x32xf32, #tpu.memory_space<vmem>>, %arg17: memref<1x6x32xf32, #tpu.memory_space<vmem>>) attributes {dimension_semantics = [#tpu.dimension_semantics<parallel>], iteration_bounds = array<i64: 1>, scalar_prefetch = 0 : i64, scratch_operands = 0 : i64, tpu.core_type = #tpu.core_type<tc>, window_params = [{transform_indices = @transform_0, window_bounds = array<i64: 48, 32>}, {transform_indices = @transform_1, window_bounds = array<i64: 6, 1, 1>}, {pipeline_mode = #tpu.pipeline_mode<synchronous>, transform_indices = @transform_2, window_bounds = array<i64: 1, 32, 96>}, {pipeline_mode = #tpu.pipeline_mode<synchronous>, transform_indices = @transform_3, window_bounds = array<i64: 1, 1, 96>}, {pipeline_mode = #tpu.pipeline_mode<synchronous>, transform_indices = @transform_4, window_bounds = array<i64: 2, 32, 32>}, {pipeline_mode = #tpu.pipeline_mode<synchronous>, transform_indices = @transform_5, window_bounds = array<i64: 2, 1, 32>}, {pipeline_mode = #tpu.pipeline_mode<synchronous>, transform_indices = @transform_6, window_bounds = array<i64: 3, 32, 32>}, {pipeline_mode = #tpu.pipeline_mode<synchronous>, transform_indices = @transform_7, window_bounds = array<i64: 3, 1, 32>}, {pipeline_mode = #tpu.pipeline_mode<synchronous>, transform_indices = @transform_8, window_bounds = array<i64: 32, 32>}, {pipeline_mode = #tpu.pipeline_mode<synchronous>, transform_indices = @transform_9, window_bounds = array<i64: 1, 32>}, {pipeline_mode = #tpu.pipeline_mode<synchronous>, transform_indices = @transform_10, window_bounds = array<i64: 32, 64>}, {pipeline_mode = #tpu.pipeline_mode<synchronous>, transform_indices = @transform_11, window_bounds = array<i64: 1, 64>}, {pipeline_mode = #tpu.pipeline_mode<synchronous>, transform_indices = @transform_12, window_bounds = array<i64: 1, 32>}, {pipeline_mode = #tpu.pipeline_mode<synchronous>, transform_indices = @transform_13, window_bounds = array<i64: 1, 32>}, {pipeline_mode = #tpu.pipeline_mode<synchronous>, transform_indices = @transform_14, window_bounds = array<i64: 1, 32, 32>}, {pipeline_mode = #tpu.pipeline_mode<synchronous>, transform_indices = @transform_15, window_bounds = array<i64: 1, 1, 32>}, {transform_indices = @transform_16, window_bounds = array<i64: 1, 6, 32>}]} {
    %c0 = arith.constant 0 : index
    %c0_0 = arith.constant 0 : index
    %c0_1 = arith.constant 0 : index
    %0 = vector.load %arg2[%c0, %c0_0, %c0_1] : memref<6x1x1xi32, #tpu.memory_space<vmem>>, vector<6x1x1xi32>
    %1 = tpu.iota {dimensions = array<i32: 2>} : vector<6x1x8xi32>
    %2 = vector.broadcast %0 : vector<6x1x1xi32> to vector<6x1x8xi32>
    %3 = arith.cmpi slt, %1, %2 : vector<6x1x8xi32>
    %4 = tpu.iota {dimensions = array<i32: 1>} : vector<6x8xi32>
    %5 = vector.shape_cast %0 : vector<6x1x1xi32> to vector<6x1xi32>
    %6 = vector.broadcast %5 : vector<6x1xi32> to vector<6x8xi32>
    %7 = arith.cmpi slt, %4, %6 : vector<6x8xi32>
    %c0_2 = arith.constant 0 : index
    %c0_3 = arith.constant 0 : index
    %8 = vector.load %arg1[%c0_2, %c0_3] : memref<48x32xf32, #tpu.memory_space<vmem>>, vector<48x32xf32>
    %9 = arith.truncf %8 : vector<48x32xf32> to vector<48x32xbf16>
    %c0_4 = arith.constant 0 : index
    %c0_5 = arith.constant 0 : index
    %c0_6 = arith.constant 0 : index
    %10 = vector.load %arg3[%c0_4, %c0_5, %c0_6] : memref<1x32x96xbf16, #tpu.memory_space<vmem>>, vector<1x32x96xbf16>
    %11 = vector.shape_cast %10 : vector<1x32x96xbf16> to vector<32x96xbf16>
    %cst = arith.constant dense<0.000000e+00> : vector<48x96xf32>
    %12 = tpu.matmul %9, %11, %cst {dimension_numbers = #tpu.dot_dimension_numbers<[1], [0], [0], [1], [0, 0, 1, 1], [], []>} : vector<48x32xbf16>, vector<32x96xbf16>, vector<48x96xf32> -> vector<48x96xf32>
    %c0_7 = arith.constant 0 : index
    %c0_8 = arith.constant 0 : index
    %c0_9 = arith.constant 0 : index
    %13 = vector.load %arg4[%c0_7, %c0_8, %c0_9] : memref<1x1x96xf32, #tpu.memory_space<vmem>>, vector<1x1x96xf32>
    %14 = vector.shape_cast %13 : vector<1x1x96xf32> to vector<1x96xf32>
    %15 = vector.broadcast %14 : vector<1x96xf32> to vector<48x96xf32>
    %16 = arith.addf %12, %15 : vector<48x96xf32>
    %17 = vector.shape_cast %16 : vector<48x96xf32> to vector<6x8x96xf32>
    %18 = vector.extract_strided_slice %17 {offsets = [0, 0, 0], sizes = [6, 8, 16], strides = [1, 1, 1]} : vector<6x8x96xf32> to vector<6x8x16xf32>
    %19 = arith.truncf %18 : vector<6x8x16xf32> to vector<6x8x16xbf16>
    %20 = vector.extract_strided_slice %17 {offsets = [0, 0, 32], sizes = [6, 8, 16], strides = [1, 1, 1]} : vector<6x8x96xf32> to vector<6x8x16xf32>
    %21 = arith.truncf %20 : vector<6x8x16xf32> to vector<6x8x16xbf16>
    %22 = vector.extract_strided_slice %17 {offsets = [0, 0, 64], sizes = [6, 8, 16], strides = [1, 1, 1]} : vector<6x8x96xf32> to vector<6x8x16xf32>
    %23 = arith.truncf %22 : vector<6x8x16xf32> to vector<6x8x16xbf16>
    %cst_10 = arith.constant dense<0.000000e+00> : vector<6x8x8xf32>
    %24 = tpu.matmul %19, %21, %cst_10 {dimension_numbers = #tpu.dot_dimension_numbers<[2], [2], [1], [1], [0, 0, 0, 1, 1, 1], [0], [0]>} : vector<6x8x16xbf16>, vector<6x8x16xbf16>, vector<6x8x8xf32> -> vector<6x8x8xf32>
    %cst_11 = arith.constant 2.500000e-01 : f32
    %25 = vector.broadcast %cst_11 : f32 to vector<6x8x8xf32>
    %26 = arith.mulf %24, %25 : vector<6x8x8xf32>
    %cst_12 = arith.constant -1.000000e+30 : f32
    %27 = vector.shape_cast %3 : vector<6x1x8xi1> to vector<6x1x8xi1>
    %28 = vector.broadcast %27 : vector<6x1x8xi1> to vector<6x8x8xi1>
    %29 = vector.broadcast %cst_12 : f32 to vector<6x8x8xf32>
    %30 = arith.select %28, %26, %29 : vector<6x8x8xi1>, vector<6x8x8xf32>
    %cst_13 = arith.constant dense<0xFF800000> : vector<6x8xf32>
    %31 = vector.multi_reduction <maximumf>, %30, %cst_13 [2] : vector<6x8x8xf32> to vector<6x8xf32>
    %32 = vector.shape_cast %31 : vector<6x8xf32> to vector<6x8x1xf32>
    %33 = vector.broadcast %32 : vector<6x8x1xf32> to vector<6x8x8xf32>
    %34 = arith.subf %30, %33 : vector<6x8x8xf32>
    %35 = math.exp %34 : vector<6x8x8xf32>
    %cst_14 = arith.constant dense<0.000000e+00> : vector<6x8xf32>
    %36 = vector.multi_reduction <add>, %35, %cst_14 [2] : vector<6x8x8xf32> to vector<6x8xf32>
    %37 = vector.shape_cast %36 : vector<6x8xf32> to vector<6x8x1xf32>
    %38 = tpu.reciprocal %37 {approx = true} : vector<6x8x1xf32> -> vector<6x8x1xf32>
    %39 = vector.broadcast %38 : vector<6x8x1xf32> to vector<6x8x8xf32>
    %40 = arith.mulf %35, %39 : vector<6x8x8xf32>
    %41 = arith.truncf %40 : vector<6x8x8xf32> to vector<6x8x8xbf16>
    %cst_15 = arith.constant dense<0.000000e+00> : vector<6x8x16xf32>
    %42 = tpu.matmul %41, %23, %cst_15 {dimension_numbers = #tpu.dot_dimension_numbers<[2], [1], [1], [2], [0, 0, 0, 1, 1, 2], [0], [0]>} : vector<6x8x8xbf16>, vector<6x8x16xbf16>, vector<6x8x16xf32> -> vector<6x8x16xf32>
    %43 = vector.extract_strided_slice %17 {offsets = [0, 0, 16], sizes = [6, 8, 16], strides = [1, 1, 1]} : vector<6x8x96xf32> to vector<6x8x16xf32>
    %44 = arith.truncf %43 : vector<6x8x16xf32> to vector<6x8x16xbf16>
    %45 = vector.extract_strided_slice %17 {offsets = [0, 0, 48], sizes = [6, 8, 16], strides = [1, 1, 1]} : vector<6x8x96xf32> to vector<6x8x16xf32>
    %46 = arith.truncf %45 : vector<6x8x16xf32> to vector<6x8x16xbf16>
    %47 = vector.extract_strided_slice %17 {offsets = [0, 0, 80], sizes = [6, 8, 16], strides = [1, 1, 1]} : vector<6x8x96xf32> to vector<6x8x16xf32>
    %48 = arith.truncf %47 : vector<6x8x16xf32> to vector<6x8x16xbf16>
    %cst_16 = arith.constant dense<0.000000e+00> : vector<6x8x8xf32>
    %49 = tpu.matmul %44, %46, %cst_16 {dimension_numbers = #tpu.dot_dimension_numbers<[2], [2], [1], [1], [0, 0, 0, 1, 1, 1], [0], [0]>} : vector<6x8x16xbf16>, vector<6x8x16xbf16>, vector<6x8x8xf32> -> vector<6x8x8xf32>
    %cst_17 = arith.constant 2.500000e-01 : f32
    %50 = vector.broadcast %cst_17 : f32 to vector<6x8x8xf32>
    %51 = arith.mulf %49, %50 : vector<6x8x8xf32>
    %cst_18 = arith.constant -1.000000e+30 : f32
    %52 = vector.shape_cast %3 : vector<6x1x8xi1> to vector<6x1x8xi1>
    %53 = vector.broadcast %52 : vector<6x1x8xi1> to vector<6x8x8xi1>
    %54 = vector.broadcast %cst_18 : f32 to vector<6x8x8xf32>
    %55 = arith.select %53, %51, %54 : vector<6x8x8xi1>, vector<6x8x8xf32>
    %cst_19 = arith.constant dense<0xFF800000> : vector<6x8xf32>
    %56 = vector.multi_reduction <maximumf>, %55, %cst_19 [2] : vector<6x8x8xf32> to vector<6x8xf32>
    %57 = vector.shape_cast %56 : vector<6x8xf32> to vector<6x8x1xf32>
    %58 = vector.broadcast %57 : vector<6x8x1xf32> to vector<6x8x8xf32>
    %59 = arith.subf %55, %58 : vector<6x8x8xf32>
    %60 = math.exp %59 : vector<6x8x8xf32>
    %cst_20 = arith.constant dense<0.000000e+00> : vector<6x8xf32>
    %61 = vector.multi_reduction <add>, %60, %cst_20 [2] : vector<6x8x8xf32> to vector<6x8xf32>
    %62 = vector.shape_cast %61 : vector<6x8xf32> to vector<6x8x1xf32>
    %63 = tpu.reciprocal %62 {approx = true} : vector<6x8x1xf32> -> vector<6x8x1xf32>
    %64 = vector.broadcast %63 : vector<6x8x1xf32> to vector<6x8x8xf32>
    %65 = arith.mulf %60, %64 : vector<6x8x8xf32>
    %66 = arith.truncf %65 : vector<6x8x8xf32> to vector<6x8x8xbf16>
    %cst_21 = arith.constant dense<0.000000e+00> : vector<6x8x16xf32>
    %67 = tpu.matmul %66, %48, %cst_21 {dimension_numbers = #tpu.dot_dimension_numbers<[2], [1], [1], [2], [0, 0, 0, 1, 1, 2], [0], [0]>} : vector<6x8x8xbf16>, vector<6x8x16xbf16>, vector<6x8x16xf32> -> vector<6x8x16xf32>
    %68 = tpu.concatenate %42, %67 in 2 : vector<6x8x16xf32>, vector<6x8x16xf32> -> vector<6x8x32xf32>
    %69 = vector.shape_cast %68 : vector<6x8x32xf32> to vector<48x32xf32>
    %70 = arith.truncf %69 : vector<48x32xf32> to vector<48x32xbf16>
    %c0_22 = arith.constant 0 : index
    %c0_23 = arith.constant 0 : index
    %c0_24 = arith.constant 0 : index
    %71 = vector.load %arg5[%c0_22, %c0_23, %c0_24] : memref<2x32x32xbf16, #tpu.memory_space<vmem>>, vector<1x32x32xbf16>
    %72 = vector.shape_cast %71 : vector<1x32x32xbf16> to vector<32x32xbf16>
    %cst_25 = arith.constant dense<0.000000e+00> : vector<48x32xf32>
    %73 = tpu.matmul %70, %72, %cst_25 {dimension_numbers = #tpu.dot_dimension_numbers<[1], [0], [0], [1], [0, 0, 1, 1], [], []>} : vector<48x32xbf16>, vector<32x32xbf16>, vector<48x32xf32> -> vector<48x32xf32>
    %c0_26 = arith.constant 0 : index
    %c0_27 = arith.constant 0 : index
    %c0_28 = arith.constant 0 : index
    %74 = vector.load %arg6[%c0_26, %c0_27, %c0_28] : memref<2x1x32xf32, #tpu.memory_space<vmem>>, vector<1x1x32xf32>
    %75 = vector.shape_cast %74 : vector<1x1x32xf32> to vector<1x32xf32>
    %76 = vector.broadcast %75 : vector<1x32xf32> to vector<48x32xf32>
    %77 = arith.addf %73, %76 : vector<48x32xf32>
    %78 = arith.addf %77, %8 : vector<48x32xf32>
    %79 = arith.truncf %78 : vector<48x32xf32> to vector<48x32xbf16>
    %c0_29 = arith.constant 0 : index
    %c0_30 = arith.constant 0 : index
    %c0_31 = arith.constant 0 : index
    %80 = vector.load %arg7[%c0_29, %c0_30, %c0_31] : memref<3x32x32xbf16, #tpu.memory_space<vmem>>, vector<1x32x32xbf16>
    %81 = vector.shape_cast %80 : vector<1x32x32xbf16> to vector<32x32xbf16>
    %cst_32 = arith.constant dense<0.000000e+00> : vector<48x32xf32>
    %82 = tpu.matmul %79, %81, %cst_32 {dimension_numbers = #tpu.dot_dimension_numbers<[1], [0], [0], [1], [0, 0, 1, 1], [], []>} : vector<48x32xbf16>, vector<32x32xbf16>, vector<48x32xf32> -> vector<48x32xf32>
    %c0_33 = arith.constant 0 : index
    %c0_34 = arith.constant 0 : index
    %c0_35 = arith.constant 0 : index
    %83 = vector.load %arg8[%c0_33, %c0_34, %c0_35] : memref<3x1x32xf32, #tpu.memory_space<vmem>>, vector<1x1x32xf32>
    %84 = vector.shape_cast %83 : vector<1x1x32xf32> to vector<1x32xf32>
    %85 = vector.broadcast %84 : vector<1x32xf32> to vector<48x32xf32>
    %86 = arith.addf %82, %85 : vector<48x32xf32>
    %cst_36 = arith.constant 0.000000e+00 : f32
    %87 = vector.broadcast %cst_36 : f32 to vector<48x32xf32>
    %88 = arith.maximumf %86, %87 : vector<48x32xf32>
    %89 = arith.addf %78, %88 : vector<48x32xf32>
    %90 = arith.truncf %89 : vector<48x32xf32> to vector<48x32xbf16>
    %c0_37 = arith.constant 0 : index
    %c0_38 = arith.constant 0 : index
    %91 = vector.load %arg9[%c0_37, %c0_38] : memref<32x32xbf16, #tpu.memory_space<vmem>>, vector<32x32xbf16>
    %cst_39 = arith.constant dense<0.000000e+00> : vector<48x32xf32>
    %92 = tpu.matmul %90, %91, %cst_39 {dimension_numbers = #tpu.dot_dimension_numbers<[1], [0], [0], [1], [0, 0, 1, 1], [], []>} : vector<48x32xbf16>, vector<32x32xbf16>, vector<48x32xf32> -> vector<48x32xf32>
    %c0_40 = arith.constant 0 : index
    %c0_41 = arith.constant 0 : index
    %93 = vector.load %arg10[%c0_40, %c0_41] : memref<1x32xf32, #tpu.memory_space<vmem>>, vector<1x32xf32>
    %94 = vector.broadcast %93 : vector<1x32xf32> to vector<48x32xf32>
    %95 = arith.addf %92, %94 : vector<48x32xf32>
    %cst_42 = arith.constant 0.000000e+00 : f32
    %96 = vector.broadcast %cst_42 : f32 to vector<48x32xf32>
    %97 = arith.maximumf %95, %96 : vector<48x32xf32>
    %98 = arith.truncf %97 : vector<48x32xf32> to vector<48x32xbf16>
    %c0_43 = arith.constant 0 : index
    %c0_44 = arith.constant 0 : index
    %99 = vector.load %arg11[%c0_43, %c0_44] : memref<32x64xbf16, #tpu.memory_space<vmem>>, vector<32x64xbf16>
    %cst_45 = arith.constant dense<0.000000e+00> : vector<48x64xf32>
    %100 = tpu.matmul %98, %99, %cst_45 {dimension_numbers = #tpu.dot_dimension_numbers<[1], [0], [0], [1], [0, 0, 1, 1], [], []>} : vector<48x32xbf16>, vector<32x64xbf16>, vector<48x64xf32> -> vector<48x64xf32>
    %c0_46 = arith.constant 0 : index
    %c0_47 = arith.constant 0 : index
    %101 = vector.load %arg12[%c0_46, %c0_47] : memref<1x64xf32, #tpu.memory_space<vmem>>, vector<1x64xf32>
    %102 = vector.broadcast %101 : vector<1x64xf32> to vector<48x64xf32>
    %103 = arith.addf %100, %102 : vector<48x64xf32>
    %104 = vector.shape_cast %103 : vector<48x64xf32> to vector<6x8x64xf32>
    %c0_48 = arith.constant 0 : index
    %c0_49 = arith.constant 0 : index
    %105 = vector.load %arg13[%c0_48, %c0_49] : memref<1x32xf32, #tpu.memory_space<vmem>>, vector<1x32xf32>
    %106 = vector.extract_strided_slice %104 {offsets = [0, 0, 0], sizes = [6, 8, 16], strides = [1, 1, 1]} : vector<6x8x64xf32> to vector<6x8x16xf32>
    %107 = vector.extract_strided_slice %104 {offsets = [0, 0, 32], sizes = [6, 8, 16], strides = [1, 1, 1]} : vector<6x8x64xf32> to vector<6x8x16xf32>
    %108 = vector.extract_strided_slice %105 {offsets = [0, 0], sizes = [1, 16], strides = [1, 1]} : vector<1x32xf32> to vector<1x16xf32>
    %109 = vector.shape_cast %108 : vector<1x16xf32> to vector<1x1x16xf32>
    %110 = vector.broadcast %109 : vector<1x1x16xf32> to vector<6x8x16xf32>
    %111 = arith.mulf %106, %110 : vector<6x8x16xf32>
    %cst_50 = arith.constant dense<0.000000e+00> : vector<6x8xf32>
    %112 = vector.multi_reduction <add>, %111, %cst_50 [2] : vector<6x8x16xf32> to vector<6x8xf32>
    %cst_51 = arith.constant 2.500000e-01 : f32
    %113 = vector.broadcast %cst_51 : f32 to vector<6x8xf32>
    %114 = arith.mulf %112, %113 : vector<6x8xf32>
    %cst_52 = arith.constant -1.000000e+30 : f32
    %115 = vector.broadcast %cst_52 : f32 to vector<6x8xf32>
    %116 = arith.select %7, %114, %115 : vector<6x8xi1>, vector<6x8xf32>
    %cst_53 = arith.constant dense<0xFF800000> : vector<6xf32>
    %117 = vector.multi_reduction <maximumf>, %116, %cst_53 [1] : vector<6x8xf32> to vector<6xf32>
    %118 = vector.shape_cast %117 : vector<6xf32> to vector<6x1xf32>
    %119 = vector.broadcast %118 : vector<6x1xf32> to vector<6x8xf32>
    %120 = arith.subf %116, %119 : vector<6x8xf32>
    %121 = math.exp %120 : vector<6x8xf32>
    %cst_54 = arith.constant dense<0.000000e+00> : vector<6xf32>
    %122 = vector.multi_reduction <add>, %121, %cst_54 [1] : vector<6x8xf32> to vector<6xf32>
    %123 = vector.shape_cast %122 : vector<6xf32> to vector<6x1xf32>
    %124 = tpu.reciprocal %123 {approx = true} : vector<6x1xf32> -> vector<6x1xf32>
    %125 = vector.broadcast %124 : vector<6x1xf32> to vector<6x8xf32>
    %126 = arith.mulf %121, %125 : vector<6x8xf32>
    %127 = vector.shape_cast %126 : vector<6x8xf32> to vector<6x8x1xf32>
    %128 = vector.broadcast %127 : vector<6x8x1xf32> to vector<6x8x16xf32>
    %129 = arith.mulf %128, %107 : vector<6x8x16xf32>
    %cst_55 = arith.constant dense<0.000000e+00> : vector<6x16xf32>
    %130 = vector.multi_reduction <add>, %129, %cst_55 [1] : vector<6x8x16xf32> to vector<6x16xf32>
    %131 = vector.extract_strided_slice %104 {offsets = [0, 0, 16], sizes = [6, 8, 16], strides = [1, 1, 1]} : vector<6x8x64xf32> to vector<6x8x16xf32>
    %132 = vector.extract_strided_slice %104 {offsets = [0, 0, 48], sizes = [6, 8, 16], strides = [1, 1, 1]} : vector<6x8x64xf32> to vector<6x8x16xf32>
    %133 = vector.extract_strided_slice %105 {offsets = [0, 16], sizes = [1, 16], strides = [1, 1]} : vector<1x32xf32> to vector<1x16xf32>
    %134 = vector.shape_cast %133 : vector<1x16xf32> to vector<1x1x16xf32>
    %135 = vector.broadcast %134 : vector<1x1x16xf32> to vector<6x8x16xf32>
    %136 = arith.mulf %131, %135 : vector<6x8x16xf32>
    %cst_56 = arith.constant dense<0.000000e+00> : vector<6x8xf32>
    %137 = vector.multi_reduction <add>, %136, %cst_56 [2] : vector<6x8x16xf32> to vector<6x8xf32>
    %cst_57 = arith.constant 2.500000e-01 : f32
    %138 = vector.broadcast %cst_57 : f32 to vector<6x8xf32>
    %139 = arith.mulf %137, %138 : vector<6x8xf32>
    %cst_58 = arith.constant -1.000000e+30 : f32
    %140 = vector.broadcast %cst_58 : f32 to vector<6x8xf32>
    %141 = arith.select %7, %139, %140 : vector<6x8xi1>, vector<6x8xf32>
    %cst_59 = arith.constant dense<0xFF800000> : vector<6xf32>
    %142 = vector.multi_reduction <maximumf>, %141, %cst_59 [1] : vector<6x8xf32> to vector<6xf32>
    %143 = vector.shape_cast %142 : vector<6xf32> to vector<6x1xf32>
    %144 = vector.broadcast %143 : vector<6x1xf32> to vector<6x8xf32>
    %145 = arith.subf %141, %144 : vector<6x8xf32>
    %146 = math.exp %145 : vector<6x8xf32>
    %cst_60 = arith.constant dense<0.000000e+00> : vector<6xf32>
    %147 = vector.multi_reduction <add>, %146, %cst_60 [1] : vector<6x8xf32> to vector<6xf32>
    %148 = vector.shape_cast %147 : vector<6xf32> to vector<6x1xf32>
    %149 = tpu.reciprocal %148 {approx = true} : vector<6x1xf32> -> vector<6x1xf32>
    %150 = vector.broadcast %149 : vector<6x1xf32> to vector<6x8xf32>
    %151 = arith.mulf %146, %150 : vector<6x8xf32>
    %152 = vector.shape_cast %151 : vector<6x8xf32> to vector<6x8x1xf32>
    %153 = vector.broadcast %152 : vector<6x8x1xf32> to vector<6x8x16xf32>
    %154 = arith.mulf %153, %132 : vector<6x8x16xf32>
    %cst_61 = arith.constant dense<0.000000e+00> : vector<6x16xf32>
    %155 = vector.multi_reduction <add>, %154, %cst_61 [1] : vector<6x8x16xf32> to vector<6x16xf32>
    %156 = tpu.concatenate %130, %155 in 1 : vector<6x16xf32>, vector<6x16xf32> -> vector<6x32xf32>
    %157 = arith.truncf %156 : vector<6x32xf32> to vector<6x32xbf16>
    %c1 = arith.constant 1 : index
    %c0_62 = arith.constant 0 : index
    %c0_63 = arith.constant 0 : index
    %158 = vector.load %arg5[%c1, %c0_62, %c0_63] : memref<2x32x32xbf16, #tpu.memory_space<vmem>>, vector<1x32x32xbf16>
    %159 = vector.shape_cast %158 : vector<1x32x32xbf16> to vector<32x32xbf16>
    %cst_64 = arith.constant dense<0.000000e+00> : vector<6x32xf32>
    %160 = tpu.matmul %157, %159, %cst_64 {dimension_numbers = #tpu.dot_dimension_numbers<[1], [0], [0], [1], [0, 0, 1, 1], [], []>} : vector<6x32xbf16>, vector<32x32xbf16>, vector<6x32xf32> -> vector<6x32xf32>
    %c1_65 = arith.constant 1 : index
    %c0_66 = arith.constant 0 : index
    %c0_67 = arith.constant 0 : index
    %161 = vector.load %arg6[%c1_65, %c0_66, %c0_67] : memref<2x1x32xf32, #tpu.memory_space<vmem>>, vector<1x1x32xf32>
    %162 = vector.shape_cast %161 : vector<1x1x32xf32> to vector<1x32xf32>
    %163 = vector.broadcast %162 : vector<1x32xf32> to vector<6x32xf32>
    %164 = arith.addf %160, %163 : vector<6x32xf32>
    %c0_68 = arith.constant 0 : index
    %c0_69 = arith.constant 0 : index
    %165 = vector.load %arg14[%c0_68, %c0_69] : memref<1x32xf32, #tpu.memory_space<vmem>>, vector<1x32xf32>
    %166 = vector.broadcast %165 : vector<1x32xf32> to vector<6x32xf32>
    %167 = arith.addf %164, %166 : vector<6x32xf32>
    %168 = arith.truncf %167 : vector<6x32xf32> to vector<6x32xbf16>
    %c1_70 = arith.constant 1 : index
    %c0_71 = arith.constant 0 : index
    %c0_72 = arith.constant 0 : index
    %169 = vector.load %arg7[%c1_70, %c0_71, %c0_72] : memref<3x32x32xbf16, #tpu.memory_space<vmem>>, vector<1x32x32xbf16>
    %170 = vector.shape_cast %169 : vector<1x32x32xbf16> to vector<32x32xbf16>
    %cst_73 = arith.constant dense<0.000000e+00> : vector<6x32xf32>
    %171 = tpu.matmul %168, %170, %cst_73 {dimension_numbers = #tpu.dot_dimension_numbers<[1], [0], [0], [1], [0, 0, 1, 1], [], []>} : vector<6x32xbf16>, vector<32x32xbf16>, vector<6x32xf32> -> vector<6x32xf32>
    %c1_74 = arith.constant 1 : index
    %c0_75 = arith.constant 0 : index
    %c0_76 = arith.constant 0 : index
    %172 = vector.load %arg8[%c1_74, %c0_75, %c0_76] : memref<3x1x32xf32, #tpu.memory_space<vmem>>, vector<1x1x32xf32>
    %173 = vector.shape_cast %172 : vector<1x1x32xf32> to vector<1x32xf32>
    %174 = vector.broadcast %173 : vector<1x32xf32> to vector<6x32xf32>
    %175 = arith.addf %171, %174 : vector<6x32xf32>
    %cst_77 = arith.constant 0.000000e+00 : f32
    %176 = vector.broadcast %cst_77 : f32 to vector<6x32xf32>
    %177 = arith.maximumf %175, %176 : vector<6x32xf32>
    %178 = arith.addf %167, %177 : vector<6x32xf32>
    %179 = arith.truncf %178 : vector<6x32xf32> to vector<6x32xbf16>
    %c0_78 = arith.constant 0 : index
    %c0_79 = arith.constant 0 : index
    %c0_80 = arith.constant 0 : index
    %180 = vector.load %arg15[%c0_78, %c0_79, %c0_80] : memref<1x32x32xbf16, #tpu.memory_space<vmem>>, vector<1x32x32xbf16>
    %181 = vector.shape_cast %180 : vector<1x32x32xbf16> to vector<32x32xbf16>
    %cst_81 = arith.constant dense<0.000000e+00> : vector<6x32xf32>
    %182 = tpu.matmul %179, %181, %cst_81 {dimension_numbers = #tpu.dot_dimension_numbers<[1], [0], [0], [1], [0, 0, 1, 1], [], []>} : vector<6x32xbf16>, vector<32x32xbf16>, vector<6x32xf32> -> vector<6x32xf32>
    %183 = arith.addf %178, %182 : vector<6x32xf32>
    %c0_82 = arith.constant 0 : index
    %c0_83 = arith.constant 0 : index
    %c0_84 = arith.constant 0 : index
    %184 = vector.load %arg16[%c0_82, %c0_83, %c0_84] : memref<1x1x32xf32, #tpu.memory_space<vmem>>, vector<1x1x32xf32>
    %185 = vector.shape_cast %184 : vector<1x1x32xf32> to vector<1x32xf32>
    %186 = vector.broadcast %185 : vector<1x32xf32> to vector<6x32xf32>
    %187 = arith.addf %183, %186 : vector<6x32xf32>
    %188 = arith.truncf %187 : vector<6x32xf32> to vector<6x32xbf16>
    %c2 = arith.constant 2 : index
    %c0_85 = arith.constant 0 : index
    %c0_86 = arith.constant 0 : index
    %189 = vector.load %arg7[%c2, %c0_85, %c0_86] : memref<3x32x32xbf16, #tpu.memory_space<vmem>>, vector<1x32x32xbf16>
    %190 = vector.shape_cast %189 : vector<1x32x32xbf16> to vector<32x32xbf16>
    %cst_87 = arith.constant dense<0.000000e+00> : vector<6x32xf32>
    %191 = tpu.matmul %188, %190, %cst_87 {dimension_numbers = #tpu.dot_dimension_numbers<[1], [0], [0], [1], [0, 0, 1, 1], [], []>} : vector<6x32xbf16>, vector<32x32xbf16>, vector<6x32xf32> -> vector<6x32xf32>
    %c2_88 = arith.constant 2 : index
    %c0_89 = arith.constant 0 : index
    %c0_90 = arith.constant 0 : index
    %192 = vector.load %arg8[%c2_88, %c0_89, %c0_90] : memref<3x1x32xf32, #tpu.memory_space<vmem>>, vector<1x1x32xf32>
    %193 = vector.shape_cast %192 : vector<1x1x32xf32> to vector<1x32xf32>
    %194 = vector.broadcast %193 : vector<1x32xf32> to vector<6x32xf32>
    %195 = arith.addf %191, %194 : vector<6x32xf32>
    %cst_91 = arith.constant 0.000000e+00 : f32
    %196 = vector.broadcast %cst_91 : f32 to vector<6x32xf32>
    %197 = arith.maximumf %195, %196 : vector<6x32xf32>
    %198 = arith.addf %187, %197 : vector<6x32xf32>
    %199 = arith.cmpf one, %198, %198 : vector<6x32xf32>
    %cst_92 = arith.constant 0.000000e+00 : f32
    %200 = vector.broadcast %cst_92 : f32 to vector<6x32xf32>
    %201 = arith.select %199, %200, %198 : vector<6x32xi1>, vector<6x32xf32>
    %cst_93 = arith.constant -3.40282347E+38 : f32
    %cst_94 = arith.constant 3.40282347E+38 : f32
    %202 = vector.broadcast %cst_93 : f32 to vector<6x32xf32>
    %203 = arith.maximumf %202, %201 : vector<6x32xf32>
    %204 = vector.broadcast %cst_94 : f32 to vector<6x32xf32>
    %205 = arith.minimumf %204, %203 : vector<6x32xf32>
    %206 = vector.shape_cast %205 : vector<6x32xf32> to vector<1x6x32xf32>
    %c0_95 = arith.constant 0 : index
    %c0_96 = arith.constant 0 : index
    %c0_97 = arith.constant 0 : index
    %207 = vector.load %arg17[%c0_95, %c0_96, %c0_97] : memref<1x6x32xf32, #tpu.memory_space<vmem>>, vector<1x6x32xf32>
    tpu.vector_store %arg17[%c0_95, %c0_96, %c0_97], %206 {strides = array<i32>} : memref<1x6x32xf32, #tpu.memory_space<vmem>>, vector<1x6x32xf32>,
    return
  }
  func.func @transform_0(%arg0: i32) -> (i32, i32) {
    %c0_i32 = arith.constant 0 : i32
    %c0_i32_0 = arith.constant 0 : i32
    return %arg0, %c0_i32 : i32, i32
  }
  func.func @transform_1(%arg0: i32) -> (i32, i32, i32) {
    %c0_i32 = arith.constant 0 : i32
    %c0_i32_0 = arith.constant 0 : i32
    %c0_i32_1 = arith.constant 0 : i32
    return %arg0, %c0_i32, %c0_i32_0 : i32, i32, i32
  }
  func.func @transform_2(%arg0: i32) -> (i32, i32, i32) {
    %c0_i32 = arith.constant 0 : i32
    %c0_i32_0 = arith.constant 0 : i32
    %c0_i32_1 = arith.constant 0 : i32
    %c0_i32_2 = arith.constant 0 : i32
    return %c0_i32, %c0_i32_0, %c0_i32_1 : i32, i32, i32
  }
  func.func @transform_3(%arg0: i32) -> (i32, i32, i32) {
    %c0_i32 = arith.constant 0 : i32
    %c0_i32_0 = arith.constant 0 : i32
    %c0_i32_1 = arith.constant 0 : i32
    %c0_i32_2 = arith.constant 0 : i32
    return %c0_i32, %c0_i32_0, %c0_i32_1 : i32, i32, i32
  }
  func.func @transform_4(%arg0: i32) -> (i32, i32, i32) {
    %c0_i32 = arith.constant 0 : i32
    %c0_i32_0 = arith.constant 0 : i32
    %c0_i32_1 = arith.constant 0 : i32
    %c0_i32_2 = arith.constant 0 : i32
    return %c0_i32, %c0_i32_0, %c0_i32_1 : i32, i32, i32
  }
  func.func @transform_5(%arg0: i32) -> (i32, i32, i32) {
    %c0_i32 = arith.constant 0 : i32
    %c0_i32_0 = arith.constant 0 : i32
    %c0_i32_1 = arith.constant 0 : i32
    %c0_i32_2 = arith.constant 0 : i32
    return %c0_i32, %c0_i32_0, %c0_i32_1 : i32, i32, i32
  }
  func.func @transform_6(%arg0: i32) -> (i32, i32, i32) {
    %c0_i32 = arith.constant 0 : i32
    %c0_i32_0 = arith.constant 0 : i32
    %c0_i32_1 = arith.constant 0 : i32
    %c0_i32_2 = arith.constant 0 : i32
    return %c0_i32, %c0_i32_0, %c0_i32_1 : i32, i32, i32
  }
  func.func @transform_7(%arg0: i32) -> (i32, i32, i32) {
    %c0_i32 = arith.constant 0 : i32
    %c0_i32_0 = arith.constant 0 : i32
    %c0_i32_1 = arith.constant 0 : i32
    %c0_i32_2 = arith.constant 0 : i32
    return %c0_i32, %c0_i32_0, %c0_i32_1 : i32, i32, i32
  }
  func.func @transform_8(%arg0: i32) -> (i32, i32) {
    %c0_i32 = arith.constant 0 : i32
    %c0_i32_0 = arith.constant 0 : i32
    %c0_i32_1 = arith.constant 0 : i32
    return %c0_i32, %c0_i32_0 : i32, i32
  }
  func.func @transform_9(%arg0: i32) -> (i32, i32) {
    %c0_i32 = arith.constant 0 : i32
    %c0_i32_0 = arith.constant 0 : i32
    %c0_i32_1 = arith.constant 0 : i32
    return %c0_i32, %c0_i32_0 : i32, i32
  }
  func.func @transform_10(%arg0: i32) -> (i32, i32) {
    %c0_i32 = arith.constant 0 : i32
    %c0_i32_0 = arith.constant 0 : i32
    %c0_i32_1 = arith.constant 0 : i32
    return %c0_i32, %c0_i32_0 : i32, i32
  }
  func.func @transform_11(%arg0: i32) -> (i32, i32) {
    %c0_i32 = arith.constant 0 : i32
    %c0_i32_0 = arith.constant 0 : i32
    %c0_i32_1 = arith.constant 0 : i32
    return %c0_i32, %c0_i32_0 : i32, i32
  }
  func.func @transform_12(%arg0: i32) -> (i32, i32) {
    %c0_i32 = arith.constant 0 : i32
    %c0_i32_0 = arith.constant 0 : i32
    %c0_i32_1 = arith.constant 0 : i32
    return %c0_i32, %c0_i32_0 : i32, i32
  }
  func.func @transform_13(%arg0: i32) -> (i32, i32) {
    %c0_i32 = arith.constant 0 : i32
    %c0_i32_0 = arith.constant 0 : i32
    %c0_i32_1 = arith.constant 0 : i32
    return %c0_i32, %c0_i32_0 : i32, i32
  }
  func.func @transform_14(%arg0: i32) -> (i32, i32, i32) {
    %c0_i32 = arith.constant 0 : i32
    %c0_i32_0 = arith.constant 0 : i32
    %c0_i32_1 = arith.constant 0 : i32
    %c0_i32_2 = arith.constant 0 : i32
    return %c0_i32, %c0_i32_0, %c0_i32_1 : i32, i32, i32
  }
  func.func @transform_15(%arg0: i32) -> (i32, i32, i32) {
    %c0_i32 = arith.constant 0 : i32
    %c0_i32_0 = arith.constant 0 : i32
    %c0_i32_1 = arith.constant 0 : i32
    %c0_i32_2 = arith.constant 0 : i32
    return %c0_i32, %c0_i32_0, %c0_i32_1 : i32, i32, i32
  }
  func.func @transform_16(%arg0: i32) -> (i32, i32, i32) {
    %c0_i32 = arith.constant 0 : i32
    %c0_i32_0 = arith.constant 0 : i32
    %c0_i32_1 = arith.constant 0 : i32
    return %arg0, %c0_i32, %c0_i32_0 : i32, i32, i32
  }
}

module attributes {stable_mosaic.version = 11 : i64} {
  func.func @_set_transformer_kernel(%arg0: i32, %arg1: memref<16x32xf32, #tpu.memory_space<vmem>>, %arg2: memref<2x1x1xi32, #tpu.memory_space<vmem>>, %arg3: memref<1x32x96xbf16, #tpu.memory_space<vmem>>, %arg4: memref<1x1x96xf32, #tpu.memory_space<vmem>>, %arg5: memref<2x32x32xbf16, #tpu.memory_space<vmem>>, %arg6: memref<2x1x32xf32, #tpu.memory_space<vmem>>, %arg7: memref<3x32x32xbf16, #tpu.memory_space<vmem>>, %arg8: memref<3x1x32xf32, #tpu.memory_space<vmem>>, %arg9: memref<32x32xbf16, #tpu.memory_space<vmem>>, %arg10: memref<1x32xf32, #tpu.memory_space<vmem>>, %arg11: memref<32x64xbf16, #tpu.memory_space<vmem>>, %arg12: memref<1x64xf32, #tpu.memory_space<vmem>>, %arg13: memref<1x32xf32, #tpu.memory_space<vmem>>, %arg14: memref<1x32xf32, #tpu.memory_space<vmem>>, %arg15: memref<1x32x32xbf16, #tpu.memory_space<vmem>>, %arg16: memref<1x1x32xf32, #tpu.memory_space<vmem>>, %arg17: memref<1x2x32xf32, #tpu.memory_space<vmem>>) attributes {dimension_semantics = [#tpu.dimension_semantics<parallel>], iteration_bounds = array<i64: 1>, scalar_prefetch = 0 : i64, scratch_operands = 0 : i64, tpu.core_type = #tpu.core_type<tc>, window_params = [{transform_indices = @transform_0, window_bounds = array<i64: 16, 32>}, {transform_indices = @transform_1, window_bounds = array<i64: 2, 1, 1>}, {pipeline_mode = #tpu.pipeline_mode<synchronous>, transform_indices = @transform_2, window_bounds = array<i64: 1, 32, 96>}, {pipeline_mode = #tpu.pipeline_mode<synchronous>, transform_indices = @transform_3, window_bounds = array<i64: 1, 1, 96>}, {pipeline_mode = #tpu.pipeline_mode<synchronous>, transform_indices = @transform_4, window_bounds = array<i64: 2, 32, 32>}, {pipeline_mode = #tpu.pipeline_mode<synchronous>, transform_indices = @transform_5, window_bounds = array<i64: 2, 1, 32>}, {pipeline_mode = #tpu.pipeline_mode<synchronous>, transform_indices = @transform_6, window_bounds = array<i64: 3, 32, 32>}, {pipeline_mode = #tpu.pipeline_mode<synchronous>, transform_indices = @transform_7, window_bounds = array<i64: 3, 1, 32>}, {pipeline_mode = #tpu.pipeline_mode<synchronous>, transform_indices = @transform_8, window_bounds = array<i64: 32, 32>}, {pipeline_mode = #tpu.pipeline_mode<synchronous>, transform_indices = @transform_9, window_bounds = array<i64: 1, 32>}, {pipeline_mode = #tpu.pipeline_mode<synchronous>, transform_indices = @transform_10, window_bounds = array<i64: 32, 64>}, {pipeline_mode = #tpu.pipeline_mode<synchronous>, transform_indices = @transform_11, window_bounds = array<i64: 1, 64>}, {pipeline_mode = #tpu.pipeline_mode<synchronous>, transform_indices = @transform_12, window_bounds = array<i64: 1, 32>}, {pipeline_mode = #tpu.pipeline_mode<synchronous>, transform_indices = @transform_13, window_bounds = array<i64: 1, 32>}, {pipeline_mode = #tpu.pipeline_mode<synchronous>, transform_indices = @transform_14, window_bounds = array<i64: 1, 32, 32>}, {pipeline_mode = #tpu.pipeline_mode<synchronous>, transform_indices = @transform_15, window_bounds = array<i64: 1, 1, 32>}, {transform_indices = @transform_16, window_bounds = array<i64: 1, 2, 32>}]} {
    %c0 = arith.constant 0 : index
    %c0_0 = arith.constant 0 : index
    %c0_1 = arith.constant 0 : index
    %0 = vector.load %arg2[%c0, %c0_0, %c0_1] : memref<2x1x1xi32, #tpu.memory_space<vmem>>, vector<2x1x1xi32>
    %1 = tpu.iota {dimensions = array<i32: 2>} : vector<2x1x8xi32>
    %2 = vector.broadcast %0 : vector<2x1x1xi32> to vector<2x1x8xi32>
    %3 = arith.cmpi slt, %1, %2 : vector<2x1x8xi32>
    %4 = tpu.iota {dimensions = array<i32: 1>} : vector<2x8xi32>
    %5 = vector.shape_cast %0 : vector<2x1x1xi32> to vector<2x1xi32>
    %6 = vector.broadcast %5 : vector<2x1xi32> to vector<2x8xi32>
    %7 = arith.cmpi slt, %4, %6 : vector<2x8xi32>
    %c0_2 = arith.constant 0 : index
    %c0_3 = arith.constant 0 : index
    %8 = vector.load %arg1[%c0_2, %c0_3] : memref<16x32xf32, #tpu.memory_space<vmem>>, vector<16x32xf32>
    %9 = arith.truncf %8 : vector<16x32xf32> to vector<16x32xbf16>
    %c0_4 = arith.constant 0 : index
    %c0_5 = arith.constant 0 : index
    %c0_6 = arith.constant 0 : index
    %10 = vector.load %arg3[%c0_4, %c0_5, %c0_6] : memref<1x32x96xbf16, #tpu.memory_space<vmem>>, vector<1x32x96xbf16>
    %11 = vector.shape_cast %10 : vector<1x32x96xbf16> to vector<32x96xbf16>
    %cst = arith.constant dense<0.000000e+00> : vector<16x96xf32>
    %12 = tpu.matmul %9, %11, %cst {dimension_numbers = #tpu.dot_dimension_numbers<[1], [0], [0], [1], [0, 0, 1, 1], [], []>} : vector<16x32xbf16>, vector<32x96xbf16>, vector<16x96xf32> -> vector<16x96xf32>
    %c0_7 = arith.constant 0 : index
    %c0_8 = arith.constant 0 : index
    %c0_9 = arith.constant 0 : index
    %13 = vector.load %arg4[%c0_7, %c0_8, %c0_9] : memref<1x1x96xf32, #tpu.memory_space<vmem>>, vector<1x1x96xf32>
    %14 = vector.shape_cast %13 : vector<1x1x96xf32> to vector<1x96xf32>
    %15 = vector.broadcast %14 : vector<1x96xf32> to vector<16x96xf32>
    %16 = arith.addf %12, %15 : vector<16x96xf32>
    %17 = vector.shape_cast %16 : vector<16x96xf32> to vector<2x8x96xf32>
    %18 = vector.extract_strided_slice %17 {offsets = [0, 0, 0], sizes = [2, 8, 16], strides = [1, 1, 1]} : vector<2x8x96xf32> to vector<2x8x16xf32>
    %19 = arith.truncf %18 : vector<2x8x16xf32> to vector<2x8x16xbf16>
    %20 = vector.extract_strided_slice %17 {offsets = [0, 0, 32], sizes = [2, 8, 16], strides = [1, 1, 1]} : vector<2x8x96xf32> to vector<2x8x16xf32>
    %21 = arith.truncf %20 : vector<2x8x16xf32> to vector<2x8x16xbf16>
    %22 = vector.extract_strided_slice %17 {offsets = [0, 0, 64], sizes = [2, 8, 16], strides = [1, 1, 1]} : vector<2x8x96xf32> to vector<2x8x16xf32>
    %23 = arith.truncf %22 : vector<2x8x16xf32> to vector<2x8x16xbf16>
    %cst_10 = arith.constant dense<0.000000e+00> : vector<2x8x8xf32>
    %24 = tpu.matmul %19, %21, %cst_10 {dimension_numbers = #tpu.dot_dimension_numbers<[2], [2], [1], [1], [0, 0, 0, 1, 1, 1], [0], [0]>} : vector<2x8x16xbf16>, vector<2x8x16xbf16>, vector<2x8x8xf32> -> vector<2x8x8xf32>
    %cst_11 = arith.constant 2.500000e-01 : f32
    %25 = vector.broadcast %cst_11 : f32 to vector<2x8x8xf32>
    %26 = arith.mulf %24, %25 : vector<2x8x8xf32>
    %cst_12 = arith.constant -1.000000e+30 : f32
    %27 = vector.shape_cast %3 : vector<2x1x8xi1> to vector<2x1x8xi1>
    %28 = vector.broadcast %27 : vector<2x1x8xi1> to vector<2x8x8xi1>
    %29 = vector.broadcast %cst_12 : f32 to vector<2x8x8xf32>
    %30 = arith.select %28, %26, %29 : vector<2x8x8xi1>, vector<2x8x8xf32>
    %cst_13 = arith.constant dense<0xFF800000> : vector<2x8xf32>
    %31 = vector.multi_reduction <maximumf>, %30, %cst_13 [2] : vector<2x8x8xf32> to vector<2x8xf32>
    %32 = vector.shape_cast %31 : vector<2x8xf32> to vector<2x8x1xf32>
    %33 = vector.broadcast %32 : vector<2x8x1xf32> to vector<2x8x8xf32>
    %34 = arith.subf %30, %33 : vector<2x8x8xf32>
    %35 = math.exp %34 : vector<2x8x8xf32>
    %cst_14 = arith.constant dense<0.000000e+00> : vector<2x8xf32>
    %36 = vector.multi_reduction <add>, %35, %cst_14 [2] : vector<2x8x8xf32> to vector<2x8xf32>
    %37 = vector.shape_cast %36 : vector<2x8xf32> to vector<2x8x1xf32>
    %38 = tpu.reciprocal %37 {approx = true} : vector<2x8x1xf32> -> vector<2x8x1xf32>
    %39 = vector.broadcast %38 : vector<2x8x1xf32> to vector<2x8x8xf32>
    %40 = arith.mulf %35, %39 : vector<2x8x8xf32>
    %41 = arith.truncf %40 : vector<2x8x8xf32> to vector<2x8x8xbf16>
    %cst_15 = arith.constant dense<0.000000e+00> : vector<2x8x16xf32>
    %42 = tpu.matmul %41, %23, %cst_15 {dimension_numbers = #tpu.dot_dimension_numbers<[2], [1], [1], [2], [0, 0, 0, 1, 1, 2], [0], [0]>} : vector<2x8x8xbf16>, vector<2x8x16xbf16>, vector<2x8x16xf32> -> vector<2x8x16xf32>
    %43 = vector.extract_strided_slice %17 {offsets = [0, 0, 16], sizes = [2, 8, 16], strides = [1, 1, 1]} : vector<2x8x96xf32> to vector<2x8x16xf32>
    %44 = arith.truncf %43 : vector<2x8x16xf32> to vector<2x8x16xbf16>
    %45 = vector.extract_strided_slice %17 {offsets = [0, 0, 48], sizes = [2, 8, 16], strides = [1, 1, 1]} : vector<2x8x96xf32> to vector<2x8x16xf32>
    %46 = arith.truncf %45 : vector<2x8x16xf32> to vector<2x8x16xbf16>
    %47 = vector.extract_strided_slice %17 {offsets = [0, 0, 80], sizes = [2, 8, 16], strides = [1, 1, 1]} : vector<2x8x96xf32> to vector<2x8x16xf32>
    %48 = arith.truncf %47 : vector<2x8x16xf32> to vector<2x8x16xbf16>
    %cst_16 = arith.constant dense<0.000000e+00> : vector<2x8x8xf32>
    %49 = tpu.matmul %44, %46, %cst_16 {dimension_numbers = #tpu.dot_dimension_numbers<[2], [2], [1], [1], [0, 0, 0, 1, 1, 1], [0], [0]>} : vector<2x8x16xbf16>, vector<2x8x16xbf16>, vector<2x8x8xf32> -> vector<2x8x8xf32>
    %cst_17 = arith.constant 2.500000e-01 : f32
    %50 = vector.broadcast %cst_17 : f32 to vector<2x8x8xf32>
    %51 = arith.mulf %49, %50 : vector<2x8x8xf32>
    %cst_18 = arith.constant -1.000000e+30 : f32
    %52 = vector.shape_cast %3 : vector<2x1x8xi1> to vector<2x1x8xi1>
    %53 = vector.broadcast %52 : vector<2x1x8xi1> to vector<2x8x8xi1>
    %54 = vector.broadcast %cst_18 : f32 to vector<2x8x8xf32>
    %55 = arith.select %53, %51, %54 : vector<2x8x8xi1>, vector<2x8x8xf32>
    %cst_19 = arith.constant dense<0xFF800000> : vector<2x8xf32>
    %56 = vector.multi_reduction <maximumf>, %55, %cst_19 [2] : vector<2x8x8xf32> to vector<2x8xf32>
    %57 = vector.shape_cast %56 : vector<2x8xf32> to vector<2x8x1xf32>
    %58 = vector.broadcast %57 : vector<2x8x1xf32> to vector<2x8x8xf32>
    %59 = arith.subf %55, %58 : vector<2x8x8xf32>
    %60 = math.exp %59 : vector<2x8x8xf32>
    %cst_20 = arith.constant dense<0.000000e+00> : vector<2x8xf32>
    %61 = vector.multi_reduction <add>, %60, %cst_20 [2] : vector<2x8x8xf32> to vector<2x8xf32>
    %62 = vector.shape_cast %61 : vector<2x8xf32> to vector<2x8x1xf32>
    %63 = tpu.reciprocal %62 {approx = true} : vector<2x8x1xf32> -> vector<2x8x1xf32>
    %64 = vector.broadcast %63 : vector<2x8x1xf32> to vector<2x8x8xf32>
    %65 = arith.mulf %60, %64 : vector<2x8x8xf32>
    %66 = arith.truncf %65 : vector<2x8x8xf32> to vector<2x8x8xbf16>
    %cst_21 = arith.constant dense<0.000000e+00> : vector<2x8x16xf32>
    %67 = tpu.matmul %66, %48, %cst_21 {dimension_numbers = #tpu.dot_dimension_numbers<[2], [1], [1], [2], [0, 0, 0, 1, 1, 2], [0], [0]>} : vector<2x8x8xbf16>, vector<2x8x16xbf16>, vector<2x8x16xf32> -> vector<2x8x16xf32>
    %68 = tpu.concatenate %42, %67 in 2 : vector<2x8x16xf32>, vector<2x8x16xf32> -> vector<2x8x32xf32>
    %69 = vector.shape_cast %68 : vector<2x8x32xf32> to vector<16x32xf32>
    %70 = arith.truncf %69 : vector<16x32xf32> to vector<16x32xbf16>
    %c0_22 = arith.constant 0 : index
    %c0_23 = arith.constant 0 : index
    %c0_24 = arith.constant 0 : index
    %71 = vector.load %arg5[%c0_22, %c0_23, %c0_24] : memref<2x32x32xbf16, #tpu.memory_space<vmem>>, vector<1x32x32xbf16>
    %72 = vector.shape_cast %71 : vector<1x32x32xbf16> to vector<32x32xbf16>
    %cst_25 = arith.constant dense<0.000000e+00> : vector<16x32xf32>
    %73 = tpu.matmul %70, %72, %cst_25 {dimension_numbers = #tpu.dot_dimension_numbers<[1], [0], [0], [1], [0, 0, 1, 1], [], []>} : vector<16x32xbf16>, vector<32x32xbf16>, vector<16x32xf32> -> vector<16x32xf32>
    %c0_26 = arith.constant 0 : index
    %c0_27 = arith.constant 0 : index
    %c0_28 = arith.constant 0 : index
    %74 = vector.load %arg6[%c0_26, %c0_27, %c0_28] : memref<2x1x32xf32, #tpu.memory_space<vmem>>, vector<1x1x32xf32>
    %75 = vector.shape_cast %74 : vector<1x1x32xf32> to vector<1x32xf32>
    %76 = vector.broadcast %75 : vector<1x32xf32> to vector<16x32xf32>
    %77 = arith.addf %73, %76 : vector<16x32xf32>
    %78 = arith.addf %77, %8 : vector<16x32xf32>
    %79 = arith.truncf %78 : vector<16x32xf32> to vector<16x32xbf16>
    %c0_29 = arith.constant 0 : index
    %c0_30 = arith.constant 0 : index
    %c0_31 = arith.constant 0 : index
    %80 = vector.load %arg7[%c0_29, %c0_30, %c0_31] : memref<3x32x32xbf16, #tpu.memory_space<vmem>>, vector<1x32x32xbf16>
    %81 = vector.shape_cast %80 : vector<1x32x32xbf16> to vector<32x32xbf16>
    %cst_32 = arith.constant dense<0.000000e+00> : vector<16x32xf32>
    %82 = tpu.matmul %79, %81, %cst_32 {dimension_numbers = #tpu.dot_dimension_numbers<[1], [0], [0], [1], [0, 0, 1, 1], [], []>} : vector<16x32xbf16>, vector<32x32xbf16>, vector<16x32xf32> -> vector<16x32xf32>
    %c0_33 = arith.constant 0 : index
    %c0_34 = arith.constant 0 : index
    %c0_35 = arith.constant 0 : index
    %83 = vector.load %arg8[%c0_33, %c0_34, %c0_35] : memref<3x1x32xf32, #tpu.memory_space<vmem>>, vector<1x1x32xf32>
    %84 = vector.shape_cast %83 : vector<1x1x32xf32> to vector<1x32xf32>
    %85 = vector.broadcast %84 : vector<1x32xf32> to vector<16x32xf32>
    %86 = arith.addf %82, %85 : vector<16x32xf32>
    %cst_36 = arith.constant 0.000000e+00 : f32
    %87 = vector.broadcast %cst_36 : f32 to vector<16x32xf32>
    %88 = arith.maximumf %86, %87 : vector<16x32xf32>
    %89 = arith.addf %78, %88 : vector<16x32xf32>
    %90 = arith.truncf %89 : vector<16x32xf32> to vector<16x32xbf16>
    %c0_37 = arith.constant 0 : index
    %c0_38 = arith.constant 0 : index
    %91 = vector.load %arg9[%c0_37, %c0_38] : memref<32x32xbf16, #tpu.memory_space<vmem>>, vector<32x32xbf16>
    %cst_39 = arith.constant dense<0.000000e+00> : vector<16x32xf32>
    %92 = tpu.matmul %90, %91, %cst_39 {dimension_numbers = #tpu.dot_dimension_numbers<[1], [0], [0], [1], [0, 0, 1, 1], [], []>} : vector<16x32xbf16>, vector<32x32xbf16>, vector<16x32xf32> -> vector<16x32xf32>
    %c0_40 = arith.constant 0 : index
    %c0_41 = arith.constant 0 : index
    %93 = vector.load %arg10[%c0_40, %c0_41] : memref<1x32xf32, #tpu.memory_space<vmem>>, vector<1x32xf32>
    %94 = vector.broadcast %93 : vector<1x32xf32> to vector<16x32xf32>
    %95 = arith.addf %92, %94 : vector<16x32xf32>
    %cst_42 = arith.constant 0.000000e+00 : f32
    %96 = vector.broadcast %cst_42 : f32 to vector<16x32xf32>
    %97 = arith.maximumf %95, %96 : vector<16x32xf32>
    %98 = arith.truncf %97 : vector<16x32xf32> to vector<16x32xbf16>
    %c0_43 = arith.constant 0 : index
    %c0_44 = arith.constant 0 : index
    %99 = vector.load %arg11[%c0_43, %c0_44] : memref<32x64xbf16, #tpu.memory_space<vmem>>, vector<32x64xbf16>
    %cst_45 = arith.constant dense<0.000000e+00> : vector<16x64xf32>
    %100 = tpu.matmul %98, %99, %cst_45 {dimension_numbers = #tpu.dot_dimension_numbers<[1], [0], [0], [1], [0, 0, 1, 1], [], []>} : vector<16x32xbf16>, vector<32x64xbf16>, vector<16x64xf32> -> vector<16x64xf32>
    %c0_46 = arith.constant 0 : index
    %c0_47 = arith.constant 0 : index
    %101 = vector.load %arg12[%c0_46, %c0_47] : memref<1x64xf32, #tpu.memory_space<vmem>>, vector<1x64xf32>
    %102 = vector.broadcast %101 : vector<1x64xf32> to vector<16x64xf32>
    %103 = arith.addf %100, %102 : vector<16x64xf32>
    %104 = vector.shape_cast %103 : vector<16x64xf32> to vector<2x8x64xf32>
    %c0_48 = arith.constant 0 : index
    %c0_49 = arith.constant 0 : index
    %105 = vector.load %arg13[%c0_48, %c0_49] : memref<1x32xf32, #tpu.memory_space<vmem>>, vector<1x32xf32>
    %106 = vector.extract_strided_slice %104 {offsets = [0, 0, 0], sizes = [2, 8, 16], strides = [1, 1, 1]} : vector<2x8x64xf32> to vector<2x8x16xf32>
    %107 = vector.extract_strided_slice %104 {offsets = [0, 0, 32], sizes = [2, 8, 16], strides = [1, 1, 1]} : vector<2x8x64xf32> to vector<2x8x16xf32>
    %108 = vector.extract_strided_slice %105 {offsets = [0, 0], sizes = [1, 16], strides = [1, 1]} : vector<1x32xf32> to vector<1x16xf32>
    %109 = vector.shape_cast %108 : vector<1x16xf32> to vector<1x1x16xf32>
    %110 = vector.broadcast %109 : vector<1x1x16xf32> to vector<2x8x16xf32>
    %111 = arith.mulf %106, %110 : vector<2x8x16xf32>
    %cst_50 = arith.constant dense<0.000000e+00> : vector<2x8xf32>
    %112 = vector.multi_reduction <add>, %111, %cst_50 [2] : vector<2x8x16xf32> to vector<2x8xf32>
    %cst_51 = arith.constant 2.500000e-01 : f32
    %113 = vector.broadcast %cst_51 : f32 to vector<2x8xf32>
    %114 = arith.mulf %112, %113 : vector<2x8xf32>
    %cst_52 = arith.constant -1.000000e+30 : f32
    %115 = vector.broadcast %cst_52 : f32 to vector<2x8xf32>
    %116 = arith.select %7, %114, %115 : vector<2x8xi1>, vector<2x8xf32>
    %cst_53 = arith.constant dense<0xFF800000> : vector<2xf32>
    %117 = vector.multi_reduction <maximumf>, %116, %cst_53 [1] : vector<2x8xf32> to vector<2xf32>
    %118 = vector.shape_cast %117 : vector<2xf32> to vector<2x1xf32>
    %119 = vector.broadcast %118 : vector<2x1xf32> to vector<2x8xf32>
    %120 = arith.subf %116, %119 : vector<2x8xf32>
    %121 = math.exp %120 : vector<2x8xf32>
    %cst_54 = arith.constant dense<0.000000e+00> : vector<2xf32>
    %122 = vector.multi_reduction <add>, %121, %cst_54 [1] : vector<2x8xf32> to vector<2xf32>
    %123 = vector.shape_cast %122 : vector<2xf32> to vector<2x1xf32>
    %124 = tpu.reciprocal %123 {approx = true} : vector<2x1xf32> -> vector<2x1xf32>
    %125 = vector.broadcast %124 : vector<2x1xf32> to vector<2x8xf32>
    %126 = arith.mulf %121, %125 : vector<2x8xf32>
    %127 = vector.shape_cast %126 : vector<2x8xf32> to vector<2x8x1xf32>
    %128 = vector.broadcast %127 : vector<2x8x1xf32> to vector<2x8x16xf32>
    %129 = arith.mulf %128, %107 : vector<2x8x16xf32>
    %cst_55 = arith.constant dense<0.000000e+00> : vector<2x16xf32>
    %130 = vector.multi_reduction <add>, %129, %cst_55 [1] : vector<2x8x16xf32> to vector<2x16xf32>
    %131 = vector.extract_strided_slice %104 {offsets = [0, 0, 16], sizes = [2, 8, 16], strides = [1, 1, 1]} : vector<2x8x64xf32> to vector<2x8x16xf32>
    %132 = vector.extract_strided_slice %104 {offsets = [0, 0, 48], sizes = [2, 8, 16], strides = [1, 1, 1]} : vector<2x8x64xf32> to vector<2x8x16xf32>
    %133 = vector.extract_strided_slice %105 {offsets = [0, 16], sizes = [1, 16], strides = [1, 1]} : vector<1x32xf32> to vector<1x16xf32>
    %134 = vector.shape_cast %133 : vector<1x16xf32> to vector<1x1x16xf32>
    %135 = vector.broadcast %134 : vector<1x1x16xf32> to vector<2x8x16xf32>
    %136 = arith.mulf %131, %135 : vector<2x8x16xf32>
    %cst_56 = arith.constant dense<0.000000e+00> : vector<2x8xf32>
    %137 = vector.multi_reduction <add>, %136, %cst_56 [2] : vector<2x8x16xf32> to vector<2x8xf32>
    %cst_57 = arith.constant 2.500000e-01 : f32
    %138 = vector.broadcast %cst_57 : f32 to vector<2x8xf32>
    %139 = arith.mulf %137, %138 : vector<2x8xf32>
    %cst_58 = arith.constant -1.000000e+30 : f32
    %140 = vector.broadcast %cst_58 : f32 to vector<2x8xf32>
    %141 = arith.select %7, %139, %140 : vector<2x8xi1>, vector<2x8xf32>
    %cst_59 = arith.constant dense<0xFF800000> : vector<2xf32>
    %142 = vector.multi_reduction <maximumf>, %141, %cst_59 [1] : vector<2x8xf32> to vector<2xf32>
    %143 = vector.shape_cast %142 : vector<2xf32> to vector<2x1xf32>
    %144 = vector.broadcast %143 : vector<2x1xf32> to vector<2x8xf32>
    %145 = arith.subf %141, %144 : vector<2x8xf32>
    %146 = math.exp %145 : vector<2x8xf32>
    %cst_60 = arith.constant dense<0.000000e+00> : vector<2xf32>
    %147 = vector.multi_reduction <add>, %146, %cst_60 [1] : vector<2x8xf32> to vector<2xf32>
    %148 = vector.shape_cast %147 : vector<2xf32> to vector<2x1xf32>
    %149 = tpu.reciprocal %148 {approx = true} : vector<2x1xf32> -> vector<2x1xf32>
    %150 = vector.broadcast %149 : vector<2x1xf32> to vector<2x8xf32>
    %151 = arith.mulf %146, %150 : vector<2x8xf32>
    %152 = vector.shape_cast %151 : vector<2x8xf32> to vector<2x8x1xf32>
    %153 = vector.broadcast %152 : vector<2x8x1xf32> to vector<2x8x16xf32>
    %154 = arith.mulf %153, %132 : vector<2x8x16xf32>
    %cst_61 = arith.constant dense<0.000000e+00> : vector<2x16xf32>
    %155 = vector.multi_reduction <add>, %154, %cst_61 [1] : vector<2x8x16xf32> to vector<2x16xf32>
    %156 = tpu.concatenate %130, %155 in 1 : vector<2x16xf32>, vector<2x16xf32> -> vector<2x32xf32>
    %157 = arith.truncf %156 : vector<2x32xf32> to vector<2x32xbf16>
    %c1 = arith.constant 1 : index
    %c0_62 = arith.constant 0 : index
    %c0_63 = arith.constant 0 : index
    %158 = vector.load %arg5[%c1, %c0_62, %c0_63] : memref<2x32x32xbf16, #tpu.memory_space<vmem>>, vector<1x32x32xbf16>
    %159 = vector.shape_cast %158 : vector<1x32x32xbf16> to vector<32x32xbf16>
    %cst_64 = arith.constant dense<0.000000e+00> : vector<2x32xf32>
    %160 = tpu.matmul %157, %159, %cst_64 {dimension_numbers = #tpu.dot_dimension_numbers<[1], [0], [0], [1], [0, 0, 1, 1], [], []>} : vector<2x32xbf16>, vector<32x32xbf16>, vector<2x32xf32> -> vector<2x32xf32>
    %c1_65 = arith.constant 1 : index
    %c0_66 = arith.constant 0 : index
    %c0_67 = arith.constant 0 : index
    %161 = vector.load %arg6[%c1_65, %c0_66, %c0_67] : memref<2x1x32xf32, #tpu.memory_space<vmem>>, vector<1x1x32xf32>
    %162 = vector.shape_cast %161 : vector<1x1x32xf32> to vector<1x32xf32>
    %163 = vector.broadcast %162 : vector<1x32xf32> to vector<2x32xf32>
    %164 = arith.addf %160, %163 : vector<2x32xf32>
    %c0_68 = arith.constant 0 : index
    %c0_69 = arith.constant 0 : index
    %165 = vector.load %arg14[%c0_68, %c0_69] : memref<1x32xf32, #tpu.memory_space<vmem>>, vector<1x32xf32>
    %166 = vector.broadcast %165 : vector<1x32xf32> to vector<2x32xf32>
    %167 = arith.addf %164, %166 : vector<2x32xf32>
    %168 = arith.truncf %167 : vector<2x32xf32> to vector<2x32xbf16>
    %c1_70 = arith.constant 1 : index
    %c0_71 = arith.constant 0 : index
    %c0_72 = arith.constant 0 : index
    %169 = vector.load %arg7[%c1_70, %c0_71, %c0_72] : memref<3x32x32xbf16, #tpu.memory_space<vmem>>, vector<1x32x32xbf16>
    %170 = vector.shape_cast %169 : vector<1x32x32xbf16> to vector<32x32xbf16>
    %cst_73 = arith.constant dense<0.000000e+00> : vector<2x32xf32>
    %171 = tpu.matmul %168, %170, %cst_73 {dimension_numbers = #tpu.dot_dimension_numbers<[1], [0], [0], [1], [0, 0, 1, 1], [], []>} : vector<2x32xbf16>, vector<32x32xbf16>, vector<2x32xf32> -> vector<2x32xf32>
    %c1_74 = arith.constant 1 : index
    %c0_75 = arith.constant 0 : index
    %c0_76 = arith.constant 0 : index
    %172 = vector.load %arg8[%c1_74, %c0_75, %c0_76] : memref<3x1x32xf32, #tpu.memory_space<vmem>>, vector<1x1x32xf32>
    %173 = vector.shape_cast %172 : vector<1x1x32xf32> to vector<1x32xf32>
    %174 = vector.broadcast %173 : vector<1x32xf32> to vector<2x32xf32>
    %175 = arith.addf %171, %174 : vector<2x32xf32>
    %cst_77 = arith.constant 0.000000e+00 : f32
    %176 = vector.broadcast %cst_77 : f32 to vector<2x32xf32>
    %177 = arith.maximumf %175, %176 : vector<2x32xf32>
    %178 = arith.addf %167, %177 : vector<2x32xf32>
    %179 = arith.truncf %178 : vector<2x32xf32> to vector<2x32xbf16>
    %c0_78 = arith.constant 0 : index
    %c0_79 = arith.constant 0 : index
    %c0_80 = arith.constant 0 : index
    %180 = vector.load %arg15[%c0_78, %c0_79, %c0_80] : memref<1x32x32xbf16, #tpu.memory_space<vmem>>, vector<1x32x32xbf16>
    %181 = vector.shape_cast %180 : vector<1x32x32xbf16> to vector<32x32xbf16>
    %cst_81 = arith.constant dense<0.000000e+00> : vector<2x32xf32>
    %182 = tpu.matmul %179, %181, %cst_81 {dimension_numbers = #tpu.dot_dimension_numbers<[1], [0], [0], [1], [0, 0, 1, 1], [], []>} : vector<2x32xbf16>, vector<32x32xbf16>, vector<2x32xf32> -> vector<2x32xf32>
    %183 = arith.addf %178, %182 : vector<2x32xf32>
    %c0_82 = arith.constant 0 : index
    %c0_83 = arith.constant 0 : index
    %c0_84 = arith.constant 0 : index
    %184 = vector.load %arg16[%c0_82, %c0_83, %c0_84] : memref<1x1x32xf32, #tpu.memory_space<vmem>>, vector<1x1x32xf32>
    %185 = vector.shape_cast %184 : vector<1x1x32xf32> to vector<1x32xf32>
    %186 = vector.broadcast %185 : vector<1x32xf32> to vector<2x32xf32>
    %187 = arith.addf %183, %186 : vector<2x32xf32>
    %188 = arith.truncf %187 : vector<2x32xf32> to vector<2x32xbf16>
    %c2 = arith.constant 2 : index
    %c0_85 = arith.constant 0 : index
    %c0_86 = arith.constant 0 : index
    %189 = vector.load %arg7[%c2, %c0_85, %c0_86] : memref<3x32x32xbf16, #tpu.memory_space<vmem>>, vector<1x32x32xbf16>
    %190 = vector.shape_cast %189 : vector<1x32x32xbf16> to vector<32x32xbf16>
    %cst_87 = arith.constant dense<0.000000e+00> : vector<2x32xf32>
    %191 = tpu.matmul %188, %190, %cst_87 {dimension_numbers = #tpu.dot_dimension_numbers<[1], [0], [0], [1], [0, 0, 1, 1], [], []>} : vector<2x32xbf16>, vector<32x32xbf16>, vector<2x32xf32> -> vector<2x32xf32>
    %c2_88 = arith.constant 2 : index
    %c0_89 = arith.constant 0 : index
    %c0_90 = arith.constant 0 : index
    %192 = vector.load %arg8[%c2_88, %c0_89, %c0_90] : memref<3x1x32xf32, #tpu.memory_space<vmem>>, vector<1x1x32xf32>
    %193 = vector.shape_cast %192 : vector<1x1x32xf32> to vector<1x32xf32>
    %194 = vector.broadcast %193 : vector<1x32xf32> to vector<2x32xf32>
    %195 = arith.addf %191, %194 : vector<2x32xf32>
    %cst_91 = arith.constant 0.000000e+00 : f32
    %196 = vector.broadcast %cst_91 : f32 to vector<2x32xf32>
    %197 = arith.maximumf %195, %196 : vector<2x32xf32>
    %198 = arith.addf %187, %197 : vector<2x32xf32>
    %199 = arith.cmpf one, %198, %198 : vector<2x32xf32>
    %cst_92 = arith.constant 0.000000e+00 : f32
    %200 = vector.broadcast %cst_92 : f32 to vector<2x32xf32>
    %201 = arith.select %199, %200, %198 : vector<2x32xi1>, vector<2x32xf32>
    %cst_93 = arith.constant -3.40282347E+38 : f32
    %cst_94 = arith.constant 3.40282347E+38 : f32
    %202 = vector.broadcast %cst_93 : f32 to vector<2x32xf32>
    %203 = arith.maximumf %202, %201 : vector<2x32xf32>
    %204 = vector.broadcast %cst_94 : f32 to vector<2x32xf32>
    %205 = arith.minimumf %204, %203 : vector<2x32xf32>
    %206 = vector.shape_cast %205 : vector<2x32xf32> to vector<1x2x32xf32>
    %c0_95 = arith.constant 0 : index
    %c0_96 = arith.constant 0 : index
    %c0_97 = arith.constant 0 : index
    %207 = vector.load %arg17[%c0_95, %c0_96, %c0_97] : memref<1x2x32xf32, #tpu.memory_space<vmem>>, vector<1x2x32xf32>
    tpu.vector_store %arg17[%c0_95, %c0_96, %c0_97], %206 {strides = array<i32>} : memref<1x2x32xf32, #tpu.memory_space<vmem>>, vector<1x2x32xf32>,
    return
  }
  func.func @transform_0(%arg0: i32) -> (i32, i32) {
    %c0_i32 = arith.constant 0 : i32
    %c0_i32_0 = arith.constant 0 : i32
    return %arg0, %c0_i32 : i32, i32
  }
  func.func @transform_1(%arg0: i32) -> (i32, i32, i32) {
    %c0_i32 = arith.constant 0 : i32
    %c0_i32_0 = arith.constant 0 : i32
    %c0_i32_1 = arith.constant 0 : i32
    return %arg0, %c0_i32, %c0_i32_0 : i32, i32, i32
  }
  func.func @transform_2(%arg0: i32) -> (i32, i32, i32) {
    %c0_i32 = arith.constant 0 : i32
    %c0_i32_0 = arith.constant 0 : i32
    %c0_i32_1 = arith.constant 0 : i32
    %c0_i32_2 = arith.constant 0 : i32
    return %c0_i32, %c0_i32_0, %c0_i32_1 : i32, i32, i32
  }
  func.func @transform_3(%arg0: i32) -> (i32, i32, i32) {
    %c0_i32 = arith.constant 0 : i32
    %c0_i32_0 = arith.constant 0 : i32
    %c0_i32_1 = arith.constant 0 : i32
    %c0_i32_2 = arith.constant 0 : i32
    return %c0_i32, %c0_i32_0, %c0_i32_1 : i32, i32, i32
  }
  func.func @transform_4(%arg0: i32) -> (i32, i32, i32) {
    %c0_i32 = arith.constant 0 : i32
    %c0_i32_0 = arith.constant 0 : i32
    %c0_i32_1 = arith.constant 0 : i32
    %c0_i32_2 = arith.constant 0 : i32
    return %c0_i32, %c0_i32_0, %c0_i32_1 : i32, i32, i32
  }
  func.func @transform_5(%arg0: i32) -> (i32, i32, i32) {
    %c0_i32 = arith.constant 0 : i32
    %c0_i32_0 = arith.constant 0 : i32
    %c0_i32_1 = arith.constant 0 : i32
    %c0_i32_2 = arith.constant 0 : i32
    return %c0_i32, %c0_i32_0, %c0_i32_1 : i32, i32, i32
  }
  func.func @transform_6(%arg0: i32) -> (i32, i32, i32) {
    %c0_i32 = arith.constant 0 : i32
    %c0_i32_0 = arith.constant 0 : i32
    %c0_i32_1 = arith.constant 0 : i32
    %c0_i32_2 = arith.constant 0 : i32
    return %c0_i32, %c0_i32_0, %c0_i32_1 : i32, i32, i32
  }
  func.func @transform_7(%arg0: i32) -> (i32, i32, i32) {
    %c0_i32 = arith.constant 0 : i32
    %c0_i32_0 = arith.constant 0 : i32
    %c0_i32_1 = arith.constant 0 : i32
    %c0_i32_2 = arith.constant 0 : i32
    return %c0_i32, %c0_i32_0, %c0_i32_1 : i32, i32, i32
  }
  func.func @transform_8(%arg0: i32) -> (i32, i32) {
    %c0_i32 = arith.constant 0 : i32
    %c0_i32_0 = arith.constant 0 : i32
    %c0_i32_1 = arith.constant 0 : i32
    return %c0_i32, %c0_i32_0 : i32, i32
  }
  func.func @transform_9(%arg0: i32) -> (i32, i32) {
    %c0_i32 = arith.constant 0 : i32
    %c0_i32_0 = arith.constant 0 : i32
    %c0_i32_1 = arith.constant 0 : i32
    return %c0_i32, %c0_i32_0 : i32, i32
  }
  func.func @transform_10(%arg0: i32) -> (i32, i32) {
    %c0_i32 = arith.constant 0 : i32
    %c0_i32_0 = arith.constant 0 : i32
    %c0_i32_1 = arith.constant 0 : i32
    return %c0_i32, %c0_i32_0 : i32, i32
  }
  func.func @transform_11(%arg0: i32) -> (i32, i32) {
    %c0_i32 = arith.constant 0 : i32
    %c0_i32_0 = arith.constant 0 : i32
    %c0_i32_1 = arith.constant 0 : i32
    return %c0_i32, %c0_i32_0 : i32, i32
  }
  func.func @transform_12(%arg0: i32) -> (i32, i32) {
    %c0_i32 = arith.constant 0 : i32
    %c0_i32_0 = arith.constant 0 : i32
    %c0_i32_1 = arith.constant 0 : i32
    return %c0_i32, %c0_i32_0 : i32, i32
  }
  func.func @transform_13(%arg0: i32) -> (i32, i32) {
    %c0_i32 = arith.constant 0 : i32
    %c0_i32_0 = arith.constant 0 : i32
    %c0_i32_1 = arith.constant 0 : i32
    return %c0_i32, %c0_i32_0 : i32, i32
  }
  func.func @transform_14(%arg0: i32) -> (i32, i32, i32) {
    %c0_i32 = arith.constant 0 : i32
    %c0_i32_0 = arith.constant 0 : i32
    %c0_i32_1 = arith.constant 0 : i32
    %c0_i32_2 = arith.constant 0 : i32
    return %c0_i32, %c0_i32_0, %c0_i32_1 : i32, i32, i32
  }
  func.func @transform_15(%arg0: i32) -> (i32, i32, i32) {
    %c0_i32 = arith.constant 0 : i32
    %c0_i32_0 = arith.constant 0 : i32
    %c0_i32_1 = arith.constant 0 : i32
    %c0_i32_2 = arith.constant 0 : i32
    return %c0_i32, %c0_i32_0, %c0_i32_1 : i32, i32, i32
  }
  func.func @transform_16(%arg0: i32) -> (i32, i32, i32) {
    %c0_i32 = arith.constant 0 : i32
    %c0_i32_0 = arith.constant 0 : i32
    %c0_i32_1 = arith.constant 0 : i32
    return %arg0, %c0_i32, %c0_i32_0 : i32, i32, i32
  }
}

</mosaic_0001>

<bundles_post_ra>
// kernel: _two_stage_forward.2
= control target key start
LH: loop header
LB: loop body
LE: loop exit
PB: predicated region body
PF: predicated region fallthrough
CT: control target
= control target key end

     0   :  { %v3268_v0 = vmov 0.0   ;;  %vm3269_vm0 = vmmov 0   ;;  %vm183_vm1 = vcmask 261120   ;;  %v3270_v12 = vmov 0   ;;  %s3271_s25 = smov 96   ;;  %s3272_s22 = smov 64   ;;  %s4022_s2 = inlined_call_operand.vmem [shape: bf16[1,32,96], index: 2, kind: input, shape index: {}]   ;;  %s4023_s0 = inlined_call_operand.vmem [shape: f32[48,32], index: 0, kind: input, shape index: {}]   ;;  %s4024_s3 = inlined_call_operand.vmem [shape: f32[1,1,96], index: 3, kind: input, shape index: {}]   ;;  %s4025_s1 = inlined_call_operand.vmem [shape: s32[6,1,1], index: 1, kind: input, shape index: {}]   ;;  %s4026_s4 = inlined_call_operand.vmem [shape: bf16[2,32,32], index: 4, kind: input, shape index: {}]   ;;  %s4027_s6 = inlined_call_operand.vmem [shape: bf16[3,32,32], index: 6, kind: input, shape index: {}]   ;;  %s4028_s5 = inlined_call_operand.vmem [shape: f32[2,1,32], index: 5, kind: input, shape index: {}]   ;;  %s4029_s8 = inlined_call_operand.vmem [shape: bf16[32,32], index: 8, kind: input, shape index: {}]   ;;  %s4030_s7 = inlined_call_operand.vmem [shape: f32[3,1,32], index: 7, kind: input, shape index: {}]   ;;  %s4031_s10 = inlined_call_operand.vmem [shape: bf16[32,64], index: 10, kind: input, shape index: {}]   ;;  %s4032_s9 = inlined_call_operand.vmem [shape: f32[1,32], index: 9, kind: input, shape index: {}]   ;;  %s4033_s11 = inlined_call_operand.vmem [shape: f32[1,64], index: 11, kind: input, shape index: {}]   ;;  %s4034_s12 = inlined_call_operand.vmem [shape: f32[1,32], index: 12, kind: input, shape index: {}]   ;;  %s4035_s13 = inlined_call_operand.vmem [shape: f32[1,32], index: 13, kind: input, shape index: {}]   ;;  %s4036_s14 = inlined_call_operand.vmem [shape: bf16[1,32,32], index: 14, kind: input, shape index: {}]   ;;  %s4037_s15 = inlined_call_operand.vmem [shape: f32[1,1,32], index: 15, kind: input, shape index: {}]   ;;  %s4038_s16 = inlined_call_operand.vmem [shape: f32[1,6,32], index: 16, kind: output, shape index: {}]  }
   0x1   :  { %4040 = sst [smem:[#allocation2_spill]] %s4022_s2  ;;  %2900 = vmatprep.subr.bf16.mxu0 %v3268_v0  ;;  %2904 = vmatprep.mubr.msk.bf16.mxu0 %vm3269_vm0, %v3268_v0  ;;  %v151_v3 = vld [vmem:[%s4023_s0] sm:$0xff]  ;;  %v152_v4 = vld [vmem:[%s4023_s0 + $0x8] sm:$0xff]  ;;  %v153_v6 = vld [vmem:[%s4023_s0 + $0x10] sm:$0xff]  ;;  %vm259_vm2 = vcmask 130048   ;;  %v60_v56 = vlaneseq  ;;  %vm653_vm3 = vcmask 1043456  }
   0x2   :  { %s4041_s23 = sld [smem:[#allocation2_spill]]  ;;  %2916 = vmatprep.subr.bf16.mxu1 %v3268_v0  ;;  %2918 = vmatprep.mubr.msk.bf16.mxu1 %vm3269_vm0, %v3268_v0  ;;  %v157_v5 = vpack.c.bf16 %v152_v4, %v151_v3  ;;  %v154_v7 = vld [vmem:[%s4023_s0 + $0x18] sm:$0xff]  ;;  %v155_v9 = vld [vmem:[%s4023_s0 + $0x20] sm:$0xff]  ;;  %v156_v10 = vld [vmem:[%s4023_s0 + $0x28] sm:$0xff]  ;;  %v3273_v58 = vmov 1966171168  }
   0x3   :  { %v158_v8 = vpack.c.bf16 %v154_v7, %v153_v6  ;;  %v159_v11 = vpack.c.bf16 %v156_v10, %v155_v9  ;;  %3166 = vset.pattern.permute.xlu0 %v3270_v12  ;;  %3167 = vset.pattern.permute.xlu1 %v3270_v12  ;;  %v2727_v13 = vld [vmem:[%s4024_s3] ss:$0 sm:$0xff]  ;;  %v55_v39 = vld [vmem:[%s4025_s1 + $0x1] sm:$0x1]  ;;  %v57_v40 = vld [vmem:[%s4025_s1 + $0x3] sm:$0x1]  ;;  %v114_v59 = vunpack.c.l.s4 %v3273_v58 }
   0x4   :  { %v54_v38 = vld [vmem:[%s4025_s1] sm:$0x1]  ;;  %v56_v41 = vld [vmem:[%s4025_s1 + $0x2] sm:$0x1]  ;;  %v59_v42 = vld [vmem:[%s4025_s1 + $0x5] sm:$0x1] }
   0x5   :  { %v58_v43 = vld [vmem:[%s4025_s1 + $0x4] sm:$0x1]  ;;  %v3483_v57 = vshrl.u32 %v60_v56, 7  ;;  %v115_v62 = vunpack.c.0.s8 %v114_v59  ;;  %vm575_vm6 = vcmask 64512   ;;  %s3274_s1 = smov 80   ;;  %s3276_s24 = smov 48  }
   0x6   :  { %s3277_s29 = smov 16   ;;  %vm2098_vm12 = vcmask 1041409   ;;  %vm2100_vm13 = vcmask 1042434   ;;  %vm2102_vm14 = vcmask 1043459   ;;  %vm2104_vm15 = vcmask 1044484  }
   0x7   :  { %v3490_v60 = vsub.s32 0, %v3483_v57  ;;  %v118_v4 = vsub.s32 %v115_v62, %v3483_v57 }
   0x8   :  { %v3188_v1 = vld [vmem:[%s4041_s23] sm:$0xff]   ;;  %v3189_v2 = vld [vmem:[%s4041_s23 + $0x8] sm:$0xff]   ;;  %s3275_s23 = smov 112  }
   0x9   :  { %2901 = vmatpush3.bf16.msra.mxu0 %v3188_v1 }
   0xa   :  { %2902 = vmatprep.subr.bf16.mxu0 %v3268_v0 }
   0xd   :  { %2903 = vmatpush3.bf16.msra.mxu0 %v3189_v2 }
   0xe   :  { %2934 = vmatprep.subr.bf16.mxu0 %v3268_v0 }
  0x10   :  { %2905 = vmatmul.mubr.msk.bf16.vlgmr.msra.gmra.mrb[0].mxu0 %vm183_vm1, %v157_v5 }
  0x11   :  { %2908 = vmatprep.mubr.msk.bf16.mxu0 %vm3269_vm0, %v3268_v0 }
  0x18   :  { %2909 = vmatmul.mubr.msk.bf16.gmra.mrb[4].mxu0 %vm183_vm1, %v158_v8 }
  0x19   :  { %2912 = vmatprep.mubr.msk.bf16.mxu0 %vm3269_vm0, %v3268_v0 }
  0x20   :  { %2913 = vmatmul.mubr.msk.bf16.gmra.mrb[8].mxu0 %vm183_vm1, %v159_v11 }
  0x21   :  { %2936 = vmatprep.mubr.msk.bf16.mxu0 %vm3269_vm0, %v3268_v0 }
  0xe3   :  { %v227_v14 = vpop.f32.mrb[0].mxu0 }
  0xe4   :  { %v228_v15 = vadd.f32 %v2727_v13, %v227_v14  ;;  %v2906_v16 = vpop.f32.mrb[1].mxu0 }
  0xe5   :  { %v230_v17 = vpop.f32.mrb[2].mxu0 }
  0xe6   :  { %v3407_v18 = vpack.c.bf16 %v228_v15, %v228_v15  ;;  %v231_v19 = vadd.f32 %v2727_v13, %v230_v17  ;;  %v2907_v20 = vpop.f32.mrb[3].mxu0 }
  0xe8   :  { %257 = vrot.lane.b32.xlu0 %v3407_v18, %s3271_s25  ;;  %v3411_v21 = vpack.c.bf16 %v231_v19, %v231_v19 }
  0xeb   :  { %v235_v22 = vpop.f32.mrb[4].mxu0 }
  0xec   :  { %v236_v23 = vadd.f32 %v2727_v13, %v235_v22  ;;  %307 = vrot.lane.b32.xlu0 %v3411_v21, %s3271_s25  ;;  %v2910_v24 = vpop.f32.mrb[5].mxu0 }
  0xed   :  { %v238_v25 = vpop.f32.mrb[6].mxu0 }
  0xee   :  { %v3415_v26 = vpack.c.bf16 %v236_v23, %v236_v23  ;;  %v239_v27 = vadd.f32 %v2727_v13, %v238_v25  ;;  %v2911_v28 = vpop.f32.mrb[7].mxu0 }
  0xef   :  { %v3525_v28 = vand.u32 127, %v60_v56 }
  0xf0   :  { %v3417_v29 = vpack.c.bf16 %v239_v27, %v239_v27  ;;  %356 = vrot.lane.b32.xlu1 %v3415_v26, %s3271_s25 }
  0xf3   :  { %v243_v30 = vpop.f32.mrb[8].mxu0 }
  0xf4   :  { %v244_v31 = vadd.f32 %v2727_v13, %v243_v30  ;;  %405 = vrot.lane.b32.xlu1 %v3417_v29, %s3271_s25  ;;  %v2914_v32 = vpop.f32.mrb[9].mxu0 }
  0xf5   :  { %v246_v33 = vpop.f32.mrb[10].mxu0 }
  0xf6   :  { %v3423_v34 = vpack.c.bf16 %v244_v31, %v244_v31  ;;  %v247_v35 = vadd.f32 %v2727_v13, %v246_v33  ;;  %v2915_v36 = vpop.f32.mrb[11].mxu0 }
  0xf8   :  { %v3425_v37 = vpack.c.bf16 %v247_v35, %v247_v35  ;;  %454 = vrot.lane.b32.xlu0 %v3423_v34, %s3271_s25 }
  0xfa   :  { %503 = vrot.lane.b32.xlu1 %v3425_v37, %s3271_s25 }
  0xfc   :  { %63 = vperm.xlu0 %3166, %v54_v38  }
  0xfe   :  { %70 = vperm.xlu1 %3167, %v55_v39  }
 0x100   :  { %84 = vperm.xlu0 %3166, %v57_v40  }
 0x102   :  { %77 = vperm.xlu1 %3167, %v56_v41  }
 0x104   :  { %98 = vperm.xlu0 %3166, %v59_v42  }
 0x106   :  { %91 = vperm.xlu1 %3167, %v58_v43  }
 0x108   :  { %648 = vrot.lane.b32.xlu0 %v3407_v18, %s3272_s22 }
 0x10a   :  { %697 = vrot.lane.b32.xlu1 %v3411_v21, %s3272_s22 }
 0x10e   :  { %745 = vrot.lane.b32.xlu1 %v3415_v26, %s3272_s22 }
 0x15a   :  { %v258_v44 = vpop.permute.xlu0 %257 }
 0x15b   :  { %v264_v45 = vsel %vm259_vm2, %v258_v44, 0 }
 0x15c   :  { %2917 = vmatpush3.bf16.xpose.msra.mxu1 %v264_v45 }
 0x15d   :  { %2922 = vmatprep.subr.bf16.mxu1 %v3268_v0 }
 0x15e   :  { %v308_v46 = vpop.permute.xlu0 %307 }
 0x15f   :  { %v313_v48 = vsel %vm259_vm2, %v308_v46, 0 }
 0x162   :  { %v357_v47 = vpop.permute.xlu1 %356 }
 0x163   :  { %2919 = vmatmul.mubr.msk.bf16.vlgmr.msra.gmra.mrb[0].mxu1 %vm259_vm2, %v3407_v18  ;;  %v362_v51 = vsel %vm259_vm2, %v357_v47, 0 }
 0x164   :  { %2923 = vmatpush3.bf16.xpose.msra.mxu1 %v313_v48  ;;  %2924 = vmatprep.mubr.msk.bf16.mxu1 %vm3269_vm0, %v3268_v0 }
 0x165   :  { %2928 = vmatprep.subr.bf16.mxu1 %v3268_v0 }
 0x166   :  { %v406_v49 = vpop.permute.xlu1 %405 }
 0x167   :  { %v411_v50 = vsel %vm259_vm2, %v406_v49, 0 }
 0x168   :  { %2935 = vmatpush3.bf16.xpose.msra.mxu0 %v411_v50 }
 0x169   :  { %2946 = vmatprep.subr.bf16.mxu0 %v3268_v0 }
 0x16a   :  { %v455_v54 = vpop.permute.xlu0 %454 }
 0x16b   :  { %2925 = vmatmul.mubr.msk.bf16.vlgmr.msra.gmra.mrb[4].mxu1 %vm259_vm2, %v3411_v21  ;;  %v460_v55 = vsel %vm259_vm2, %v455_v54, 0 }
 0x16c   :  { %2929 = vmatpush3.bf16.xpose.msra.mxu1 %v362_v51  ;;  %v504_v52 = vpop.permute.xlu1 %503  ;;  %2930 = vmatprep.mubr.msk.bf16.mxu1 %vm3269_vm0, %v3268_v0 }
 0x16d   :  { %v509_v53 = vsel %vm259_vm2, %v504_v52, 0  ;;  %2940 = vmatprep.subr.bf16.mxu1 %v3268_v0 }
 0x16f   :  { %2937 = vmatmul.mubr.msk.bf16.vlgmr.msra.gmra.mrb[12].mxu0 %vm259_vm2, %v3417_v29 }
 0x170   :  { %2947 = vmatpush3.bf16.xpose.msra.mxu0 %v509_v53  ;;  %2948 = vmatprep.mubr.msk.bf16.mxu0 %vm3269_vm0, %v3268_v0 }
 0x171   :  { %2958 = vmatprep.subr.bf16.mxu0 %v3268_v0 }
 0x173   :  { %2931 = vmatmul.mubr.msk.bf16.vlgmr.msra.gmra.mrb[8].mxu1 %vm259_vm2, %v3415_v26 }
 0x174   :  { %2941 = vmatpush3.bf16.xpose.msra.mxu1 %v460_v55  ;;  %2942 = vmatprep.mubr.msk.bf16.mxu1 %vm3269_vm0, %v3268_v0 }
 0x175   :  { %2952 = vmatprep.subr.bf16.mxu1 %v3268_v0 }
 0x177   :  { %2949 = vmatmul.mubr.msk.bf16.vlgmr.msra.gmra.mrb[16].mxu0 %vm259_vm2, %v3425_v37 }
 0x178   :  { %2960 = vmatprep.mubr.msk.bf16.mxu0 %vm3269_vm0, %v3268_v0 }
 0x17b   :  { %2943 = vmatmul.mubr.msk.bf16.vlgmr.msra.gmra.mrb[12].mxu1 %vm259_vm2, %v3423_v34  ;;  %v64_v61 = vpop.permute.xlu0 %63 }
 0x17c   :  { %2954 = vmatprep.mubr.msk.bf16.mxu1 %vm3269_vm0, %v3268_v0  ;;  %v3497_v1 = vrot.slane %v64_v61, %v3490_v60 }
 0x17d   :  { %v71_v63 = vpop.permute.xlu1 %70 }
 0x17e   :  { %v3500_v2 = vrot.slane %v71_v63, %v3490_v60  ;;  %vm104_vm5 = vcmp.lt.s32.totalorder %v3525_v28, %v3497_v1 }
 0x17f   :  { %v85_v3 = vpop.permute.xlu0 %84 }
 0x180   :  { %v110_v5 = vcombine.low %v3497_v1, %v3500_v2  ;;  %v3506_v6 = vrot.slane %v85_v3, %v3490_v60  ;;  %vm105_vm7 = vcmp.lt.s32.totalorder %v3525_v28, %v3500_v2 }
 0x181   :  { %v78_v7 = vpop.permute.xlu1 %77 }
 0x182   :  { %v3509_v8 = vrot.slane %v78_v7, %v3490_v60  ;;  %v119_v10 = vrot.slane %v110_v5, %v118_v4  ;;  %vm107_vm8 = vcmp.lt.s32.totalorder %v3525_v28, %v3506_v6 }
 0x183   :  { %v99_v9 = vpop.permute.xlu0 %98 }
 0x184   :  { %v111_v11 = vcombine.low %v3509_v8, %v3506_v6  ;;  %v3514_v12 = vrot.slane %v99_v9, %v3490_v60  ;;  %vm106_vm9 = vcmp.lt.s32.totalorder %v3525_v28, %v3509_v8 }
 0x185   :  { %v92_v13 = vpop.permute.xlu1 %91 }
 0x186   :  { %v126_v14 = vrot.slane %v111_v11, %v118_v4  ;;  %v3517_v15 = vrot.slane %v92_v13, %v3490_v60  ;;  %vm109_vm10 = vcmp.lt.s32.totalorder %v3525_v28, %v3514_v12 }
 0x187   :  { %v649_v16 = vpop.permute.xlu0 %648 }
 0x188   :  { %v134_v17 = vcombine.low %v119_v10, %v126_v14  ;;  %v112_v19 = vcombine.low %v3517_v15, %v3514_v12  ;;  %v655_v20 = vsel %vm653_vm3, %v649_v16, 0  ;;  %vm108_vm11 = vcmp.lt.s32.totalorder %v3525_v28, %v3517_v15 }
 0x189   :  { %2953 = vmatpush3.bf16.msra.mxu1 %v655_v20  ;;  %v698_v22 = vpop.permute.xlu1 %697 }
 0x18a   :  { %v703_v23 = vsel %vm653_vm3, %v698_v22, 0  ;;  %2964 = vmatprep.subr.bf16.mxu1 %v3268_v0  ;;  %v133_v24 = vrot.slane %v112_v19, %v118_v4  ;;  %v141_v25 = vrot.slane %v134_v17, %v118_v4 }
 0x18b   :  { %2959 = vmatpush3.bf16.msra.mxu0 %v703_v23 }
 0x18c   :  { %2970 = vmatprep.subr.bf16.mxu0 %v3268_v0  ;;  %v148_v27 = vrot.slane %v133_v24, %v118_v4 }
 0x18d   :  { %v3571_v22 = vpop.permute.xlu1 %745 }
 0x18e   :  { %v3527_v30 = vcombine.low %v141_v25, %v148_v27 }
 0x190   :  { %vm150_vm4 = vcmp.lt.s32.totalorder %v3525_v28, %v3527_v30  ;;  %v2131_v30 = vsub.s32 1, %v3483_v57 }
 0x236   :  { %v300_v31 = vpop.f32.mrb[0].mxu1 }
 0x237   :  { %v551_v32 = vmul.f32 0.25, %v300_v31  ;;  %v2920_v33 = vpop.f32.mrb[1].mxu1 }
 0x238   :  { %v303_v35 = vpop.f32.mrb[2].mxu1 }
 0x239   :  { %v2921_v36 = vpop.f32.mrb[3].mxu1  ;;  %v569_v38 = vsel %vm104_vm5, %v551_v32, -1e+30 }
 0x23a   :  { %v576_v39 = vsel %vm575_vm6, %v569_v38, -inf }
 0x23b   :  { %577 = vmax.xlane.f32.xlu1 %v576_v39 }
 0x23e   :  { %v349_v40 = vpop.f32.mrb[4].mxu1 }
 0x23f   :  { %v552_v41 = vmul.f32 0.25, %v349_v40  ;;  %v2926_v42 = vpop.f32.mrb[5].mxu1 }
 0x240   :  { %v352_v43 = vpop.f32.mrb[6].mxu1 }
 0x241   :  { %v2927_v44 = vpop.f32.mrb[7].mxu1  ;;  %v570_v45 = vsel %vm105_vm7, %v552_v41, -1e+30 }
 0x242   :  { %v447_v46 = vpop.f32.mrb[12].mxu0  ;;  %v579_v47 = vsel %vm575_vm6, %v570_v45, -inf }
 0x243   :  { %v554_v48 = vmul.f32 0.25, %v447_v46  ;;  %580 = vmax.xlane.f32.xlu0 %v579_v47  ;;  %v2938_v49 = vpop.f32.mrb[13].mxu0 }
 0x244   :  { %v450_v50 = vpop.f32.mrb[14].mxu0 }
 0x245   :  { %v2939_v51 = vpop.f32.mrb[15].mxu0  ;;  %v572_v52 = vsel %vm107_vm8, %v554_v48, -1e+30 }
 0x246   :  { %v398_v53 = vpop.f32.mrb[8].mxu1  ;;  %v585_v54 = vsel %vm575_vm6, %v572_v52, -inf }
 0x247   :  { %v553_v55 = vmul.f32 0.25, %v398_v53  ;;  %v2932_v56 = vpop.f32.mrb[9].mxu1  ;;  %586 = vmax.xlane.f32.xlu1 %v585_v54 }
 0x248   :  { %v401_v58 = vpop.f32.mrb[10].mxu1 }
 0x249   :  { %v2933_v59 = vpop.f32.mrb[11].mxu1  ;;  %v571_v61 = vsel %vm106_vm9, %v553_v55, -1e+30 }
 0x24a   :  { %v545_v62 = vpop.f32.mrb[16].mxu0  ;;  %v582_v63 = vsel %vm575_vm6, %v571_v61, -inf }
 0x24b   :  { %v556_v3 = vmul.f32 0.25, %v545_v62  ;;  %583 = vmax.xlane.f32.xlu0 %v582_v63  ;;  %v2950_v4 = vpop.f32.mrb[17].mxu0 }
 0x24c   :  { %v548_v5 = vpop.f32.mrb[18].mxu0 }
 0x24d   :  { %v2951_v7 = vpop.f32.mrb[19].mxu0  ;;  %v574_v9 = vsel %vm109_vm10, %v556_v3, -1e+30 }
 0x24e   :  { %v496_v10 = vpop.f32.mrb[12].mxu1  ;;  %v591_v11 = vsel %vm575_vm6, %v574_v9, -inf }
 0x24f   :  { %v555_v13 = vmul.f32 0.25, %v496_v10  ;;  %v2944_v14 = vpop.f32.mrb[13].mxu1  ;;  %592 = vmax.xlane.f32.xlu1 %v591_v11  ;;  %v751_v10 = vsel %vm653_vm3, %v3571_v22, 0 }
 0x250   :  { %v499_v16 = vpop.f32.mrb[14].mxu1 }
 0x251   :  { %v2945_v17 = vpop.f32.mrb[15].mxu1  ;;  %v573_v19 = vsel %vm108_vm11, %v555_v13, -1e+30 }
 0x252   :  { %v588_v20 = vsel %vm575_vm6, %v573_v19, -inf }
 0x253   :  { %589 = vmax.xlane.f32.xlu0 %v588_v20 }
 0x260   :  { %841 = vrot.lane.b32.xlu1 %v3423_v34, %s3272_s22 }
 0x269   :  { %793 = vrot.lane.b32.xlu0 %v3417_v29, %s3272_s22 }
 0x2c8   :  { %v578_v23 = vpop.xlane.xlu1 %577 }
 0x2c9   :  { %v594_v24 = vsub.f32 %v569_v38, %v578_v23 }
 0x2cb   :  { %v600_v25 = vmul.f32 1.442695, %v594_v24 }
 0x2cd   :  { %3206 = vpow2.f32 %v600_v25 }
 0x2d0   :  { %v581_v27 = vpop.xlane.xlu0 %580 }
 0x2d1   :  { %v595_v31 = vsub.f32 %v570_v45, %v581_v27 }
 0x2d3   :  { %v602_v32 = vmul.f32 1.442695, %v595_v31 }
 0x2d4   :  { %v587_v33 = vpop.xlane.xlu1 %586 }
 0x2d5   :  { %3208 = vpow2.f32 %v602_v32  ;;  %v597_v35 = vsub.f32 %v572_v52, %v587_v33 }
 0x2d7   :  { %v3207_v36 = vpop.eup %3206  ;;  %v606_v39 = vmul.f32 1.442695, %v597_v35 }
 0x2d8   :  { %v584_v40 = vpop.xlane.xlu0 %583  ;;  %v612_v41 = vsel %vm575_vm6, %v3207_v36, 0.0 }
 0x2d9   :  { %3210 = vpow2.f32 %v606_v39  ;;  %v596_v42 = vsub.f32 %v571_v61, %v584_v40  ;;  %613 = vadd.xlane.f32.xlu0 %v612_v41 }
 0x2db   :  { %v604_v43 = vmul.f32 1.442695, %v596_v42 }
 0x2dc   :  { %v593_v49 = vpop.xlane.xlu1 %592 }
 0x2dd   :  { %3212 = vpow2.f32 %v604_v43  ;;  %v599_v50 = vsub.f32 %v574_v9, %v593_v49 }
 0x2df   :  { %v3209_v44 = vpop.eup %3208  ;;  %v610_v52 = vmul.f32 1.442695, %v599_v50 }
 0x2e0   :  { %v615_v38 = vsel %vm575_vm6, %v3209_v44, 0.0  ;;  %v590_v51 = vpop.xlane.xlu0 %589  ;;  %v842_v63 = vpop.permute.xlu1 %841 }
 0x2e1   :  { %616 = vadd.xlane.f32.xlu1 %v615_v38  ;;  %v598_v53 = vsub.f32 %v573_v19, %v590_v51  ;;  %3214 = vpow2.f32 %v610_v52  ;;  %v847_v31 = vsel %vm653_vm3, %v842_v63, 0 }
 0x2e3   :  { %v3211_v46 = vpop.eup %3210  ;;  %v608_v54 = vmul.f32 1.442695, %v598_v53 }
 0x2e4   :  { %v621_v45 = vsel %vm575_vm6, %v3211_v46, 0.0  ;;  %v794_v61 = vpop.permute.xlu0 %793 }
 0x2e5   :  { %622 = vadd.xlane.f32.xlu1 %v621_v45  ;;  %3216 = vpow2.f32 %v608_v54  ;;  %v799_v19 = vsel %vm653_vm3, %v794_v61, 0 }
 0x2e7   :  { %v3213_v47 = vpop.eup %3212 }
 0x2e8   :  { %v618_v48 = vsel %vm575_vm6, %v3213_v47, 0.0 }
 0x2e9   :  { %619 = vadd.xlane.f32.xlu0 %v618_v48 }
 0x2eb   :  { %v3580_v55 = vpop.eup %3214 }
 0x2ec   :  { %v627_v56 = vsel %vm575_vm6, %v3580_v55, 0.0 }
 0x2ef   :  { %v3584_v58 = vpop.eup %3216 }
 0x2f0   :  { %v624_v59 = vsel %vm575_vm6, %v3584_v58, 0.0 }
 0x2f6   :  { %939 = vrot.lane.b32.xlu1 %v3407_v18, %s3274_s1 }
 0x2ff   :  { %889 = vrot.lane.b32.xlu0 %v3425_v37, %s3272_s22 }
 0x31a   :  { %628 = vadd.xlane.f32.xlu1 %v627_v56 }
 0x31e   :  { %625 = vadd.xlane.f32.xlu0 %v624_v59 }
 0x32b   :  { %937 = vrot.lane.b32.xlu1 %v3407_v18, %s3275_s23 }
 0x32f   :  { %1039 = vrot.lane.b32.xlu1 %v3415_v26, %s3274_s1 }
 0x333   :  { %1037 = vrot.lane.b32.xlu1 %v3415_v26, %s3275_s23 }
 0x334   :  { %989 = vrot.lane.b32.xlu0 %v3411_v21, %s3274_s1 }
 0x337   :  { %1139 = vrot.lane.b32.xlu1 %v3423_v34, %s3274_s1 }
 0x338   :  { %987 = vrot.lane.b32.xlu0 %v3411_v21, %s3275_s23 }
 0x33b   :  { %1137 = vrot.lane.b32.xlu1 %v3423_v34, %s3275_s23 }
 0x33c   :  { %1089 = vrot.lane.b32.xlu0 %v3417_v29, %s3274_s1 }
 0x340   :  { %1087 = vrot.lane.b32.xlu0 %v3417_v29, %s3275_s23 }
 0x344   :  { %1189 = vrot.lane.b32.xlu0 %v3425_v37, %s3274_s1 }
 0x348   :  { %1187 = vrot.lane.b32.xlu0 %v3425_v37, %s3275_s23 }
 0x366   :  { %v614_v62 = vpop.xlane.xlu0 %613 }
 0x367   :  { %3218 = vrcp.f32 %v614_v62 }
 0x36e   :  { %v617_v3 = vpop.xlane.xlu1 %616 }
 0x36f   :  { %3220 = vrcp.f32 %v617_v3 }
 0x371   :  { %v3219_v4 = vpop.eup %3218 }
 0x372   :  { %v636_v5 = vmul.f32 %v3219_v4, %v3207_v36  ;;  %v623_v7 = vpop.xlane.xlu1 %622 }
 0x373   :  { %3222 = vrcp.f32 %v623_v7 }
 0x374   :  { %v642_v9 = vpack.c.bf16 %v636_v5, %v636_v5 }
 0x376   :  { %2955 = vmatmul.mubr.msk.bf16.vlgmr.msra.gmra.mrb[16].mxu1 %vm575_vm6, %v642_v9  ;;  %v620_v11 = vpop.xlane.xlu0 %619  ;;  %v940_v33 = vpop.permute.xlu1 %939 }
 0x377   :  { %2965 = vmatpush3.bf16.msra.mxu1 %v751_v10  ;;  %3224 = vrcp.f32 %v620_v11  ;;  %2966 = vmatprep.mubr.msk.bf16.mxu1 %vm3269_vm0, %v3268_v0  ;;  %v945_v49 = vsel %vm259_vm2, %v940_v33, 0 }
 0x378   :  { %2976 = vmatprep.subr.bf16.mxu1 %v3268_v0 }
 0x379   :  { %v3221_v13 = vpop.eup %3220 }
 0x37a   :  { %v637_v14 = vmul.f32 %v3221_v13, %v3209_v44  ;;  %v890_v24 = vpop.permute.xlu0 %889 }
 0x37b   :  { %v895_v32 = vsel %vm653_vm3, %v890_v24, 0 }
 0x37c   :  { %v643_v16 = vpack.c.bf16 %v637_v14, %v637_v14 }
 0x37d   :  { %v3223_v17 = vpop.eup %3222 }
 0x37e   :  { %2961 = vmatmul.mubr.msk.bf16.vlgmr.msra.gmra.mrb[20].mxu0 %vm575_vm6, %v643_v16  ;;  %v639_v20 = vmul.f32 %v3223_v17, %v3211_v46 }
 0x37f   :  { %2971 = vmatpush3.bf16.msra.mxu0 %v799_v19  ;;  %2972 = vmatprep.mubr.msk.bf16.mxu0 %vm3269_vm0, %v3268_v0 }
 0x380   :  { %2982 = vmatprep.subr.bf16.mxu0 %v3268_v0  ;;  %v645_v27 = vpack.c.bf16 %v639_v20, %v639_v20 }
 0x381   :  { %v3225_v22 = vpop.eup %3224 }
 0x382   :  { %v638_v23 = vmul.f32 %v3225_v22, %v3213_v47 }
 0x384   :  { %v644_v25 = vpack.c.bf16 %v638_v23, %v638_v23 }
 0x386   :  { %2967 = vmatmul.mubr.msk.bf16.vlgmr.msra.gmra.mrb[20].mxu1 %vm575_vm6, %v644_v25  ;;  %2973 = vmatmul.mubr.msk.bf16.vlgmr.msra.gmra.mrb[24].mxu0 %vm575_vm6, %v645_v27 }
 0x387   :  { %2977 = vmatpush3.bf16.msra.mxu1 %v847_v31  ;;  %2983 = vmatpush3.bf16.msra.mxu0 %v895_v32 }
 0x388   :  { %2984 = vmatprep.mubr.msk.bf16.mxu0 %vm3269_vm0, %v3268_v0  ;;  %2994 = vmatprep.subr.bf16.mxu0 %v3268_v0 }
 0x389   :  { %2978 = vmatprep.mubr.msk.bf16.mxu1 %vm3269_vm0, %v3268_v0  ;;  %2988 = vmatprep.subr.bf16.mxu1 %v3268_v0 }
 0x3a7   :  { %v629_v35 = vpop.xlane.xlu1 %628 }
 0x3a8   :  { %3226 = vrcp.f32 %v629_v35 }
 0x3ab   :  { %v626_v36 = vpop.xlane.xlu0 %625  ;;  %v938_v38 = vpop.permute.xlu1 %937 }
 0x3ac   :  { %3228 = vrcp.f32 %v626_v36 }
 0x3af   :  { %v990_v39 = vpop.permute.xlu0 %989  ;;  %v1040_v50 = vpop.permute.xlu1 %1039 }
 0x3b0   :  { %v995_v45 = vsel %vm259_vm2, %v990_v39, 0  ;;  %v1045_v54 = vsel %vm259_vm2, %v1040_v50, 0 }
 0x3b2   :  { %v3227_v40 = vpop.eup %3226 }
 0x3b3   :  { %v641_v41 = vmul.f32 %v3227_v40, %v3580_v55  ;;  %v988_v42 = vpop.permute.xlu0 %987  ;;  %v1038_v53 = vpop.permute.xlu1 %1037 }
 0x3b5   :  { %v647_v43 = vpack.c.bf16 %v641_v41, %v641_v41 }
 0x3b6   :  { %v3229_v44 = vpop.eup %3228 }
 0x3b7   :  { %v640_v46 = vmul.f32 %v3229_v44, %v3584_v58  ;;  %2985 = vmatmul.mubr.msk.bf16.vlgmr.msra.gmra.mrb[28].mxu0 %vm575_vm6, %v647_v43  ;;  %v1090_v47 = vpop.permute.xlu0 %1089  ;;  %v1140_v58 = vpop.permute.xlu1 %1139 }
 0x3b8   :  { %2995 = vmatpush3.bf16.xpose.msra.mxu0 %v995_v45  ;;  %2996 = vmatprep.mubr.msk.bf16.mxu0 %vm3269_vm0, %v3268_v0  ;;  %v1095_v52 = vsel %vm259_vm2, %v1090_v47, 0  ;;  %v1145_v59 = vsel %vm259_vm2, %v1140_v58, 0 }
 0x3b9   :  { %v646_v48 = vpack.c.bf16 %v640_v46, %v640_v46  ;;  %3006 = vmatprep.subr.bf16.mxu0 %v3268_v0 }
 0x3bb   :  { %2979 = vmatmul.mubr.msk.bf16.vlgmr.msra.gmra.mrb[24].mxu1 %vm575_vm6, %v646_v48  ;;  %v1088_v51 = vpop.permute.xlu0 %1087  ;;  %v1138_v62 = vpop.permute.xlu1 %1137 }
 0x3bc   :  { %2989 = vmatpush3.bf16.xpose.msra.mxu1 %v945_v49  ;;  %2990 = vmatprep.mubr.msk.bf16.mxu1 %vm3269_vm0, %v3268_v0 }
 0x3bd   :  { %3000 = vmatprep.subr.bf16.mxu1 %v3268_v0 }
 0x3bf   :  { %2997 = vmatmul.mubr.msk.bf16.vlgmr.msra.gmra.mrb[32].mxu0 %vm259_vm2, %v988_v42  ;;  %v1190_v55 = vpop.permute.xlu0 %1189 }
 0x3c0   :  { %3007 = vmatpush3.bf16.xpose.msra.mxu0 %v1095_v52  ;;  %3008 = vmatprep.mubr.msk.bf16.mxu0 %vm3269_vm0, %v3268_v0  ;;  %v1195_v56 = vsel %vm259_vm2, %v1190_v55, 0 }
 0x3c1   :  { %3018 = vmatprep.subr.bf16.mxu0 %v3268_v0 }
 0x3c3   :  { %2991 = vmatmul.mubr.msk.bf16.vlgmr.msra.gmra.mrb[28].mxu1 %vm259_vm2, %v938_v38  ;;  %v1188_v61 = vpop.permute.xlu0 %1187 }
 0x3c4   :  { %3001 = vmatpush3.bf16.xpose.msra.mxu1 %v1045_v54  ;;  %3002 = vmatprep.mubr.msk.bf16.mxu1 %vm3269_vm0, %v3268_v0 }
 0x3c5   :  { %3012 = vmatprep.subr.bf16.mxu1 %v3268_v0 }
 0x3c7   :  { %3009 = vmatmul.mubr.msk.bf16.vlgmr.msra.gmra.mrb[36].mxu0 %vm259_vm2, %v1088_v51 }
 0x3c8   :  { %3019 = vmatpush3.bf16.xpose.msra.mxu0 %v1195_v56  ;;  %3020 = vmatprep.mubr.msk.bf16.mxu0 %vm3269_vm0, %v3268_v0 }
 0x3c9   :  { %3030 = vmatprep.subr.bf16.mxu0 %v3268_v0 }
 0x3cb   :  { %3003 = vmatmul.mubr.msk.bf16.vlgmr.msra.gmra.mrb[32].mxu1 %vm259_vm2, %v1038_v53 }
 0x3cc   :  { %3013 = vmatpush3.bf16.xpose.msra.mxu1 %v1145_v59  ;;  %3014 = vmatprep.mubr.msk.bf16.mxu1 %vm3269_vm0, %v3268_v0 }
 0x3cd   :  { %3024 = vmatprep.subr.bf16.mxu1 %v3268_v0 }
 0x3cf   :  { %3021 = vmatmul.mubr.msk.bf16.vlgmr.msra.gmra.mrb[40].mxu0 %vm259_vm2, %v1188_v61 }
 0x3d0   :  { %3032 = vmatprep.mubr.msk.bf16.mxu0 %vm3269_vm0, %v3268_v0 }
 0x3d3   :  { %3015 = vmatmul.mubr.msk.bf16.vlgmr.msra.gmra.mrb[36].mxu1 %vm259_vm2, %v1138_v62 }
 0x3d4   :  { %3026 = vmatprep.mubr.msk.bf16.mxu1 %vm3269_vm0, %v3268_v0 }
 0x449   :  { %v3664_v63 = vpop.f32.mrb[16].mxu1 }
 0x44a   :  { %v2956_v3 = vpop.f32.mrb[17].mxu1 }
 0x44b   :  { %v694_v4 = vpop.f32.mrb[18].mxu1 }
 0x44c   :  { %v2957_v5 = vpop.f32.mrb[19].mxu1 }
 0x451   :  { %v3666_v7 = vpop.f32.mrb[20].mxu0 }
 0x452   :  { %v2962_v9 = vpop.f32.mrb[21].mxu0 }
 0x453   :  { %v742_v10 = vpop.f32.mrb[22].mxu0 }
 0x454   :  { %v2963_v11 = vpop.f32.mrb[23].mxu0 }
 0x459   :  { %v3668_v13 = vpop.f32.mrb[20].mxu1  ;;  %v3670_v14 = vpop.f32.mrb[24].mxu0 }
 0x45a   :  { %v2968_v16 = vpop.f32.mrb[21].mxu1  ;;  %v2974_v17 = vpop.f32.mrb[25].mxu0 }
 0x45b   :  { %v790_v19 = vpop.f32.mrb[22].mxu1  ;;  %v838_v20 = vpop.f32.mrb[26].mxu0 }
 0x45c   :  { %v2969_v22 = vpop.f32.mrb[23].mxu1  ;;  %v2975_v23 = vpop.f32.mrb[27].mxu0 }
 0x48a   :  { %v3672_v24 = vpop.f32.mrb[28].mxu0 }
 0x48b   :  { %v2986_v25 = vpop.f32.mrb[29].mxu0 }
 0x48c   :  { %v934_v27 = vpop.f32.mrb[30].mxu0 }
 0x48d   :  { %v2987_v31 = vpop.f32.mrb[31].mxu0 }
 0x48e   :  { %v3674_v32 = vpop.f32.mrb[24].mxu1 }
 0x48f   :  { %v2980_v33 = vpop.f32.mrb[25].mxu1 }
 0x490   :  { %v886_v35 = vpop.f32.mrb[26].mxu1 }
 0x491   :  { %v2981_v36 = vpop.f32.mrb[27].mxu1 }
 0x492   :  { %v1031_v39 = vpop.f32.mrb[32].mxu0 }
 0x493   :  { %v1238_v40 = vmul.f32 0.25, %v1031_v39  ;;  %v2998_v41 = vpop.f32.mrb[33].mxu0 }
 0x494   :  { %v1034_v42 = vpop.f32.mrb[34].mxu0 }
 0x495   :  { %v2999_v43 = vpop.f32.mrb[35].mxu0  ;;  %v1244_v44 = vsel %vm105_vm7, %v1238_v40, -1e+30 }
 0x496   :  { %v981_v38 = vpop.f32.mrb[28].mxu1  ;;  %v1252_v46 = vsel %vm575_vm6, %v1244_v44, -inf }
 0x497   :  { %v1237_v45 = vmul.f32 0.25, %v981_v38  ;;  %v2992_v47 = vpop.f32.mrb[29].mxu1  ;;  %1253 = vmax.xlane.f32.xlu0 %v1252_v46 }
 0x498   :  { %v984_v48 = vpop.f32.mrb[30].mxu1 }
 0x499   :  { %v2993_v49 = vpop.f32.mrb[31].mxu1  ;;  %v1243_v50 = vsel %vm104_vm5, %v1237_v45, -1e+30  ;;  %vm2110_vm5 = vcmask 62464  }
 0x49a   :  { %v1131_v51 = vpop.f32.mrb[36].mxu0  ;;  %v1249_v52 = vsel %vm575_vm6, %v1243_v50, -inf }
 0x49b   :  { %v1240_v53 = vmul.f32 0.25, %v1131_v51  ;;  %1250 = vmax.xlane.f32.xlu1 %v1249_v52  ;;  %v3010_v54 = vpop.f32.mrb[37].mxu0 }
 0x49c   :  { %v1134_v2 = vpop.f32.mrb[38].mxu0 }
 0x49d   :  { %v3011_v55 = vpop.f32.mrb[39].mxu0  ;;  %v1246_v56 = vsel %vm107_vm8, %v1240_v53, -1e+30 }
 0x49e   :  { %v1081_v58 = vpop.f32.mrb[32].mxu1  ;;  %v1258_v59 = vsel %vm575_vm6, %v1246_v56, -inf }
 0x49f   :  { %v1239_v61 = vmul.f32 0.25, %v1081_v58  ;;  %v3004_v62 = vpop.f32.mrb[33].mxu1  ;;  %1259 = vmax.xlane.f32.xlu1 %v1258_v59 }
 0x4a0   :  { %v1084_v1 = vpop.f32.mrb[34].mxu1 }
 0x4a1   :  { %v3005_v3 = vpop.f32.mrb[35].mxu1  ;;  %v3691_v4 = vsel %vm106_vm9, %v1239_v61, -1e+30 }
 0x4a2   :  { %v1231_v5 = vpop.f32.mrb[40].mxu0  ;;  %v1255_v9 = vsel %vm575_vm6, %v3691_v4, -inf }
 0x4a3   :  { %v1242_v10 = vmul.f32 0.25, %v1231_v5  ;;  %1256 = vmax.xlane.f32.xlu0 %v1255_v9  ;;  %v3022_v6 = vpop.f32.mrb[41].mxu0 }
 0x4a4   :  { %v1234_v11 = vpop.f32.mrb[42].mxu0 }
 0x4a5   :  { %v3023_v16 = vpop.f32.mrb[43].mxu0  ;;  %v1248_v17 = vsel %vm109_vm10, %v1242_v10, -1e+30 }
 0x4a6   :  { %v1181_v19 = vpop.f32.mrb[36].mxu1  ;;  %v1264_v20 = vsel %vm575_vm6, %v1248_v17, -inf }
 0x4a7   :  { %v1241_v22 = vmul.f32 0.25, %v1181_v19  ;;  %v3016_v8 = vpop.f32.mrb[37].mxu1  ;;  %1265 = vmax.xlane.f32.xlu1 %v1264_v20 }
 0x4a8   :  { %v1184_v23 = vpop.f32.mrb[38].mxu1 }
 0x4a9   :  { %v3017_v25 = vpop.f32.mrb[39].mxu1  ;;  %v1247_v27 = vsel %vm108_vm11, %v1241_v22, -1e+30 }
 0x4aa   :  { %v1261_v31 = vsel %vm575_vm6, %v1247_v27, -inf }
 0x4ab   :  { %1262 = vmax.xlane.f32.xlu0 %v1261_v31 }
 0x4b8   :  { %1369 = vrot.lane.b32.xlu1 %v3411_v21, %s3276_s24 }
 0x4bc   :  { %1417 = vrot.lane.b32.xlu1 %v3415_v26, %s3276_s24 }
 0x4c1   :  { %1321 = vrot.lane.b32.xlu0 %v3407_v18, %s3276_s24 }
 0x524   :  { %v1254_v12 = vpop.xlane.xlu0 %1253 }
 0x525   :  { %v1268_v33 = vsub.f32 %v1244_v44, %v1254_v12 }
 0x527   :  { %v1275_v35 = vmul.f32 1.442695, %v1268_v33 }
 0x528   :  { %v1251_v36 = vpop.xlane.xlu1 %1250 }
 0x529   :  { %3230 = vpow2.f32 %v1275_v35  ;;  %v1267_v15 = vsub.f32 %v1243_v50, %v1251_v36 }
 0x52b   :  { %v1273_v39 = vmul.f32 1.442695, %v1267_v15 }
 0x52c   :  { %v1260_v40 = vpop.xlane.xlu1 %1259 }
 0x52d   :  { %3232 = vpow2.f32 %v1273_v39  ;;  %v1270_v41 = vsub.f32 %v1246_v56, %v1260_v40 }
 0x52f   :  { %v1279_v42 = vmul.f32 1.442695, %v1270_v41 }
 0x530   :  { %v1257_v21 = vpop.xlane.xlu0 %1256 }
 0x531   :  { %3234 = vpow2.f32 %v1279_v42  ;;  %v1269_v55 = vsub.f32 %v3691_v4, %v1257_v21 }
 0x533   :  { %v3231_v43 = vpop.eup %3230  ;;  %v1277_v56 = vmul.f32 1.442695, %v1269_v55 }
 0x534   :  { %v1266_v38 = vpop.xlane.xlu1 %1265  ;;  %v1288_v26 = vsel %vm575_vm6, %v3231_v43, 0.0 }
 0x535   :  { %v1272_v46 = vsub.f32 %v1248_v17, %v1266_v38  ;;  %1289 = vadd.xlane.f32.xlu1 %v1288_v26 }
 0x537   :  { %v3233_v18 = vpop.eup %3232  ;;  %v1283_v45 = vmul.f32 1.442695, %v1272_v46  ;;  %v3190_v46 = vld [vmem:[%s4026_s4] sm:$0xff]  }
 0x538   :  { %v1263_v44 = vpop.xlane.xlu0 %1262  ;;  %v1370_v47 = vpop.permute.xlu1 %1369  ;;  %v1285_v48 = vsel %vm575_vm6, %v3233_v18, 0.0 }
 0x539   :  { %3236 = vpow2.f32 %v1283_v45  ;;  %v1375_v49 = vsel %vm653_vm3, %v1370_v47, 0  ;;  %1286 = vadd.xlane.f32.xlu0 %v1285_v48  ;;  %v1271_v58 = vsub.f32 %v1247_v27, %v1263_v44 }
 0x53a   :  { %3031 = vmatpush3.bf16.msra.mxu0 %v1375_v49  ;;  %3238 = vpow2.f32 %v1277_v56 }
 0x53b   :  { %v3235_v50 = vpop.eup %3234  ;;  %3042 = vmatprep.subr.bf16.mxu0 %v3268_v0  ;;  %v1281_v59 = vmul.f32 1.442695, %v1271_v58 }
 0x53c   :  { %v1322_v51 = vpop.permute.xlu0 %1321  ;;  %v1294_v52 = vsel %vm575_vm6, %v3235_v50, 0.0 }
 0x53d   :  { %v1327_v53 = vsel %vm653_vm3, %v1322_v51, 0  ;;  %1295 = vadd.xlane.f32.xlu1 %v1294_v52  ;;  %3240 = vpow2.f32 %v1281_v59 }
 0x53e   :  { %3025 = vmatpush3.bf16.msra.mxu1 %v1327_v53 }
 0x53f   :  { %3036 = vmatprep.subr.bf16.mxu1 %v3268_v0 }
 0x543   :  { %v3237_v54 = vpop.eup %3236 }
 0x544   :  { %v1300_v2 = vsel %vm575_vm6, %v3237_v54, 0.0  ;;  %v3239_v61 = vpop.eup %3238 }
 0x545   :  { %1301 = vadd.xlane.f32.xlu1 %v1300_v2  ;;  %v1291_v62 = vsel %vm575_vm6, %v3239_v61, 0.0 }
 0x547   :  { %v3241_v1 = vpop.eup %3240 }
 0x548   :  { %v1297_v3 = vsel %vm575_vm6, %v3241_v1, 0.0 }
 0x54f   :  { %1465 = vrot.lane.b32.xlu0 %v3417_v29, %s3276_s24  ;;  %v1418_v29 = vpop.permute.xlu1 %1417 }
 0x550   :  { %v1423_v22 = vsel %vm653_vm3, %v1418_v29, 0 }
 0x556   :  { %1513 = vrot.lane.b32.xlu1 %v3423_v34, %s3276_s24 }
 0x56e   :  { %1292 = vadd.xlane.f32.xlu0 %v1291_v62 }
 0x572   :  { %1298 = vadd.xlane.f32.xlu0 %v1297_v3 }
 0x588   :  { %1561 = vrot.lane.b32.xlu0 %v3425_v37, %s3276_s24 }
 0x5c2   :  { %v1290_v34 = vpop.xlane.xlu1 %1289 }
 0x5c3   :  { %3242 = vrcp.f32 %v1290_v34 }
 0x5c6   :  { %v1287_v4 = vpop.xlane.xlu0 %1286 }
 0x5c7   :  { %3244 = vrcp.f32 %v1287_v4 }
 0x5ca   :  { %v1296_v5 = vpop.xlane.xlu1 %1295  ;;  %v1466_v6 = vpop.permute.xlu0 %1465 }
 0x5cb   :  { %3246 = vrcp.f32 %v1296_v5  ;;  %v1471_v19 = vsel %vm653_vm3, %v1466_v6, 0 }
 0x5cd   :  { %v3243_v9 = vpop.eup %3242 }
 0x5ce   :  { %v1310_v10 = vmul.f32 %v3243_v9, %v3231_v43 }
 0x5d0   :  { %v1316_v11 = vpack.c.bf16 %v1310_v10, %v1310_v10 }
 0x5d1   :  { %v3245_v16 = vpop.eup %3244 }
 0x5d2   :  { %v1309_v17 = vmul.f32 %v3245_v16, %v3233_v18  ;;  %3033 = vmatmul.mubr.msk.bf16.vlgmr.msra.gmra.mrb[44].mxu0 %vm575_vm6, %v1316_v11  ;;  %v1302_v25 = vpop.xlane.xlu1 %1301  ;;  %v3191_v18 = vld [vmem:[%s4026_s4 + $0x8] sm:$0xff]  }
 0x5d3   :  { %3043 = vmatpush3.bf16.msra.mxu0 %v1471_v19  ;;  %3044 = vmatprep.mubr.msk.bf16.mxu0 %vm3269_vm0, %v3268_v0  ;;  %3248 = vrcp.f32 %v1302_v25 }
 0x5d4   :  { %v1315_v37 = vpack.c.bf16 %v1309_v17, %v1309_v17  ;;  %3054 = vmatprep.subr.bf16.mxu0 %v3268_v0 }
 0x5d5   :  { %v3247_v20 = vpop.eup %3246 }
 0x5d6   :  { %v1312_v8 = vmul.f32 %v3247_v20, %v3235_v50  ;;  %3027 = vmatmul.mubr.msk.bf16.vlgmr.msra.gmra.mrb[40].mxu1 %vm575_vm6, %v1315_v37  ;;  %v1514_v41 = vpop.permute.xlu1 %1513 }
 0x5d7   :  { %3037 = vmatpush3.bf16.msra.mxu1 %v1423_v22  ;;  %3038 = vmatprep.mubr.msk.bf16.mxu1 %vm3269_vm0, %v3268_v0  ;;  %v1519_v21 = vsel %vm653_vm3, %v1514_v41, 0 }
 0x5d8   :  { %v1318_v23 = vpack.c.bf16 %v1312_v8, %v1312_v8  ;;  %3048 = vmatprep.subr.bf16.mxu1 %v3268_v0 }
 0x5da   :  { %3045 = vmatmul.mubr.msk.bf16.vlgmr.msra.gmra.mrb[48].mxu0 %vm575_vm6, %v1318_v23 }
 0x5db   :  { %3056 = vmatprep.mubr.msk.bf16.mxu0 %vm3269_vm0, %v3268_v0 }
 0x5dd   :  { %v3249_v31 = vpop.eup %3248 }
 0x5de   :  { %v1314_v33 = vmul.f32 %v3249_v31, %v3237_v54 }
 0x5e0   :  { %v1320_v39 = vpack.c.bf16 %v1314_v33, %v1314_v33 }
 0x5fb   :  { %v1293_v27 = vpop.xlane.xlu0 %1292 }
 0x5fc   :  { %3250 = vrcp.f32 %v1293_v27 }
 0x5ff   :  { %v1299_v12 = vpop.xlane.xlu0 %1298 }
 0x600   :  { %3252 = vrcp.f32 %v1299_v12 }
 0x603   :  { %v1562_v35 = vpop.permute.xlu0 %1561 }
 0x604   :  { %v1567_v36 = vsel %vm653_vm3, %v1562_v35, 0  ;;  %vm2106_vm3 = vcmask 1045509  }
 0x605   :  { %3055 = vmatpush3.bf16.msra.mxu0 %v1567_v36 }
 0x606   :  { %v3251_v15 = vpop.eup %3250  ;;  %3076 = vmatprep.subr.bf16.mxu0 %v3268_v0 }
 0x607   :  { %v1311_v40 = vmul.f32 %v3251_v15, %v3239_v61 }
 0x608   :  { %3057 = vmatmul.mubr.msk.bf16.vlgmr.msra.gmra.mrb[52].mxu0 %vm575_vm6, %v1320_v39 }
 0x609   :  { %v1317_v42 = vpack.c.bf16 %v1311_v40, %v1311_v40  ;;  %3080 = vmatprep.mubr.msk.bf16.mxu0 %vm3269_vm0, %v3268_v0 }
 0x60a   :  { %v3253_v43 = vpop.eup %3252 }
 0x60b   :  { %3039 = vmatmul.mubr.msk.bf16.vlgmr.msra.gmra.mrb[44].mxu1 %vm575_vm6, %v1317_v42  ;;  %v1313_v38 = vmul.f32 %v3253_v43, %v3241_v1 }
 0x60c   :  { %3049 = vmatpush3.bf16.msra.mxu1 %v1519_v21  ;;  %3050 = vmatprep.mubr.msk.bf16.mxu1 %vm3269_vm0, %v3268_v0  ;;  %v3262_v21 = vld [vmem:[%s4023_s0] sm:$0xff] }
 0x60d   :  { %3060 = vmatprep.subr.bf16.mxu1 %v3268_v0  ;;  %v1319_v26 = vpack.c.bf16 %v1313_v38, %v1313_v38 }
 0x613   :  { %3051 = vmatmul.mubr.msk.bf16.vlgmr.msra.gmra.mrb[48].mxu1 %vm575_vm6, %v1319_v26  ;;  %v3263_v26 = vld [vmem:[%s4023_s0 + $0x8] sm:$0xff]  ;;  %vm2357_vm6 = vcmask 523648  }
 0x614   :  { %3064 = vmatprep.mubr.msk.bf16.mxu1 %vm3269_vm0, %v3268_v0  ;;  %3061 = vmatpush3.bf16.msra.mxu1 %v3190_v46 }
 0x615   :  { %3062 = vmatprep.subr.bf16.mxu1 %v3268_v0 }
 0x618   :  { %3063 = vmatpush3.bf16.msra.mxu1 %v3191_v18 }
 0x619   :  { %3092 = vmatprep.subr.bf16.mxu1 %v3268_v0 }
 0x6a5   :  { %v1411_v45 = vpop.f32.mrb[44].mxu0 }
 0x6a6   :  { %v3034_v44 = vpop.f32.mrb[45].mxu0 }
 0x6a7   :  { %v1414_v47 = vpop.f32.mrb[46].mxu0 }
 0x6a8   :  { %v3035_v48 = vpop.f32.mrb[47].mxu0 }
 0x6a9   :  { %v1363_v49 = vpop.f32.mrb[40].mxu1 }
 0x6aa   :  { %v3168_v50 = vpack.i.bf16 %v1411_v45, %v1363_v49  ;;  %v3028_v51 = vpop.f32.mrb[41].mxu1 }
 0x6ab   :  { %v1366_v52 = vpop.f32.mrb[42].mxu1  ;;  %v3264_v51 = vld [vmem:[%s4023_s0 + $0x10] sm:$0xff] }
 0x6ac   :  { %v3029_v53 = vpop.f32.mrb[43].mxu1  ;;  %3169 = vrot.lane.b32.xlu1 %v3168_v50, %s3277_s29 }
 0x6ad   :  { %v1507_v54 = vpop.f32.mrb[48].mxu0  ;;  %v3265_v53 = vld [vmem:[%s4023_s0 + $0x18] sm:$0xff] }
 0x6ae   :  { %v3046_v2 = vpop.f32.mrb[49].mxu0 }
 0x6af   :  { %v1510_v55 = vpop.f32.mrb[50].mxu0 }
 0x6b0   :  { %v3047_v56 = vpop.f32.mrb[51].mxu0 }
 0x6db   :  { %v1603_v58 = vpop.f32.mrb[52].mxu0 }
 0x6dc   :  { %v3058_v59 = vpop.f32.mrb[53].mxu0 }
 0x6dd   :  { %v1606_v61 = vpop.f32.mrb[54].mxu0 }
 0x6de   :  { %v1459_v62 = vpop.f32.mrb[44].mxu1  ;;  %v3059_v1 = vpop.f32.mrb[55].mxu0 }
 0x6df   :  { %v3173_v3 = vpack.i.bf16 %v1507_v54, %v1459_v62  ;;  %v3040_v29 = vpop.f32.mrb[45].mxu1  ;;  %v3266_v1 = vld [vmem:[%s4023_s0 + $0x20] sm:$0xff] }
 0x6e0   :  { %v1462_v34 = vpop.f32.mrb[46].mxu1  ;;  %v3267_v29 = vld [vmem:[%s4023_s0 + $0x28] sm:$0xff] }
 0x6e1   :  { %v3041_v4 = vpop.f32.mrb[47].mxu1  ;;  %3174 = vrot.lane.b32.xlu0 %v3173_v3, %s3277_s29 }
 0x6e6   :  { %v1555_v5 = vpop.f32.mrb[48].mxu1 }
 0x6e7   :  { %v3178_v9 = vpack.i.bf16 %v1603_v58, %v1555_v5  ;;  %v3052_v10 = vpop.f32.mrb[49].mxu1  ;;  %v3194_v5 = vld [vmem:[%s4029_s8] sm:$0xff]  }
 0x6e8   :  { %v1558_v6 = vpop.f32.mrb[50].mxu1  ;;  %v2763_v10 = vld [vmem:[%s4030_s7] ss:$0 sm:$0xff] }
 0x6e9   :  { %v3053_v11 = vpop.f32.mrb[51].mxu1  ;;  %3179 = vrot.lane.b32.xlu1 %v3178_v9, %s3277_s29  ;;  %v3195_v9 = vld [vmem:[%s4029_s8 + $0x8] sm:$0xff]  }
 0x71e   :  { %v3170_v16 = vpop.permute.xlu1 %3169 }
 0x71f   :  { %v3172_v17 = vunpack.i.h.bf16 %v3170_v16  ;;  %v3171_v19 = vunpack.i.l.bf16 %v3170_v16 }
 0x721   :  { %v1634_v37 = vsel %vm259_vm2, %v3666_v7, %v3172_v17  ;;  %v1633_v20 = vsel %vm259_vm2, %v3664_v63, %v3171_v19 }
 0x722   :  { %v1639_v22 = vpack.c.bf16 %v1634_v37, %v1633_v20 }
 0x724   :  { %3065 = vmatmul.mubr.msk.bf16.vlgmr.msra.gmra.mrb[52].mxu1 %vm183_vm1, %v1639_v22 }
 0x725   :  { %3068 = vmatprep.mubr.msk.bf16.mxu1 %vm3269_vm0, %v3268_v0  ;;  %3093 = vmatpush3.bf16.msra.mxu1 %v3194_v5 }
 0x726   :  { %3094 = vmatprep.subr.bf16.mxu1 %v3268_v0 }
 0x729   :  { %3095 = vmatpush3.bf16.msra.mxu1 %v3195_v9 }
 0x72a   :  { %3124 = vmatprep.subr.bf16.mxu1 %v3268_v0 }
 0x753   :  { %v3175_v8 = vpop.permute.xlu0 %3174 }
 0x754   :  { %v3177_v23 = vunpack.i.h.bf16 %v3175_v8  ;;  %v3176_v25 = vunpack.i.l.bf16 %v3175_v8 }
 0x756   :  { %v1636_v27 = vsel %vm259_vm2, %v3670_v14, %v3177_v23  ;;  %v1635_v31 = vsel %vm259_vm2, %v3668_v13, %v3176_v25  ;;  %v3192_v13 = vld [vmem:[%s4027_s6] sm:$0xff]   ;;  %v3193_v14 = vld [vmem:[%s4027_s6 + $0x8] sm:$0xff]  }
 0x757   :  { %v1640_v12 = vpack.c.bf16 %v1636_v27, %v1635_v31  ;;  %3077 = vmatpush3.bf16.msra.mxu0 %v3192_v13 }
 0x758   :  { %3078 = vmatprep.subr.bf16.mxu0 %v3268_v0 }
 0x759   :  { %3069 = vmatmul.mubr.msk.bf16.gmra.mrb[56].mxu1 %vm183_vm1, %v1640_v12 }
 0x75a   :  { %3072 = vmatprep.mubr.msk.bf16.mxu1 %vm3269_vm0, %v3268_v0 }
 0x75b   :  { %v3180_v63 = vpop.permute.xlu1 %3179  ;;  %3079 = vmatpush3.bf16.msra.mxu0 %v3193_v14 }
 0x75c   :  { %v3182_v7 = vunpack.i.h.bf16 %v3180_v63  ;;  %v3181_v33 = vunpack.i.l.bf16 %v3180_v63  ;;  %3108 = vmatprep.subr.bf16.mxu0 %v3268_v0 }
 0x75e   :  { %v1638_v35 = vsel %vm259_vm2, %v3672_v24, %v3182_v7  ;;  %v1637_v36 = vsel %vm259_vm2, %v3674_v32, %v3181_v33  ;;  %v2757_v24 = vld [vmem:[%s4028_s5] ss:$0 sm:$0xff] }
 0x75f   :  { %v1641_v15 = vpack.c.bf16 %v1638_v35, %v1637_v36 }
 0x761   :  { %3073 = vmatmul.mubr.msk.bf16.gmra.mrb[60].mxu1 %vm183_vm1, %v1641_v15 }
 0x762   :  { %3096 = vmatprep.mubr.msk.bf16.mxu1 %vm3269_vm0, %v3268_v0 }
 0x7f7   :  { %v1708_v32 = vpop.f32.mrb[52].mxu1 }
 0x7f8   :  { %v1709_v39 = vadd.f32 %v2757_v24, %v1708_v32  ;;  %v3066_v40 = vpop.f32.mrb[53].mxu1 }
 0x7f9   :  { %v1711_v41 = vpop.f32.mrb[54].mxu1 }
 0x7fa   :  { %v1712_v42 = vadd.f32 %v2757_v24, %v1711_v41  ;;  %v3067_v43 = vpop.f32.mrb[55].mxu1  ;;  %v1731_v38 = vadd.f32 %v3262_v21, %v1709_v39 }
 0x7fc   :  { %v1732_v46 = vadd.f32 %v3263_v26, %v1712_v42 }
 0x7fe   :  { %v1737_v18 = vpack.c.bf16 %v1732_v46, %v1731_v38 }
 0x800   :  { %3081 = vmatmul.mubr.msk.bf16.vlgmr.msra.gmra.mrb[56].mxu0 %vm183_vm1, %v1737_v18  ;;  %v3196_v18 = vld [vmem:[%s4031_s10] sm:$0xff]  }
 0x801   :  { %3084 = vmatprep.mubr.msk.bf16.mxu0 %vm3269_vm0, %v3268_v0  ;;  %3109 = vmatpush3.bf16.msra.mxu0 %v3196_v18 }
 0x802   :  { %3110 = vmatprep.subr.bf16.mxu0 %v3268_v0 }
 0x82c   :  { %v1716_v45 = vpop.f32.mrb[56].mxu1 }
 0x82d   :  { %v1717_v44 = vadd.f32 %v2757_v24, %v1716_v45  ;;  %v3070_v47 = vpop.f32.mrb[57].mxu1  ;;  %v3197_v45 = vld [vmem:[%s4031_s10 + $0x8] sm:$0xff]  }
 0x82e   :  { %v1719_v48 = vpop.f32.mrb[58].mxu1  ;;  %3111 = vmatpush3.bf16.msra.mxu0 %v3197_v45 }
 0x82f   :  { %v1720_v49 = vadd.f32 %v2757_v24, %v1719_v48  ;;  %v3071_v50 = vpop.f32.mrb[59].mxu1  ;;  %v1733_v52 = vadd.f32 %v3264_v51, %v1717_v44  ;;  %3132 = vmatprep.subr.bf16.mxu0 %v3268_v0  ;;  %v2769_v44 = vld [vmem:[%s4032_s9] ss:$0 sm:$0xff] }
 0x831   :  { %v1734_v54 = vadd.f32 %v3265_v53, %v1720_v49 }
 0x833   :  { %v1738_v2 = vpack.c.bf16 %v1734_v54, %v1733_v52 }
 0x834   :  { %v1724_v55 = vpop.f32.mrb[60].mxu1 }
 0x835   :  { %v1725_v56 = vadd.f32 %v2757_v24, %v1724_v55  ;;  %v3074_v58 = vpop.f32.mrb[61].mxu1  ;;  %3085 = vmatmul.mubr.msk.bf16.gmra.mrb[60].mxu0 %vm183_vm1, %v1738_v2 }
 0x836   :  { %v1727_v59 = vpop.f32.mrb[62].mxu1  ;;  %3088 = vmatprep.mubr.msk.bf16.mxu0 %vm3269_vm0, %v3268_v0 }
 0x837   :  { %v1728_v61 = vadd.f32 %v2757_v24, %v1727_v59  ;;  %v3075_v62 = vpop.f32.mrb[63].mxu1  ;;  %v1735_v3 = vadd.f32 %v3266_v1, %v1725_v56 }
 0x839   :  { %v1736_v34 = vadd.f32 %v3267_v29, %v1728_v61 }
 0x83b   :  { %v1739_v4 = vpack.c.bf16 %v1736_v34, %v1735_v3 }
 0x83d   :  { %3089 = vmatmul.mubr.msk.bf16.gmra.mrb[64].mxu0 %vm183_vm1, %v1739_v4 }
 0x83e   :  { %3112 = vmatprep.mubr.msk.bf16.mxu0 %vm3269_vm0, %v3268_v0 }
 0x8d3   :  { %v1806_v6 = vpop.f32.mrb[56].mxu0 }
 0x8d4   :  { %v1807_v11 = vadd.f32 %v2763_v10, %v1806_v6  ;;  %v3082_v16 = vpop.f32.mrb[57].mxu0 }
 0x8d5   :  { %v1809_v17 = vpop.f32.mrb[58].mxu0 }
 0x8d6   :  { %v1829_v19 = vmax.f32 %v1807_v11, 0.0  ;;  %v1810_v37 = vadd.f32 %v2763_v10, %v1809_v17  ;;  %v3083_v20 = vpop.f32.mrb[59].mxu0 }
 0x8d7   :  { %v2781_v20 = vld [vmem:[%s4034_s12] ss:$0 sm:$0xff] }
 0x8d8   :  { %v1830_v22 = vmax.f32 %v1810_v37, 0.0  ;;  %v1835_v8 = vadd.f32 %v1829_v19, %v1731_v38  ;;  %v2775_v19 = vld [vmem:[%s4033_s11] ss:$0 sm:$0xff] }
 0x8da   :  { %v1836_v23 = vadd.f32 %v1830_v22, %v1732_v46 }
 0x8dc   :  { %v1841_v25 = vpack.c.bf16 %v1836_v23, %v1835_v8 }
 0x8de   :  { %3097 = vmatmul.mubr.msk.bf16.vlgmr.msra.gmra.mrb[64].mxu1 %vm183_vm1, %v1841_v25 }
 0x8df   :  { %3100 = vmatprep.mubr.msk.bf16.mxu1 %vm3269_vm0, %v3268_v0 }
 0x908   :  { %v1814_v27 = vpop.f32.mrb[60].mxu0 }
 0x909   :  { %v1815_v31 = vadd.f32 %v2763_v10, %v1814_v27  ;;  %v3086_v12 = vpop.f32.mrb[61].mxu0 }
 0x90a   :  { %v1817_v63 = vpop.f32.mrb[62].mxu0 }
 0x90b   :  { %v1831_v7 = vmax.f32 %v1815_v31, 0.0  ;;  %v1818_v33 = vadd.f32 %v2763_v10, %v1817_v63  ;;  %v3087_v35 = vpop.f32.mrb[63].mxu0 }
 0x90d   :  { %v1832_v36 = vmax.f32 %v1818_v33, 0.0  ;;  %v1837_v15 = vadd.f32 %v1831_v7, %v1733_v52 }
 0x90f   :  { %v1838_v13 = vadd.f32 %v1832_v36, %v1734_v54 }
 0x910   :  { %v1822_v14 = vpop.f32.mrb[64].mxu0 }
 0x911   :  { %v1842_v24 = vpack.c.bf16 %v1838_v13, %v1837_v15  ;;  %v1823_v32 = vadd.f32 %v2763_v10, %v1822_v14  ;;  %v3090_v39 = vpop.f32.mrb[65].mxu0 }
 0x912   :  { %v1825_v40 = vpop.f32.mrb[66].mxu0 }
 0x913   :  { %v1833_v41 = vmax.f32 %v1823_v32, 0.0  ;;  %v1826_v42 = vadd.f32 %v2763_v10, %v1825_v40  ;;  %v3091_v43 = vpop.f32.mrb[67].mxu0  ;;  %3101 = vmatmul.mubr.msk.bf16.gmra.mrb[68].mxu1 %vm183_vm1, %v1842_v24 }
 0x914   :  { %3104 = vmatprep.mubr.msk.bf16.mxu1 %vm3269_vm0, %v3268_v0 }
 0x915   :  { %v1834_v21 = vmax.f32 %v1826_v42, 0.0  ;;  %v1839_v38 = vadd.f32 %v1833_v41, %v1735_v3 }
 0x917   :  { %v1840_v26 = vadd.f32 %v1834_v21, %v1736_v34 }
 0x919   :  { %v1843_v46 = vpack.c.bf16 %v1840_v26, %v1839_v38 }
 0x91b   :  { %3105 = vmatmul.mubr.msk.bf16.gmra.mrb[72].mxu1 %vm183_vm1, %v1843_v46 }
 0x91c   :  { %3128 = vmatprep.mubr.msk.bf16.mxu1 %vm3269_vm0, %v3268_v0 }
 0x9b1   :  { %v1910_v47 = vpop.f32.mrb[64].mxu1 }
 0x9b2   :  { %v1911_v48 = vadd.f32 %v2769_v44, %v1910_v47  ;;  %v3098_v49 = vpop.f32.mrb[65].mxu1 }
 0x9b3   :  { %v1913_v50 = vpop.f32.mrb[66].mxu1 }
 0x9b4   :  { %v1914_v51 = vadd.f32 %v2769_v44, %v1913_v50  ;;  %v3099_v52 = vpop.f32.mrb[67].mxu1  ;;  %v1933_v53 = vmax.f32 %v1911_v48, 0.0 }
 0x9b6   :  { %v1934_v54 = vmax.f32 %v1914_v51, 0.0 }
 0x9b8   :  { %v1939_v2 = vpack.c.bf16 %v1934_v54, %v1933_v53 }
 0x9ba   :  { %3113 = vmatmul.mubr.msk.bf16.vlgmr.msra.gmra.mrb[68].mxu0 %vm183_vm1, %v1939_v2 }
 0x9bb   :  { %3116 = vmatprep.mubr.msk.bf16.mxu0 %vm3269_vm0, %v3268_v0 }
 0x9e6   :  { %v1918_v55 = vpop.f32.mrb[68].mxu1 }
 0x9e7   :  { %v1919_v56 = vadd.f32 %v2769_v44, %v1918_v55  ;;  %v3102_v58 = vpop.f32.mrb[69].mxu1 }
 0x9e8   :  { %v1921_v59 = vpop.f32.mrb[70].mxu1 }
 0x9e9   :  { %v1922_v61 = vadd.f32 %v2769_v44, %v1921_v59  ;;  %v3103_v62 = vpop.f32.mrb[71].mxu1  ;;  %v1935_v1 = vmax.f32 %v1919_v56, 0.0 }
 0x9eb   :  { %v1936_v3 = vmax.f32 %v1922_v61, 0.0 }
 0x9ed   :  { %v1940_v29 = vpack.c.bf16 %v1936_v3, %v1935_v1 }
 0x9ee   :  { %v1926_v34 = vpop.f32.mrb[72].mxu1 }
 0x9ef   :  { %v1927_v4 = vadd.f32 %v2769_v44, %v1926_v34  ;;  %v3106_v5 = vpop.f32.mrb[73].mxu1  ;;  %3117 = vmatmul.mubr.msk.bf16.gmra.mrb[72].mxu0 %vm183_vm1, %v1940_v29  ;;  %v2076_v34 = vsub.s32 %v3525_v28, %v3483_v57 }
 0x9f0   :  { %v1929_v9 = vpop.f32.mrb[74].mxu1  ;;  %3120 = vmatprep.mubr.msk.bf16.mxu0 %vm3269_vm0, %v3268_v0 }
 0x9f1   :  { %v1930_v10 = vadd.f32 %v2769_v44, %v1929_v9  ;;  %v3107_v6 = vpop.f32.mrb[75].mxu1  ;;  %v1937_v11 = vmax.f32 %v1927_v4, 0.0 }
 0x9f3   :  { %v1938_v16 = vmax.f32 %v1930_v10, 0.0 }
 0x9f5   :  { %v1941_v17 = vpack.c.bf16 %v1938_v16, %v1937_v11 }
 0x9f7   :  { %3121 = vmatmul.mubr.msk.bf16.gmra.mrb[76].mxu0 %vm183_vm1, %v1941_v17 }
 0x9f8   :  { %3136 = vmatprep.mubr.msk.bf16.mxu0 %vm3269_vm0, %v3268_v0 }
 0xa8d   :  { %v2008_v37 = vpop.f32.mrb[68].mxu0 }
 0xa8e   :  { %v3865_v22 = vadd.f32 %v2775_v19, %v2008_v37  ;;  %v3114_v8 = vpop.f32.mrb[69].mxu0 }
 0xa8f   :  { %v2011_v23 = vpop.f32.mrb[70].mxu0 }
 0xa90   :  { %v3867_v25 = vadd.f32 %v2775_v19, %v2011_v23  ;;  %v3115_v27 = vpop.f32.mrb[71].mxu0  ;;  %v2038_v31 = vmul.f32 %v2781_v20, %v3865_v22 }
 0xa92   :  { %2219 = vrot.lane.b32.xlu0 %v2038_v31, %s3275_s23  ;;  %v2039_v12 = vmul.f32 %v2781_v20, %v3867_v25  ;;  %v2044_v38 = vsel %vm259_vm2, %v2038_v31, 0.0 }
 0xa94   :  { %2221 = vrot.lane.b32.xlu1 %v2039_v12, %s3275_s23  ;;  %v2047_v26 = vsel %vm259_vm2, %v2039_v12, 0.0 }
 0xac2   :  { %v2016_v63 = vpop.f32.mrb[72].mxu0 }
 0xac3   :  { %v3873_v7 = vadd.f32 %v2775_v19, %v2016_v63  ;;  %v3118_v33 = vpop.f32.mrb[73].mxu0 }
 0xac4   :  { %v2019_v35 = vpop.f32.mrb[74].mxu0 }
 0xac5   :  { %v3875_v36 = vadd.f32 %v2775_v19, %v2019_v35  ;;  %v3119_v15 = vpop.f32.mrb[75].mxu0  ;;  %v2040_v13 = vmul.f32 %v2781_v20, %v3873_v7 }
 0xac7   :  { %2223 = vrot.lane.b32.xlu0 %v2040_v13, %s3275_s23  ;;  %v2041_v14 = vmul.f32 %v2781_v20, %v3875_v36  ;;  %v2050_v46 = vsel %vm259_vm2, %v2040_v13, 0.0 }
 0xac9   :  { %2225 = vrot.lane.b32.xlu1 %v2041_v14, %s3275_s23  ;;  %v2053_v18 = vsel %vm259_vm2, %v2041_v14, 0.0 }
 0xaca   :  { %v2024_v24 = vpop.f32.mrb[76].mxu0 }
 0xacb   :  { %v3881_v32 = vadd.f32 %v2775_v19, %v2024_v24  ;;  %v3122_v39 = vpop.f32.mrb[77].mxu0 }
 0xacc   :  { %v2027_v40 = vpop.f32.mrb[78].mxu0 }
 0xacd   :  { %v3883_v41 = vadd.f32 %v2775_v19, %v2027_v40  ;;  %v3123_v42 = vpop.f32.mrb[79].mxu0  ;;  %v2042_v43 = vmul.f32 %v2781_v20, %v3881_v32 }
 0xacf   :  { %2227 = vrot.lane.b32.xlu0 %v2042_v43, %s3275_s23  ;;  %v2043_v21 = vmul.f32 %v2781_v20, %v3883_v41  ;;  %v2056_v45 = vsel %vm259_vm2, %v2042_v43, 0.0 }
 0xad1   :  { %2229 = vrot.lane.b32.xlu1 %v2043_v21, %s3275_s23  ;;  %v2059_v47 = vsel %vm259_vm2, %v2043_v21, 0.0 }
 0xaee   :  { %2045 = vadd.xlane.f32.xlu0 %v2044_v38 }
 0xaf5   :  { %2048 = vadd.xlane.f32.xlu1 %v2047_v26 }
 0xaf9   :  { %2051 = vadd.xlane.f32.xlu1 %v2050_v46 }
 0xafd   :  { %2054 = vadd.xlane.f32.xlu1 %v2053_v18 }
 0xb01   :  { %2057 = vadd.xlane.f32.xlu1 %v2056_v45 }
 0xb04   :  { %v2220_v44 = vpop.permute.xlu0 %2219 }
 0xb05   :  { %2060 = vadd.xlane.f32.xlu1 %v2059_v47  ;;  %v2237_v48 = vsel %vm259_vm2, %v2220_v44, 0.0 }
 0xb06   :  { %v2222_v49 = vpop.permute.xlu1 %2221  ;;  %2238 = vadd.xlane.f32.xlu0 %v2237_v48 }
 0xb07   :  { %v2240_v50 = vsel %vm259_vm2, %v2222_v49, 0.0 }
 0xb0a   :  { %2241 = vadd.xlane.f32.xlu0 %v2240_v50 }
 0xb39   :  { %v2224_v51 = vpop.permute.xlu0 %2223 }
 0xb3a   :  { %v2243_v52 = vsel %vm259_vm2, %v2224_v51, 0.0 }
 0xb3b   :  { %v2226_v53 = vpop.permute.xlu1 %2225  ;;  %2244 = vadd.xlane.f32.xlu0 %v2243_v52 }
 0xb3c   :  { %v2246_v54 = vsel %vm259_vm2, %v2226_v53, 0.0 }
 0xb3f   :  { %2247 = vadd.xlane.f32.xlu0 %v2246_v54 }
 0xb41   :  { %v2228_v2 = vpop.permute.xlu0 %2227 }
 0xb42   :  { %v2249_v55 = vsel %vm259_vm2, %v2228_v2, 0.0 }
 0xb43   :  { %2250 = vadd.xlane.f32.xlu0 %v2249_v55  ;;  %v2230_v56 = vpop.permute.xlu1 %2229 }
 0xb44   :  { %v2252_v58 = vsel %vm259_vm2, %v2230_v56, 0.0 }
 0xb47   :  { %2253 = vadd.xlane.f32.xlu0 %v2252_v58 }
 0xb7b   :  { %v2046_v62 = vpop.xlane.xlu0 %2045 }
 0xb7c   :  { %v2062_v4 = vmul.f32 0.25, %v2046_v62 }
 0xb7e   :  { %v2077_v16 = vrot.slane %v2062_v4, %v2076_v34 }
 0xb82   :  { %v2049_v59 = vpop.xlane.xlu1 %2048 }
 0xb83   :  { %v2063_v3 = vmul.f32 0.25, %v2049_v59 }
 0xb85   :  { %v2081_v10 = vrot.slane %v2063_v3, %v2076_v34 }
 0xb86   :  { %v2052_v61 = vpop.xlane.xlu1 %2051 }
 0xb87   :  { %v2064_v29 = vmul.f32 0.25, %v2052_v61  ;;  %v2099_v20 = vsel %vm2098_vm12, %v2081_v10, %v2077_v16 }
 0xb89   :  { %v2085_v11 = vrot.slane %v2064_v29, %v2076_v34 }
 0xb8a   :  { %v2055_v1 = vpop.xlane.xlu1 %2054 }
 0xb8b   :  { %v2065_v5 = vmul.f32 0.25, %v2055_v1  ;;  %v2101_v23 = vsel %vm2100_vm13, %v2085_v11, %v2099_v20  ;;  %v2138_v11 = vsub.s32 2, %v3483_v57 }
 0xb8d   :  { %v2089_v17 = vrot.slane %v2065_v5, %v2076_v34 }
 0xb8e   :  { %v2058_v9 = vpop.xlane.xlu1 %2057 }
 0xb8f   :  { %v2066_v6 = vmul.f32 0.25, %v2058_v9  ;;  %v2103_v31 = vsel %vm2102_vm14, %v2089_v17, %v2101_v23  ;;  %v2145_v17 = vsub.s32 3, %v3483_v57 }
 0xb91   :  { %v2093_v19 = vrot.slane %v2066_v6, %v2076_v34 }
 0xb92   :  { %v2061_v37 = vpop.xlane.xlu1 %2060 }
 0xb93   :  { %v2067_v8 = vmul.f32 0.25, %v2061_v37  ;;  %v2105_v12 = vsel %vm2104_vm15, %v2093_v19, %v2103_v31  ;;  %v2239_v15 = vpop.xlane.xlu0 %2238  ;;  %v2152_v37 = vsub.s32 4, %v3483_v57 }
 0xb94   :  { %v2255_v42 = vmul.f32 0.25, %v2239_v15 }
 0xb95   :  { %v2097_v27 = vrot.slane %v2067_v8, %v2076_v34  ;;  %v2159_v8 = vsub.s32 5, %v3483_v57  ;;  %v3198_v57 = vld [vmem:[%s4026_s4 + $0x10] sm:$0xff]  }
 0xb96   :  { %v2270_v18 = vrot.slane %v2255_v42, %v2076_v34  ;;  %3125 = vmatpush3.bf16.msra.mxu1 %v3198_v57 }
 0xb97   :  { %v2107_v63 = vsel %vm2106_vm3, %v2097_v27, %v2105_v12  ;;  %v2242_v13 = vpop.xlane.xlu0 %2241  ;;  %3126 = vmatprep.subr.bf16.mxu1 %v3268_v0 }
 0xb98   :  { %v2109_v33 = vsel %vm150_vm4, %v2107_v63, -1e+30  ;;  %v2256_v39 = vmul.f32 0.25, %v2242_v13 }
 0xb99   :  { %v2111_v35 = vsel %vm2110_vm5, %v2109_v33, -inf }
 0xb9a   :  { %2112 = vmax.xlane.f32.xlu1 %v2111_v35  ;;  %v2274_v38 = vrot.slane %v2256_v39, %v2076_v34 }
 0xb9c   :  { %v2291_v48 = vsel %vm2098_vm12, %v2274_v38, %v2270_v18 }
 0xbc8   :  { %v2245_v14 = vpop.xlane.xlu0 %2244 }
 0xbc9   :  { %v2257_v40 = vmul.f32 0.25, %v2245_v14 }
 0xbcb   :  { %v2278_v46 = vrot.slane %v2257_v40, %v2076_v34 }
 0xbcc   :  { %v2248_v24 = vpop.xlane.xlu0 %2247 }
 0xbcd   :  { %v2258_v43 = vmul.f32 0.25, %v2248_v24  ;;  %v2292_v50 = vsel %vm2100_vm13, %v2278_v46, %v2291_v48 }
 0xbcf   :  { %v2282_v45 = vrot.slane %v2258_v43, %v2076_v34 }
 0xbd0   :  { %v2251_v21 = vpop.xlane.xlu0 %2250 }
 0xbd1   :  { %v2259_v26 = vmul.f32 0.25, %v2251_v21  ;;  %v2293_v52 = vsel %vm2102_vm14, %v2282_v45, %v2292_v50 }
 0xbd3   :  { %v2286_v44 = vrot.slane %v2259_v26, %v2076_v34 }
 0xbd4   :  { %v2254_v47 = vpop.xlane.xlu0 %2253 }
 0xbd5   :  { %v2260_v49 = vmul.f32 0.25, %v2254_v47  ;;  %v2294_v53 = vsel %vm2104_vm15, %v2286_v44, %v2293_v52 }
 0xbd7   :  { %v2290_v51 = vrot.slane %v2260_v49, %v2076_v34 }
 0xbd9   :  { %v2295_v54 = vsel %vm2106_vm3, %v2290_v51, %v2294_v53 }
 0xbda   :  { %v2297_v2 = vsel %vm150_vm4, %v2295_v54, -1e+30  ;;  %vm2170_vm4 = vcmask 392448  }
 0xbdb   :  { %v2298_v55 = vsel %vm2110_vm5, %v2297_v2, -inf }
 0xbdc   :  { %2299 = vmax.xlane.f32.xlu0 %v2298_v55 }
 0xc27   :  { %v2113_v56 = vpop.xlane.xlu1 %2112 }
 0xc28   :  { %v2114_v58 = vsub.f32 %v2109_v33, %v2113_v56 }
 0xc2a   :  { %v2115_v59 = vmul.f32 1.442695, %v2114_v58 }
 0xc2c   :  { %3254 = vpow2.f32 %v2115_v59 }
 0xc36   :  { %v3255_v61 = vpop.eup %3254 }
 0xc37   :  { %v2117_v62 = vsel %vm2110_vm5, %v3255_v61, 0.0 }
 0xc38   :  { %2118 = vadd.xlane.f32.xlu1 %v2117_v62 }
 0xc69   :  { %v2300_v1 = vpop.xlane.xlu0 %2299 }
 0xc6a   :  { %v2301_v3 = vsub.f32 %v2297_v2, %v2300_v1 }
 0xc6c   :  { %v2302_v29 = vmul.f32 1.442695, %v2301_v3 }
 0xc6e   :  { %3256 = vpow2.f32 %v2302_v29 }
 0xc78   :  { %v3257_v34 = vpop.eup %3256 }
 0xc79   :  { %v2304_v4 = vsel %vm2110_vm5, %v3257_v34, 0.0 }
 0xc7a   :  { %2305 = vadd.xlane.f32.xlu0 %v2304_v4 }
 0xcc5   :  { %v2119_v28 = vpop.xlane.xlu1 %2118 }
 0xcc6   :  { %3258 = vrcp.f32 %v2119_v28 }
 0xcd0   :  { %v3259_v5 = vpop.eup %3258 }
 0xcd1   :  { %v2121_v9 = vmul.f32 %v3259_v5, %v3255_v61 }
 0xcd3   :  { %v2132_v10 = vrot.slane %v2121_v9, %v2131_v30  ;;  %v2125_v6 = vrot.slane %v2121_v9, %v3490_v60  ;;  %v2139_v16 = vrot.slane %v2121_v9, %v2138_v11  ;;  %v2146_v19 = vrot.slane %v2121_v9, %v2145_v17 }
 0xcd4   :  { %v2153_v20 = vrot.slane %v2121_v9, %v2152_v37  ;;  %v2160_v23 = vrot.slane %v2121_v9, %v2159_v8 }
 0xcd5   :  { %2134 = vbcast.lane.b32.xlu0 %v2132_v10, 256  ;;  %2127 = vbcast.lane.b32.xlu1 %v2125_v6, 256 }
 0xcd9   :  { %2141 = vbcast.lane.b32.xlu0 %v2139_v16, 256 }
 0xcdd   :  { %2148 = vbcast.lane.b32.xlu0 %v2146_v19, 256 }
 0xce1   :  { %2155 = vbcast.lane.b32.xlu0 %v2153_v20, 256 }
 0xce5   :  { %2162 = vbcast.lane.b32.xlu0 %v2160_v23, 256 }
 0xd07   :  { %v2306_v27 = vpop.xlane.xlu0 %2305 }
 0xd08   :  { %3260 = vrcp.f32 %v2306_v27 }
 0xd12   :  { %v3261_v31 = vpop.eup %3260 }
 0xd13   :  { %v2308_v12 = vmul.f32 %v3261_v31, %v3257_v34 }
 0xd15   :  { %v2312_v63 = vrot.slane %v2308_v12, %v3490_v60  ;;  %v2319_v33 = vrot.slane %v2308_v12, %v2131_v30  ;;  %v2326_v35 = vrot.slane %v2308_v12, %v2138_v11  ;;  %v2333_v15 = vrot.slane %v2308_v12, %v2145_v17  ;;  %v3199_v60 = vld [vmem:[%s4026_s4 + $0x18] sm:$0xff]  }
 0xd16   :  { %v2340_v13 = vrot.slane %v2308_v12, %v2152_v37  ;;  %v2347_v14 = vrot.slane %v2308_v12, %v2159_v8  ;;  %3127 = vmatpush3.bf16.msra.mxu1 %v3199_v60 }
 0xd17   :  { %2314 = vbcast.lane.b32.xlu1 %v2312_v63, 256  ;;  %3140 = vmatprep.subr.bf16.mxu1 %v3268_v0 }
 0xd1b   :  { %2321 = vbcast.lane.b32.xlu1 %v2319_v33, 256 }
 0xd1f   :  { %2328 = vbcast.lane.b32.xlu1 %v2326_v35, 256 }
 0xd23   :  { %2335 = vbcast.lane.b32.xlu1 %v2333_v15, 256 }
 0xd27   :  { %2342 = vbcast.lane.b32.xlu1 %v2340_v13, 256 }
 0xd2b   :  { %2349 = vbcast.lane.b32.xlu1 %v2347_v14, 256 }
 0xd47   :  { %v2135_v24 = vpop.permute.xlu0 %2134  ;;  %v2128_v42 = vpop.permute.xlu1 %2127 }
 0xd48   :  { %v2165_v21 = vmul.f32 %v2135_v24, %v3867_v25  ;;  %v2164_v38 = vmul.f32 %v2128_v42, %v3865_v22 }
 0xd4a   :  { %v2178_v47 = vsel %vm2170_vm4, %v2165_v21, 0.0  ;;  %v2171_v48 = vsel %vm2170_vm4, %v2164_v38, 0.0 }
 0xd4b   :  { %v2142_v39 = vpop.permute.xlu0 %2141  ;;  %v2179_v2 = vrot.slane %v2178_v47, 4  ;;  %v2172_v55 = vrot.slane %v2171_v48, 4 }
 0xd4c   :  { %v2166_v46 = vmul.f32 %v2142_v39, %v3873_v7 }
 0xd4d   :  { %v2180_v34 = vadd.f32 %v2179_v2, %v2178_v47  ;;  %v2173_v4 = vadd.f32 %v2172_v55, %v2171_v48 }
 0xd4e   :  { %v2185_v53 = vsel %vm2170_vm4, %v2166_v46, 0.0 }
 0xd4f   :  { %v2149_v40 = vpop.permute.xlu0 %2148  ;;  %v2186_v62 = vrot.slane %v2185_v53, 4  ;;  %v2181_v20 = vrot.slane %v2180_v34, 2  ;;  %v2174_v8 = vrot.slane %v2173_v4, 2 }
 0xd50   :  { %v2167_v18 = vmul.f32 %v2149_v40, %v3875_v36 }
 0xd51   :  { %v2187_v11 = vadd.f32 %v2186_v62, %v2185_v53  ;;  %v2182_v60 = vadd.f32 %v2181_v20, %v2180_v34 }
 0xd52   :  { %v2192_v54 = vsel %vm2170_vm4, %v2167_v18, 0.0 }
 0xd53   :  { %v2156_v43 = vpop.permute.xlu0 %2155  ;;  %v2193_v1 = vrot.slane %v2192_v54, 4  ;;  %v2188_v33 = vrot.slane %v2187_v11, 2  ;;  %v2183_v48 = vrot.slane %v2182_v60, 1 }
 0xd54   :  { %v2168_v49 = vmul.f32 %v2156_v43, %v3881_v32 }
 0xd55   :  { %v2194_v16 = vadd.f32 %v2193_v1, %v2192_v54 }
 0xd56   :  { %v2199_v58 = vsel %vm2170_vm4, %v2168_v49, 0.0 }
 0xd57   :  { %v2163_v45 = vpop.permute.xlu0 %2162  ;;  %v2200_v28 = vrot.slane %v2199_v58, 4  ;;  %v2195_v35 = vrot.slane %v2194_v16, 2 }
 0xd58   :  { %v2169_v51 = vmul.f32 %v2163_v45, %v3883_v41 }
 0xd59   :  { %v2201_v23 = vadd.f32 %v2200_v28, %v2199_v58  ;;  %v2196_v46 = vadd.f32 %v2195_v35, %v2194_v16 }
 0xd5a   :  { %v2206_v3 = vsel %vm2170_vm4, %v2169_v51, 0.0 }
 0xd5b   :  { %v2207_v5 = vrot.slane %v2206_v3, 4  ;;  %v2202_v24 = vrot.slane %v2201_v23, 2 }
 0xd5d   :  { %v2208_v27 = vadd.f32 %v2207_v5, %v2206_v3 }
 0xd5f   :  { %v2209_v40 = vrot.slane %v2208_v27, 2 }
 0xd89   :  { %v2315_v26 = vpop.permute.xlu1 %2314 }
 0xd8a   :  { %v2351_v44 = vmul.f32 %v2315_v26, %v3865_v22  ;;  %v2189_v26 = vadd.f32 %v2188_v33, %v2187_v11 }
 0xd8c   :  { %v2358_v22 = vsel %vm2357_vm6, %v2351_v44, 0.0  ;;  %v2190_v55 = vrot.slane %v2189_v26, 1 }
 0xd8d   :  { %v2322_v50 = vpop.permute.xlu1 %2321  ;;  %v2359_v29 = vrot.slane %v2358_v22, 4 }
 0xd8e   :  { %v2352_v52 = vmul.f32 %v2322_v50, %v3867_v25  ;;  %v2203_v50 = vadd.f32 %v2202_v24, %v2201_v23  ;;  %v2191_v28 = vadd.f32 %v2190_v55, %v2189_v26  ;;  %v3204_v55 = vld [vmem:[%s4027_s6 + $0x20] sm:$0xff]  }
 0xd8f   :  { %v2360_v19 = vadd.f32 %v2359_v29, %v2358_v22  ;;  %v2197_v22 = vrot.slane %v2196_v46, 1 }
 0xd90   :  { %v2365_v56 = vsel %vm2357_vm6, %v2352_v52, 0.0  ;;  %v2210_v52 = vadd.f32 %v2209_v40, %v2208_v27  ;;  %v2204_v3 = vrot.slane %v2203_v50, 1  ;;  %v3201_v27 = vld [vmem:[%s4027_s6 + $0x18] sm:$0xff]   ;;  %v2787_v40 = vld [vmem:[%s4028_s5 + $0x1] ss:$0 sm:$0xff] }
 0xd91   :  { %v2366_v59 = vrot.slane %v2365_v56, 4  ;;  %v2329_v61 = vpop.permute.xlu1 %2328  ;;  %v2361_v14 = vrot.slane %v2360_v19, 2  ;;  %v2198_v5 = vadd.f32 %v2197_v22, %v2196_v46  ;;  %v3205_v22 = vld [vmem:[%s4027_s6 + $0x28] sm:$0xff]  }
 0xd92   :  { %v2353_v25 = vmul.f32 %v2329_v61, %v3873_v7  ;;  %v2205_v11 = vadd.f32 %v2204_v3, %v2203_v50 }
 0xd93   :  { %v2367_v9 = vadd.f32 %v2366_v59, %v2365_v56  ;;  %v2362_v44 = vadd.f32 %v2361_v14, %v2360_v19 }
 0xd94   :  { %v2372_v30 = vsel %vm2357_vm6, %v2353_v25, 0.0  ;;  %v2211_v25 = vrot.slane %v2210_v52, 1 }
 0xd95   :  { %v2373_v10 = vrot.slane %v2372_v30, 4  ;;  %v2336_v6 = vpop.permute.xlu1 %2335  ;;  %v2368_v31 = vrot.slane %v2367_v9, 2  ;;  %v2363_v58 = vrot.slane %v2362_v44, 1 }
 0xd96   :  { %v2354_v17 = vmul.f32 %v2336_v6, %v3875_v36  ;;  %v2175_v36 = vadd.f32 %v2174_v8, %v2173_v4 }
 0xd97   :  { %v2374_v37 = vadd.f32 %v2373_v10, %v2372_v30  ;;  %v2369_v42 = vadd.f32 %v2368_v31, %v2367_v9  ;;  %v2364_v9 = vadd.f32 %v2363_v58, %v2362_v44  ;;  %v3202_v44 = vld [vmem:[%s4036_s14] sm:$0xff]  }
 0xd98   :  { %v2379_v7 = vsel %vm2357_vm6, %v2354_v17, 0.0  ;;  %v2176_v49 = vrot.slane %v2175_v36, 1  ;;  %v3200_v17 = vld [vmem:[%s4027_s6 + $0x10] sm:$0xff]   ;;  %v2804_v58 = vld [vmem:[%s4037_s15] ss:$0 sm:$0xff] }
 0xd99   :  { %v2380_v12 = vrot.slane %v2379_v7, 4  ;;  %v2343_v63 = vpop.permute.xlu1 %2342  ;;  %v2375_v15 = vrot.slane %v2374_v37, 2  ;;  %v2370_v53 = vrot.slane %v2369_v42, 1  ;;  %3133 = vmatpush3.bf16.msra.mxu0 %v3200_v17 }
 0xd9a   :  { %v2355_v13 = vmul.f32 %v2343_v63, %v3881_v32  ;;  %v2177_v1 = vadd.f32 %v2176_v49, %v2175_v36  ;;  %3134 = vmatprep.subr.bf16.mxu0 %v3268_v0 }
 0xd9b   :  { %v2381_v57 = vadd.f32 %v2380_v12, %v2379_v7  ;;  %v2376_v18 = vadd.f32 %v2375_v15, %v2374_v37  ;;  %v2371_v29 = vadd.f32 %v2370_v53, %v2369_v42  ;;  %v2212_v37 = vadd.f32 %v2211_v25, %v2210_v52 }
 0xd9c   :  { %v2386_v39 = vsel %vm2357_vm6, %v2355_v13, 0.0 }
 0xd9d   :  { %v2382_v43 = vrot.slane %v2381_v57, 2  ;;  %v2387_v21 = vrot.slane %v2386_v39, 4  ;;  %v2350_v38 = vpop.permute.xlu1 %2349  ;;  %v2377_v56 = vrot.slane %v2376_v18, 1  ;;  %v2420_v20 = vsel %vm2098_vm12, %v2371_v29, %v2364_v9  ;;  %3135 = vmatpush3.bf16.msra.mxu0 %v3201_v27 }
 0xd9e   :  { %v2356_v45 = vmul.f32 %v2350_v38, %v3883_v41  ;;  %v2184_v41 = vadd.f32 %v2183_v48, %v2182_v60  ;;  %3148 = vmatprep.subr.bf16.mxu0 %v3268_v0 }
 0xd9f   :  { %v2383_v47 = vadd.f32 %v2382_v43, %v2381_v57  ;;  %v2388_v32 = vadd.f32 %v2387_v21, %v2386_v39  ;;  %v2378_v30 = vadd.f32 %v2377_v56, %v2376_v18  ;;  %v2791_v43 = vld [vmem:[%s4035_s13] ss:$0 sm:$0xff] }
 0xda0   :  { %v2393_v51 = vsel %vm2357_vm6, %v2356_v45, 0.0  ;;  %v2406_v19 = vsel %vm2098_vm12, %v2184_v41, %v2177_v1 }
 0xda1   :  { %v2389_v54 = vrot.slane %v2388_v32, 2  ;;  %v2394_v2 = vrot.slane %v2393_v51, 4  ;;  %v2384_v59 = vrot.slane %v2383_v47, 1  ;;  %v2407_v23 = vsel %vm2100_vm13, %v2191_v28, %v2406_v19 }
 0xda2   :  { %v2421_v7 = vsel %vm2100_vm13, %v2378_v30, %v2420_v20  ;;  %v2408_v12 = vsel %vm2102_vm14, %v2198_v5, %v2407_v23 }
 0xda3   :  { %v2390_v61 = vadd.f32 %v2389_v54, %v2388_v32  ;;  %v2395_v62 = vadd.f32 %v2394_v2, %v2393_v51  ;;  %v2385_v10 = vadd.f32 %v2384_v59, %v2383_v47  ;;  %v2409_v33 = vsel %vm2104_vm15, %v2205_v11, %v2408_v12  ;;  %v3203_v47 = vld [vmem:[%s4036_s14 + $0x8] sm:$0xff]   ;;  %v2797_v32 = vld [vmem:[%s4030_s7 + $0x1] ss:$0 sm:$0xff] }
 0xda4   :  { %v2410_v15 = vsel %vm2106_vm3, %v2212_v37, %v2409_v33 }
 0xda5   :  { %v2391_v34 = vrot.slane %v2390_v61, 1  ;;  %v2396_v4 = vrot.slane %v2395_v62, 2  ;;  %v2422_v63 = vsel %vm2102_vm14, %v2385_v10, %v2421_v7 }
 0xda7   :  { %v2397_v6 = vadd.f32 %v2396_v4, %v2395_v62  ;;  %v2392_v16 = vadd.f32 %v2391_v34, %v2390_v61 }
 0xda9   :  { %v2398_v8 = vrot.slane %v2397_v6, 1  ;;  %v2423_v35 = vsel %vm2104_vm15, %v2392_v16, %v2422_v63 }
 0xdab   :  { %v2399_v31 = vadd.f32 %v2398_v8, %v2397_v6 }
 0xdad   :  { %v2424_v13 = vsel %vm2106_vm3, %v2399_v31, %v2423_v35 }
 0xdae   :  { %v3183_v14 = vpack.i.bf16 %v2424_v13, %v2410_v15 }
 0xdb0   :  { %3184 = vrot.lane.b32.xlu0 %v3183_v14, %s3271_s25 }
 0xe22   :  { %v3185_v57 = vpop.permute.xlu0 %3184 }
 0xe23   :  { %v3187_v60 = vunpack.i.h.bf16 %v3185_v57  ;;  %v3186_v36 = vunpack.i.l.bf16 %v3185_v57 }
 0xe25   :  { %v2428_v24 = vsel %vm259_vm2, %v3186_v36, %v3187_v60  ;;  %vm2721_vm2 = vcmask 259072  }
 0xe26   :  { %v2429_v39 = vpack.c.bf16 %v2428_v24, %v2428_v24 }
 0xe28   :  { %3129 = vmatmul.mubr.msk.bf16.vlgmr.msra.gmra.mrb[76].mxu1 %vm183_vm1, %v2429_v39 }
 0xe29   :  { %3144 = vmatprep.mubr.msk.bf16.mxu1 %vm3269_vm0, %v3268_v0  ;;  %3141 = vmatpush3.bf16.msra.mxu1 %v3202_v44 }
 0xe2a   :  { %3142 = vmatprep.subr.bf16.mxu1 %v3268_v0 }
 0xe2d   :  { %3143 = vmatpush3.bf16.msra.mxu1 %v3203_v47 }
 0xefb   :  { %v2492_v42 = vpop.f32.mrb[76].mxu1 }
 0xefc   :  { %v2493_v21 = vadd.f32 %v2787_v40, %v2492_v42  ;;  %v3130_v38 = vpop.f32.mrb[77].mxu1 }
 0xefd   :  { %v2495_v26 = vpop.f32.mrb[78].mxu1 }
 0xefe   :  { %v2505_v46 = vadd.f32 %v2791_v43, %v2493_v21  ;;  %v3131_v18 = vpop.f32.mrb[79].mxu1 }
 0xf00   :  { %v2506_v45 = vpack.c.bf16 %v2505_v46, %v2505_v46 }
 0xf02   :  { %3137 = vmatmul.mubr.msk.bf16.vlgmr.msra.gmra.mrb[80].mxu0 %vm183_vm1, %v2506_v45 }
 0xf03   :  { %3152 = vmatprep.mubr.msk.bf16.mxu0 %vm3269_vm0, %v3268_v0  ;;  %3149 = vmatpush3.bf16.msra.mxu0 %v3204_v55 }
 0xf04   :  { %3150 = vmatprep.subr.bf16.mxu0 %v3268_v0  ;;  %v2810_v0 = vld [vmem:[%s4030_s7 + $0x2] ss:$0 sm:$0xff] }
 0xf07   :  { %3151 = vmatpush3.bf16.msra.mxu0 %v3205_v22 }
 0xfd5   :  { %v2569_v48 = vpop.f32.mrb[80].mxu0 }
 0xfd6   :  { %v2570_v49 = vadd.f32 %v2797_v32, %v2569_v48  ;;  %v3138_v50 = vpop.f32.mrb[81].mxu0 }
 0xfd7   :  { %v2572_v51 = vpop.f32.mrb[82].mxu0 }
 0xfd8   :  { %v2575_v52 = vmax.f32 %v2570_v49, 0.0  ;;  %v3139_v53 = vpop.f32.mrb[83].mxu0 }
 0xfda   :  { %v2576_v54 = vadd.f32 %v2575_v52, %v2505_v46 }
 0xfdc   :  { %v2577_v2 = vpack.c.bf16 %v2576_v54, %v2576_v54 }
 0xfde   :  { %3145 = vmatmul.mubr.msk.bf16.vlgmr.msra.gmra.mrb[80].mxu1 %vm183_vm1, %v2577_v2 }
0x10b1   :  { %v2631_v56 = vpop.f32.mrb[80].mxu1 }
0x10b2   :  { %v2637_v59 = vadd.f32 %v2631_v56, %v2576_v54  ;;  %v3146_v61 = vpop.f32.mrb[81].mxu1 }
0x10b3   :  { %v2634_v62 = vpop.f32.mrb[82].mxu1 }
0x10b4   :  { %v2645_v41 = vadd.f32 %v2804_v58, %v2637_v59  ;;  %v3147_v1 = vpop.f32.mrb[83].mxu1 }
0x10b6   :  { %v2646_v3 = vpack.c.bf16 %v2645_v41, %v2645_v41 }
0x10b8   :  { %3153 = vmatmul.mubr.msk.bf16.vlgmr.msra.gmra.mrb[84].mxu0 %vm183_vm1, %v2646_v3 }
0x118b   :  { %v2709_v25 = vpop.f32.mrb[84].mxu0 }
0x118c   :  { %v2710_v29 = vadd.f32 %v2810_v0, %v2709_v25  ;;  %v3154_v34 = vpop.f32.mrb[85].mxu0 }
0x118d   :  { %v2712_v4 = vpop.f32.mrb[86].mxu0 }
0x118e   :  { %v2715_v28 = vmax.f32 %v2710_v29, 0.0  ;;  %v3155_v30 = vpop.f32.mrb[87].mxu0 }
0x1190   :  { %v2716_v5 = vadd.f32 %v2715_v28, %v2645_v41 }
0x1192   :  { %vm2717_vm0 = vcmp.ne.f32.partialorder %v2716_v5, %v2716_v5 }
0x1193   :  { %v2718_v9 = vsel %vm2717_vm0, 0.0, %v2716_v5 }
0x1194   :  { %v2814_v10 = vclamps-f32 %v2718_v9, 3.4028235e+38 }
0x1196   :  { %2722 = vst.msk [vmem:[%s4038_s16] sm:$0x3f] %vm2721_vm2, %v2814_v10 }

// kernel: _two_stage_forward.3
= control target key start
LH: loop header
LB: loop body
LE: loop exit
PB: predicated region body
PF: predicated region fallthrough
CT: control target
= control target key end

     0   :  { %s2090_s0 = inlined_call_operand.vmem [shape: f32[16,32], index: 0, kind: input, shape index: {}]   ;;  %s2091_s1 = inlined_call_operand.vmem [shape: s32[2,1,1], index: 1, kind: input, shape index: {}]   ;;  %s2092_s2 = inlined_call_operand.vmem [shape: bf16[1,32,96], index: 2, kind: input, shape index: {}]   ;;  %s2093_s3 = inlined_call_operand.vmem [shape: f32[1,1,96], index: 3, kind: input, shape index: {}]   ;;  %s2094_s4 = inlined_call_operand.vmem [shape: bf16[2,32,32], index: 4, kind: input, shape index: {}]   ;;  %s2095_s5 = inlined_call_operand.vmem [shape: f32[2,1,32], index: 5, kind: input, shape index: {}]   ;;  %s2096_s6 = inlined_call_operand.vmem [shape: bf16[3,32,32], index: 6, kind: input, shape index: {}]   ;;  %s2097_s7 = inlined_call_operand.vmem [shape: f32[3,1,32], index: 7, kind: input, shape index: {}]   ;;  %s2098_s8 = inlined_call_operand.vmem [shape: bf16[32,32], index: 8, kind: input, shape index: {}]   ;;  %s2099_s9 = inlined_call_operand.vmem [shape: f32[1,32], index: 9, kind: input, shape index: {}]   ;;  %s2100_s10 = inlined_call_operand.vmem [shape: bf16[32,64], index: 10, kind: input, shape index: {}]   ;;  %s2101_s11 = inlined_call_operand.vmem [shape: f32[1,64], index: 11, kind: input, shape index: {}]   ;;  %s2102_s12 = inlined_call_operand.vmem [shape: f32[1,32], index: 12, kind: input, shape index: {}]   ;;  %s2103_s13 = inlined_call_operand.vmem [shape: f32[1,32], index: 13, kind: input, shape index: {}]   ;;  %s2104_s14 = inlined_call_operand.vmem [shape: bf16[1,32,32], index: 14, kind: input, shape index: {}]   ;;  %s2105_s15 = inlined_call_operand.vmem [shape: f32[1,1,32], index: 15, kind: input, shape index: {}]   ;;  %s2106_s16 = inlined_call_operand.hbm [shape: f32[1,2,32], index: 16, kind: output, shape index: {}]  }
   0x1   :  { %2108 = sst [smem:[#allocation5_spill]] %s2090_s0 }
   0x2   :  { %v1621_v0 = vld [vmem:[%s2092_s2] sm:$0xff]   ;;  %v1687_v1 = vmov 0.0   ;;  %v1622_v2 = vld [vmem:[%s2092_s2 + $0x8] sm:$0xff]   ;;  %vm1688_vm0 = vmmov 0   ;;  %s2109_s27 = sld [smem:[#allocation5_spill]]  ;;  %vm117_vm1 = vcmask 261120  }
   0x3   :  { %1478 = vmatprep.subr.bf16.mxu0 %v1687_v1  ;;  %1486 = vmatprep.subr.bf16.mxu1 %v1687_v1 }
   0x4   :  { %1479 = vmatpush3.bf16.msra.mxu0 %v1621_v0  ;;  %1482 = vmatprep.mubr.msk.bf16.mxu0 %vm1688_vm0, %v1687_v1 }
   0x5   :  { %1480 = vmatprep.subr.bf16.mxu0 %v1687_v1  ;;  %1488 = vmatprep.mubr.msk.bf16.mxu1 %vm1688_vm0, %v1687_v1 }
   0x8   :  { %v1796_v3 = vld [vmem:[%s2109_s27] sm:$0xff]  ;;  %v1801_v4 = vld [vmem:[%s2109_s27 + $0x8] sm:$0xff]  ;;  %1481 = vmatpush3.bf16.msra.mxu0 %v1622_v2 }
   0x9   :  { %v93_v5 = vpack.c.bf16 %v1801_v4, %v1796_v3  ;;  %1492 = vmatprep.subr.bf16.mxu0 %v1687_v1 }
   0xb   :  { %1483 = vmatmul.mubr.msk.bf16.vlgmr.msra.gmra.mrb[0].mxu0 %vm117_vm1, %v93_v5 }
   0xc   :  { %1494 = vmatprep.mubr.msk.bf16.mxu0 %vm1688_vm0, %v1687_v1 }
   0xd   :  { %21 = vsyncpa [#allocation3], 0  ;;  %v1373_v6 = vld [vmem:[%s2093_s3] ss:$0 sm:$0xff]  ;;  %s1689_s18 = smov 96   ;;  %v1690_v15 = vmov 0   ;;  %v57_v22 = vlaneseq }
   0xe   :  { %v55_v14 = vld [vmem:[%s2091_s1] sm:$0x1]  ;;  %1609 = vset.pattern.permute.xlu1 %v1690_v15  ;;  %1620 = vset.pattern.permute.xlu0 %v1690_v15  ;;  %v56_v17 = vld [vmem:[%s2091_s1 + $0x1] sm:$0x1]  ;;  %vm167_vm2 = vcmask 130048   ;;  %vm271_vm4 = vcmask 64512  }
   0xf   :  { %60 = vperm.xlu1 %1609, %v55_v14   ;;  %v1841_v23 = vshrl.u32 %v57_v22, 7  ;;  %v1854_v30 = vand.u32 127, %v57_v22  ;;  %s1691_s1 = smov 64   ;;  %s1692_s20 = smov 80   ;;  %vm301_vm6 = vcmask 1043456   ;;  %vm934_vm7 = vcmask 1041409  }
  0x10   :  { %s1693_s21 = smov 112   ;;  %s1694_s22 = smov 48   ;;  %vm938_vm8 = vcmask 58368   ;;  %vm966_vm10 = vcmask 392448   ;;  %vm1037_vm11 = vcmask 523648   ;;  %vm1357_vm13 = vcmask 254976  }
  0x11   :  { %v1844_v25 = vsub.s32 0, %v1841_v23  ;;  %s1695_s27 = smov 16  }
  0x13   :  { %67 = vperm.xlu1 %1609, %v56_v17  }
  0x8e   :  { %v61_v24 = vpop.permute.xlu1 %60 }
  0x8f   :  { %v1847_v26 = vrot.slane %v61_v24, %v1844_v25 }
  0x91   :  { %vm73_vm3 = vcmp.lt.s32.totalorder %v1854_v30, %v1847_v26 }
  0x92   :  { %v68_v27 = vpop.permute.xlu1 %67 }
  0x93   :  { %v1850_v28 = vrot.slane %v68_v27, %v1844_v25 }
  0x95   :  { %v75_v29 = vcombine.low %v1847_v26, %v1850_v28  ;;  %vm74_vm5 = vcmp.lt.s32.totalorder %v1854_v30, %v1850_v28 }
  0xde   :  { %v155_v7 = vpop.f32.mrb[0].mxu0 }
  0xdf   :  { %v156_v8 = vadd.f32 %v1373_v6, %v155_v7  ;;  %v1484_v9 = vpop.f32.mrb[1].mxu0 }
  0xe0   :  { %v158_v10 = vpop.f32.mrb[2].mxu0 }
  0xe1   :  { %v1815_v11 = vpack.c.bf16 %v156_v8, %v156_v8  ;;  %v159_v12 = vadd.f32 %v1373_v6, %v158_v10  ;;  %v1485_v13 = vpop.f32.mrb[3].mxu0 }
  0xe3   :  { %165 = vrot.lane.b32.xlu0 %v1815_v11, %s1689_s18  ;;  %v1822_v16 = vpack.c.bf16 %v159_v12, %v159_v12 }
  0xe7   :  { %215 = vrot.lane.b32.xlu0 %v1822_v16, %s1689_s18 }
 0x155   :  { %v166_v18 = vpop.permute.xlu0 %165 }
 0x156   :  { %v172_v19 = vsel %vm167_vm2, %v166_v18, 0 }
 0x157   :  { %1487 = vmatpush3.bf16.xpose.msra.mxu1 %v172_v19 }
 0x158   :  { %1498 = vmatprep.subr.bf16.mxu1 %v1687_v1 }
 0x159   :  { %v216_v20 = vpop.permute.xlu0 %215 }
 0x15a   :  { %v221_v21 = vsel %vm167_vm2, %v216_v20, 0 }
 0x15b   :  { %1493 = vmatpush3.bf16.xpose.msra.mxu0 %v221_v21 }
 0x15c   :  { %1504 = vmatprep.subr.bf16.mxu0 %v1687_v1 }
 0x15e   :  { %1489 = vmatmul.mubr.msk.bf16.vlgmr.msra.gmra.mrb[0].mxu1 %vm167_vm2, %v1815_v11 }
 0x15f   :  { %1500 = vmatprep.mubr.msk.bf16.mxu1 %vm1688_vm0, %v1687_v1 }
 0x162   :  { %1495 = vmatmul.mubr.msk.bf16.vlgmr.msra.gmra.mrb[4].mxu0 %vm167_vm2, %v1822_v16 }
 0x163   :  { %1506 = vmatprep.mubr.msk.bf16.mxu0 %vm1688_vm0, %v1687_v1 }
 0x231   :  { %v208_v31 = vpop.f32.mrb[0].mxu1 }
 0x232   :  { %v263_v32 = vmul.f32 0.25, %v208_v31  ;;  %v1490_v33 = vpop.f32.mrb[1].mxu1 }
 0x233   :  { %v211_v34 = vpop.f32.mrb[2].mxu1 }
 0x234   :  { %v1491_v35 = vpop.f32.mrb[3].mxu1  ;;  %v269_v36 = vsel %vm73_vm3, %v263_v32, -1e+30 }
 0x235   :  { %v257_v37 = vpop.f32.mrb[4].mxu0  ;;  %v272_v38 = vsel %vm271_vm4, %v269_v36, -inf }
 0x236   :  { %v264_v39 = vmul.f32 0.25, %v257_v37  ;;  %v1496_v40 = vpop.f32.mrb[5].mxu0  ;;  %273 = vmax.xlane.f32.xlu0 %v272_v38 }
 0x237   :  { %v260_v41 = vpop.f32.mrb[6].mxu0 }
 0x238   :  { %v1497_v42 = vpop.f32.mrb[7].mxu0  ;;  %v270_v43 = vsel %vm74_vm5, %v264_v39, -1e+30 }
 0x239   :  { %v275_v44 = vsel %vm271_vm4, %v270_v43, -inf }
 0x23a   :  { %276 = vmax.xlane.f32.xlu1 %v275_v44 }
 0x24b   :  { %296 = vrot.lane.b32.xlu1 %v1815_v11, %s1691_s1 }
 0x24f   :  { %395 = vrot.lane.b32.xlu1 %v1815_v11, %s1692_s20 }
 0x253   :  { %445 = vrot.lane.b32.xlu1 %v1822_v16, %s1692_s20 }
 0x257   :  { %443 = vrot.lane.b32.xlu1 %v1822_v16, %s1693_s21 }
 0x2c3   :  { %v274_v45 = vpop.xlane.xlu0 %273 }
 0x2c4   :  { %v278_v46 = vsub.f32 %v269_v36, %v274_v45 }
 0x2c6   :  { %v280_v47 = vmul.f32 1.442695, %v278_v46 }
 0x2c7   :  { %v277_v48 = vpop.xlane.xlu1 %276 }
 0x2c8   :  { %1639 = vpow2.f32 %v280_v47  ;;  %v279_v49 = vsub.f32 %v270_v43, %v277_v48 }
 0x2ca   :  { %v282_v50 = vmul.f32 1.442695, %v279_v49 }
 0x2cb   :  { %v297_v51 = vpop.permute.xlu1 %296 }
 0x2cc   :  { %1641 = vpow2.f32 %v282_v50  ;;  %v303_v52 = vsel %vm301_vm6, %v297_v51, 0 }
 0x2cd   :  { %1499 = vmatpush3.bf16.msra.mxu1 %v303_v52 }
 0x2ce   :  { %1510 = vmatprep.subr.bf16.mxu1 %v1687_v1 }
 0x2cf   :  { %v396_v62 = vpop.permute.xlu1 %395 }
 0x2d0   :  { %v401_v5 = vsel %vm167_vm2, %v396_v62, 0  ;;  %v1623_v62 = vld [vmem:[%s2094_s4] sm:$0xff]  }
 0x2d2   :  { %v1640_v53 = vpop.eup %1639 }
 0x2d3   :  { %v284_v54 = vsel %vm271_vm4, %v1640_v53, 0.0  ;;  %v446_v7 = vpop.permute.xlu1 %445 }
 0x2d4   :  { %285 = vadd.xlane.f32.xlu0 %v284_v54  ;;  %v451_v9 = vsel %vm167_vm2, %v446_v7, 0 }
 0x2d6   :  { %v1642_v55 = vpop.eup %1641 }
 0x2d7   :  { %v287_v56 = vsel %vm271_vm4, %v1642_v55, 0.0  ;;  %v444_v12 = vpop.permute.xlu1 %443 }
 0x2d8   :  { %288 = vadd.xlane.f32.xlu0 %v287_v56 }
 0x2ee   :  { %345 = vrot.lane.b32.xlu0 %v1822_v16, %s1691_s1 }
 0x2f2   :  { %393 = vrot.lane.b32.xlu0 %v1815_v11, %s1693_s21 }
 0x361   :  { %v286_v57 = vpop.xlane.xlu0 %285 }
 0x362   :  { %1643 = vrcp.f32 %v286_v57 }
 0x365   :  { %v289_v58 = vpop.xlane.xlu0 %288 }
 0x366   :  { %1645 = vrcp.f32 %v289_v58 }
 0x369   :  { %v346_v59 = vpop.permute.xlu0 %345 }
 0x36a   :  { %v351_v60 = vsel %vm301_vm6, %v346_v59, 0 }
 0x36b   :  { %1505 = vmatpush3.bf16.msra.mxu0 %v351_v60 }
 0x36c   :  { %v1644_v61 = vpop.eup %1643  ;;  %1516 = vmatprep.subr.bf16.mxu0 %v1687_v1 }
 0x36d   :  { %v292_v63 = vmul.f32 %v1644_v61, %v1640_v53  ;;  %v394_v10 = vpop.permute.xlu0 %393 }
 0x36f   :  { %v294_v0 = vpack.c.bf16 %v292_v63, %v292_v63  ;;  %v1624_v63 = vld [vmem:[%s2094_s4 + $0x8] sm:$0xff]  }
 0x370   :  { %v1646_v2 = vpop.eup %1645 }
 0x371   :  { %v293_v6 = vmul.f32 %v1646_v2, %v1642_v55  ;;  %1501 = vmatmul.mubr.msk.bf16.vlgmr.msra.gmra.mrb[4].mxu1 %vm271_vm4, %v294_v0 }
 0x372   :  { %1511 = vmatpush3.bf16.xpose.msra.mxu1 %v401_v5  ;;  %1512 = vmatprep.mubr.msk.bf16.mxu1 %vm1688_vm0, %v1687_v1 }
 0x373   :  { %v295_v8 = vpack.c.bf16 %v293_v6, %v293_v6  ;;  %1522 = vmatprep.subr.bf16.mxu1 %v1687_v1 }
 0x375   :  { %1507 = vmatmul.mubr.msk.bf16.vlgmr.msra.gmra.mrb[8].mxu0 %vm271_vm4, %v295_v8 }
 0x376   :  { %1517 = vmatpush3.bf16.xpose.msra.mxu0 %v451_v9  ;;  %1518 = vmatprep.mubr.msk.bf16.mxu0 %vm1688_vm0, %v1687_v1 }
 0x377   :  { %1528 = vmatprep.subr.bf16.mxu0 %v1687_v1 }
 0x379   :  { %1513 = vmatmul.mubr.msk.bf16.vlgmr.msra.gmra.mrb[8].mxu1 %vm167_vm2, %v394_v10 }
 0x37a   :  { %1524 = vmatprep.mubr.msk.bf16.mxu1 %vm1688_vm0, %v1687_v1 }
 0x37d   :  { %1519 = vmatmul.mubr.msk.bf16.vlgmr.msra.gmra.mrb[12].mxu0 %vm167_vm2, %v444_v12 }
 0x37e   :  { %1530 = vmatprep.mubr.msk.bf16.mxu0 %vm1688_vm0, %v1687_v1 }
 0x444   :  { %v1898_v13 = vpop.f32.mrb[4].mxu1 }
 0x445   :  { %v1502_v14 = vpop.f32.mrb[5].mxu1 }
 0x446   :  { %v342_v15 = vpop.f32.mrb[6].mxu1 }
 0x447   :  { %v1503_v17 = vpop.f32.mrb[7].mxu1 }
 0x448   :  { %v1900_v18 = vpop.f32.mrb[8].mxu0 }
 0x449   :  { %v1508_v19 = vpop.f32.mrb[9].mxu0 }
 0x44a   :  { %v390_v20 = vpop.f32.mrb[10].mxu0 }
 0x44b   :  { %v1509_v21 = vpop.f32.mrb[11].mxu0 }
 0x44c   :  { %v437_v22 = vpop.f32.mrb[8].mxu1 }
 0x44d   :  { %v493_v24 = vmul.f32 0.25, %v437_v22  ;;  %v1514_v27 = vpop.f32.mrb[9].mxu1  ;;  %v1625_v22 = vld [vmem:[%s2096_s6] sm:$0xff]  }
 0x44e   :  { %v440_v31 = vpop.f32.mrb[10].mxu1 }
 0x44f   :  { %v1515_v32 = vpop.f32.mrb[11].mxu1  ;;  %v495_v33 = vsel %vm73_vm3, %v493_v24, -1e+30 }
 0x450   :  { %v487_v34 = vpop.f32.mrb[12].mxu0  ;;  %v497_v35 = vsel %vm271_vm4, %v495_v33, -inf }
 0x451   :  { %v494_v36 = vmul.f32 0.25, %v487_v34  ;;  %498 = vmax.xlane.f32.xlu0 %v497_v35  ;;  %v1520_v37 = vpop.f32.mrb[13].mxu0 }
 0x452   :  { %v490_v38 = vpop.f32.mrb[14].mxu0 }
 0x453   :  { %v1521_v39 = vpop.f32.mrb[15].mxu0  ;;  %v496_v40 = vsel %vm74_vm5, %v494_v36, -1e+30  ;;  %v1627_v38 = vld [vmem:[%s2098_s8] sm:$0xff]  }
 0x454   :  { %v500_v41 = vsel %vm271_vm4, %v496_v40, -inf  ;;  %v1628_v39 = vld [vmem:[%s2098_s8 + $0x8] sm:$0xff]  }
 0x455   :  { %501 = vmax.xlane.f32.xlu1 %v500_v41 }
 0x466   :  { %521 = vrot.lane.b32.xlu1 %v1815_v11, %s1694_s22 }
 0x4de   :  { %v499_v42 = vpop.xlane.xlu0 %498 }
 0x4df   :  { %v503_v43 = vsub.f32 %v495_v33, %v499_v42 }
 0x4e1   :  { %v505_v44 = vmul.f32 1.442695, %v503_v43 }
 0x4e2   :  { %v502_v45 = vpop.xlane.xlu1 %501 }
 0x4e3   :  { %1647 = vpow2.f32 %v505_v44  ;;  %v504_v46 = vsub.f32 %v496_v40, %v502_v45 }
 0x4e5   :  { %v507_v47 = vmul.f32 1.442695, %v504_v46 }
 0x4e6   :  { %v522_v48 = vpop.permute.xlu1 %521 }
 0x4e7   :  { %1649 = vpow2.f32 %v507_v47  ;;  %v527_v49 = vsel %vm301_vm6, %v522_v48, 0 }
 0x4e8   :  { %1523 = vmatpush3.bf16.msra.mxu1 %v527_v49 }
 0x4e9   :  { %1534 = vmatprep.subr.bf16.mxu1 %v1687_v1 }
 0x4ed   :  { %v1648_v50 = vpop.eup %1647 }
 0x4ee   :  { %v509_v51 = vsel %vm271_vm4, %v1648_v50, 0.0 }
 0x4ef   :  { %510 = vadd.xlane.f32.xlu0 %v509_v51  ;;  %v1630_v51 = vld [vmem:[%s2100_s10 + $0x8] sm:$0xff]  }
 0x4f1   :  { %v1650_v52 = vpop.eup %1649 }
 0x4f2   :  { %v512_v11 = vsel %vm271_vm4, %v1650_v52, 0.0 }
 0x4f3   :  { %513 = vadd.xlane.f32.xlu0 %v512_v11 }
 0x509   :  { %569 = vrot.lane.b32.xlu0 %v1822_v16, %s1694_s22 }
 0x57c   :  { %v511_v53 = vpop.xlane.xlu0 %510 }
 0x57d   :  { %1651 = vrcp.f32 %v511_v53 }
 0x580   :  { %v514_v54 = vpop.xlane.xlu0 %513 }
 0x581   :  { %1653 = vrcp.f32 %v514_v54 }
 0x584   :  { %v570_v55 = vpop.permute.xlu0 %569 }
 0x585   :  { %v575_v56 = vsel %vm301_vm6, %v570_v55, 0 }
 0x586   :  { %1529 = vmatpush3.bf16.msra.mxu0 %v575_v56 }
 0x587   :  { %v1652_v57 = vpop.eup %1651  ;;  %1542 = vmatprep.subr.bf16.mxu0 %v1687_v1 }
 0x588   :  { %v517_v58 = vmul.f32 %v1652_v57, %v1648_v50  ;;  %v1629_v50 = vld [vmem:[%s2100_s10] sm:$0xff]  }
 0x58a   :  { %v519_v59 = vpack.c.bf16 %v517_v58, %v517_v58 }
 0x58b   :  { %v1654_v60 = vpop.eup %1653 }
 0x58c   :  { %v518_v61 = vmul.f32 %v1654_v60, %v1650_v52  ;;  %1525 = vmatmul.mubr.msk.bf16.vlgmr.msra.gmra.mrb[12].mxu1 %vm271_vm4, %v519_v59  ;;  %v1393_v52 = vld [vmem:[%s2099_s9] ss:$0 sm:$0xff] }
 0x58d   :  { %1538 = vmatprep.mubr.msk.bf16.mxu1 %vm1688_vm0, %v1687_v1  ;;  %1535 = vmatpush3.bf16.msra.mxu1 %v1623_v62  ;;  %v1401_v62 = vld [vmem:[%s2102_s12] ss:$0 sm:$0xff] }
 0x58e   :  { %v520_v16 = vpack.c.bf16 %v518_v61, %v518_v61  ;;  %1536 = vmatprep.subr.bf16.mxu1 %v1687_v1  ;;  %v1397_v61 = vld [vmem:[%s2101_s11] ss:$0 sm:$0xff] }
 0x590   :  { %1531 = vmatmul.mubr.msk.bf16.vlgmr.msra.gmra.mrb[16].mxu0 %vm271_vm4, %v520_v16 }
 0x591   :  { %1546 = vmatprep.mubr.msk.bf16.mxu0 %vm1688_vm0, %v1687_v1  ;;  %1537 = vmatpush3.bf16.msra.mxu1 %v1624_v63 }
 0x592   :  { %1550 = vmatprep.subr.bf16.mxu1 %v1687_v1  ;;  %1543 = vmatpush3.bf16.msra.mxu0 %v1625_v22 }
 0x593   :  { %1544 = vmatprep.subr.bf16.mxu0 %v1687_v1 }
 0x65f   :  { %v563_v0 = vpop.f32.mrb[12].mxu1 }
 0x660   :  { %v1526_v2 = vpop.f32.mrb[13].mxu1 }
 0x661   :  { %v566_v5 = vpop.f32.mrb[14].mxu1 }
 0x662   :  { %v1527_v6 = vpop.f32.mrb[15].mxu1 }
 0x663   :  { %v611_v7 = vpop.f32.mrb[16].mxu0 }
 0x664   :  { %v1610_v8 = vpack.i.bf16 %v611_v7, %v563_v0  ;;  %v1532_v9 = vpop.f32.mrb[17].mxu0 }
 0x665   :  { %v614_v10 = vpop.f32.mrb[18].mxu0 }
 0x666   :  { %1611 = vrot.lane.b32.xlu1 %v1610_v8, %s1695_s27  ;;  %v1533_v12 = vpop.f32.mrb[19].mxu0 }
 0x6d8   :  { %v1612_v14 = vpop.permute.xlu1 %1611 }
 0x6d9   :  { %v1614_v15 = vunpack.i.h.bf16 %v1612_v14  ;;  %v1613_v17 = vunpack.i.l.bf16 %v1612_v14 }
 0x6db   :  { %v626_v19 = vsel %vm167_vm2, %v1900_v18, %v1614_v15  ;;  %v625_v20 = vsel %vm167_vm2, %v1898_v13, %v1613_v17  ;;  %v1626_v18 = vld [vmem:[%s2096_s6 + $0x8] sm:$0xff]   ;;  %v1385_v13 = vld [vmem:[%s2095_s5] ss:$0 sm:$0xff] }
 0x6dc   :  { %v627_v21 = vpack.c.bf16 %v626_v19, %v625_v20  ;;  %1545 = vmatpush3.bf16.msra.mxu0 %v1626_v18  ;;  %v1696_v19 = vmov 1966171168  }
 0x6dd   :  { %1558 = vmatprep.subr.bf16.mxu0 %v1687_v1  ;;  %v77_v20 = vunpack.c.l.s4 %v1696_v19 }
 0x6de   :  { %1539 = vmatmul.mubr.msk.bf16.vlgmr.msra.gmra.mrb[16].mxu1 %vm117_vm1, %v627_v21 }
 0x6df   :  { %1554 = vmatprep.mubr.msk.bf16.mxu1 %vm1688_vm0, %v1687_v1  ;;  %1551 = vmatpush3.bf16.msra.mxu1 %v1627_v38  ;;  %v78_v21 = vunpack.c.0.s8 %v77_v20 }
 0x6e0   :  { %1552 = vmatprep.subr.bf16.mxu1 %v1687_v1 }
 0x6e1   :  { %v81_v22 = vsub.s32 %v78_v21, %v1841_v23 }
 0x6e3   :  { %1553 = vmatpush3.bf16.msra.mxu1 %v1628_v39  ;;  %v82_v18 = vrot.slane %v75_v29, %v81_v22 }
 0x6e4   :  { %1566 = vmatprep.subr.bf16.mxu1 %v1687_v1 }
 0x7b1   :  { %v688_v24 = vpop.f32.mrb[16].mxu1 }
 0x7b2   :  { %v689_v27 = vadd.f32 %v1385_v13, %v688_v24  ;;  %v1540_v31 = vpop.f32.mrb[17].mxu1  ;;  %v928_v24 = vsub.s32 %v1854_v30, %v1841_v23 }
 0x7b3   :  { %v691_v32 = vpop.f32.mrb[18].mxu1 }
 0x7b4   :  { %v692_v33 = vadd.f32 %v1385_v13, %v691_v32  ;;  %v1541_v34 = vpop.f32.mrb[19].mxu1  ;;  %v695_v35 = vadd.f32 %v689_v27, %v1796_v3  ;;  %v1389_v3 = vld [vmem:[%s2097_s7] ss:$0 sm:$0xff] }
 0x7b6   :  { %v696_v36 = vadd.f32 %v692_v33, %v1801_v4  ;;  %v89_v33 = vrot.slane %v82_v18, %v81_v22 }
 0x7b8   :  { %v697_v37 = vpack.c.bf16 %v696_v36, %v695_v35  ;;  %vm90_vm9 = vcmp.lt.s32.totalorder %v1854_v30, %v89_v33  ;;  %v1632_v33 = vld [vmem:[%s2094_s4 + $0x18] sm:$0xff]  }
 0x7ba   :  { %1547 = vmatmul.mubr.msk.bf16.vlgmr.msra.gmra.mrb[20].mxu0 %vm117_vm1, %v697_v37 }
 0x7bb   :  { %1562 = vmatprep.mubr.msk.bf16.mxu0 %vm1688_vm0, %v1687_v1  ;;  %1559 = vmatpush3.bf16.msra.mxu0 %v1629_v50 }
 0x7bc   :  { %1560 = vmatprep.subr.bf16.mxu0 %v1687_v1 }
 0x7bf   :  { %1561 = vmatpush3.bf16.msra.mxu0 %v1630_v51 }
 0x7c0   :  { %1574 = vmatprep.subr.bf16.mxu0 %v1687_v1 }
 0x88d   :  { %v758_v4 = vpop.f32.mrb[20].mxu0 }
 0x88e   :  { %v759_v40 = vadd.f32 %v1389_v3, %v758_v4  ;;  %v1548_v41 = vpop.f32.mrb[21].mxu0 }
 0x88f   :  { %v761_v42 = vpop.f32.mrb[22].mxu0 }
 0x890   :  { %v765_v43 = vmax.f32 %v759_v40, 0.0  ;;  %v762_v44 = vadd.f32 %v1389_v3, %v761_v42  ;;  %v1549_v45 = vpop.f32.mrb[23].mxu0 }
 0x892   :  { %v766_v46 = vmax.f32 %v762_v44, 0.0  ;;  %v767_v47 = vadd.f32 %v765_v43, %v695_v35 }
 0x894   :  { %v768_v48 = vadd.f32 %v766_v46, %v696_v36 }
 0x896   :  { %v769_v49 = vpack.c.bf16 %v768_v48, %v767_v47 }
 0x898   :  { %1555 = vmatmul.mubr.msk.bf16.vlgmr.msra.gmra.mrb[20].mxu1 %vm117_vm1, %v769_v49 }
 0x899   :  { %1570 = vmatprep.mubr.msk.bf16.mxu1 %vm1688_vm0, %v1687_v1 }
 0x96b   :  { %v830_v11 = vpop.f32.mrb[20].mxu1 }
 0x96c   :  { %v831_v53 = vadd.f32 %v1393_v52, %v830_v11  ;;  %v1556_v54 = vpop.f32.mrb[21].mxu1  ;;  %v959_v11 = vsub.s32 1, %v1841_v23  ;;  %v1631_v23 = vld [vmem:[%s2094_s4 + $0x10] sm:$0xff]  }
 0x96d   :  { %v833_v55 = vpop.f32.mrb[22].mxu1  ;;  %1567 = vmatpush3.bf16.msra.mxu1 %v1631_v23 }
 0x96e   :  { %v834_v56 = vadd.f32 %v1393_v52, %v833_v55  ;;  %v1557_v57 = vpop.f32.mrb[23].mxu1  ;;  %v837_v58 = vmax.f32 %v831_v53, 0.0  ;;  %1568 = vmatprep.subr.bf16.mxu1 %v1687_v1 }
 0x970   :  { %v838_v59 = vmax.f32 %v834_v56, 0.0 }
 0x971   :  { %1569 = vmatpush3.bf16.msra.mxu1 %v1632_v33 }
 0x972   :  { %v839_v60 = vpack.c.bf16 %v838_v59, %v837_v58  ;;  %1582 = vmatprep.subr.bf16.mxu1 %v1687_v1 }
 0x974   :  { %1563 = vmatmul.mubr.msk.bf16.vlgmr.msra.gmra.mrb[24].mxu0 %vm117_vm1, %v839_v60 }
 0x975   :  { %1578 = vmatprep.mubr.msk.bf16.mxu0 %vm1688_vm0, %v1687_v1 }
 0xa47   :  { %v900_v16 = vpop.f32.mrb[24].mxu0 }
 0xa48   :  { %v1989_v63 = vadd.f32 %v1397_v61, %v900_v16  ;;  %v1564_v0 = vpop.f32.mrb[25].mxu0 }
 0xa49   :  { %v903_v2 = vpop.f32.mrb[26].mxu0 }
 0xa4a   :  { %v1991_v5 = vadd.f32 %v1397_v61, %v903_v2  ;;  %v1565_v6 = vpop.f32.mrb[27].mxu0  ;;  %v914_v7 = vmul.f32 %v1401_v62, %v1989_v63 }
 0xa4c   :  { %983 = vrot.lane.b32.xlu1 %v914_v7, %s1693_s21  ;;  %v915_v8 = vmul.f32 %v1401_v62, %v1991_v5  ;;  %v916_v10 = vsel %vm167_vm2, %v914_v7, 0.0 }
 0xa4e   :  { %985 = vrot.lane.b32.xlu0 %v915_v8, %s1693_s21  ;;  %v919_v9 = vsel %vm167_vm2, %v915_v8, 0.0 }
 0xa6d   :  { %920 = vadd.xlane.f32.xlu0 %v919_v9 }
 0xa70   :  { %917 = vadd.xlane.f32.xlu1 %v916_v10 }
 0xabe   :  { %v984_v12 = vpop.permute.xlu1 %983 }
 0xabf   :  { %v989_v14 = vsel %vm167_vm2, %v984_v12, 0.0 }
 0xac0   :  { %v986_v15 = vpop.permute.xlu0 %985  ;;  %990 = vadd.xlane.f32.xlu0 %v989_v14 }
 0xac1   :  { %v992_v17 = vsel %vm167_vm2, %v986_v15, 0.0 }
 0xac2   :  { %993 = vadd.xlane.f32.xlu1 %v992_v17 }
 0xafa   :  { %v921_v13 = vpop.xlane.xlu0 %920 }
 0xafb   :  { %v923_v27 = vmul.f32 0.25, %v921_v13 }
 0xafd   :  { %v918_v31 = vpop.xlane.xlu1 %917  ;;  %v933_v34 = vrot.slane %v923_v27, %v928_v24 }
 0xafe   :  { %v922_v32 = vmul.f32 0.25, %v918_v31 }
 0xb00   :  { %v929_v35 = vrot.slane %v922_v32, %v928_v24 }
 0xb02   :  { %v935_v36 = vsel %vm934_vm7, %v933_v34, %v929_v35 }
 0xb03   :  { %v937_v37 = vsel %vm90_vm9, %v935_v36, -1e+30 }
 0xb04   :  { %v939_v26 = vsel %vm938_vm8, %v937_v37, -inf }
 0xb05   :  { %940 = vmax.xlane.f32.xlu0 %v939_v26 }
 0xb4d   :  { %v991_v28 = vpop.xlane.xlu0 %990 }
 0xb4e   :  { %v995_v29 = vmul.f32 0.25, %v991_v28 }
 0xb4f   :  { %v994_v38 = vpop.xlane.xlu1 %993 }
 0xb50   :  { %v996_v39 = vmul.f32 0.25, %v994_v38  ;;  %v1002_v3 = vrot.slane %v995_v29, %v928_v24 }
 0xb52   :  { %v1006_v4 = vrot.slane %v996_v39, %v928_v24 }
 0xb54   :  { %v1007_v40 = vsel %vm934_vm7, %v1006_v4, %v1002_v3 }
 0xb55   :  { %v1009_v41 = vsel %vm90_vm9, %v1007_v40, -1e+30 }
 0xb56   :  { %v1010_v42 = vsel %vm938_vm8, %v1009_v41, -inf }
 0xb57   :  { %1011 = vmax.xlane.f32.xlu1 %v1010_v42 }
 0xb92   :  { %v941_v43 = vpop.xlane.xlu0 %940 }
 0xb93   :  { %v942_v30 = vsub.f32 %v937_v37, %v941_v43 }
 0xb95   :  { %v943_v44 = vmul.f32 1.442695, %v942_v30 }
 0xb97   :  { %1655 = vpow2.f32 %v943_v44 }
 0xba1   :  { %v1656_v45 = vpop.eup %1655 }
 0xba2   :  { %v945_v46 = vsel %vm938_vm8, %v1656_v45, 0.0 }
 0xba3   :  { %946 = vadd.xlane.f32.xlu0 %v945_v46  ;;  %v1633_v46 = vld [vmem:[%s2096_s6 + $0x10] sm:$0xff]  }
 0xba4   :  { %1575 = vmatpush3.bf16.msra.mxu0 %v1633_v46 }
 0xba5   :  { %1576 = vmatprep.subr.bf16.mxu0 %v1687_v1 }
 0xbe4   :  { %v1012_v47 = vpop.xlane.xlu1 %1011 }
 0xbe5   :  { %v1013_v48 = vsub.f32 %v1009_v41, %v1012_v47  ;;  %v1634_v47 = vld [vmem:[%s2096_s6 + $0x18] sm:$0xff]  }
 0xbe6   :  { %1577 = vmatpush3.bf16.msra.mxu0 %v1634_v47 }
 0xbe7   :  { %v1014_v49 = vmul.f32 1.442695, %v1013_v48  ;;  %1590 = vmatprep.subr.bf16.mxu0 %v1687_v1  ;;  %v1407_v48 = vld [vmem:[%s2095_s5 + $0x1] ss:$0 sm:$0xff] }
 0xbe9   :  { %1657 = vpow2.f32 %v1014_v49 }
 0xbf3   :  { %v1658_v50 = vpop.eup %1657 }
 0xbf4   :  { %v1016_v51 = vsel %vm938_vm8, %v1658_v50, 0.0 }
 0xbf5   :  { %1017 = vadd.xlane.f32.xlu1 %v1016_v51 }
 0xc30   :  { %v947_v52 = vpop.xlane.xlu0 %946 }
 0xc31   :  { %1659 = vrcp.f32 %v947_v52 }
 0xc3b   :  { %v1660_v53 = vpop.eup %1659 }
 0xc3c   :  { %v949_v54 = vmul.f32 %v1660_v53, %v1656_v45 }
 0xc3e   :  { %v960_v55 = vrot.slane %v949_v54, %v959_v11  ;;  %v953_v56 = vrot.slane %v949_v54, %v1844_v25 }
 0xc40   :  { %962 = vbcast.lane.b32.xlu1 %v960_v55, 256  ;;  %955 = vbcast.lane.b32.xlu0 %v953_v56, 256  ;;  %v1635_v56 = vld [vmem:[%s2104_s14] sm:$0xff]  }
 0xc82   :  { %v1018_v57 = vpop.xlane.xlu1 %1017 }
 0xc83   :  { %1661 = vrcp.f32 %v1018_v57  ;;  %v1636_v57 = vld [vmem:[%s2104_s14 + $0x8] sm:$0xff]  }
 0xc8d   :  { %v1662_v58 = vpop.eup %1661 }
 0xc8e   :  { %v1020_v59 = vmul.f32 %v1662_v58, %v1658_v50  ;;  %v1411_v50 = vld [vmem:[%s2103_s13] ss:$0 sm:$0xff]  ;;  %v1417_v58 = vld [vmem:[%s2097_s7 + $0x1] ss:$0 sm:$0xff] }
 0xc90   :  { %v1024_v60 = vrot.slane %v1020_v59, %v1844_v25  ;;  %v1031_v61 = vrot.slane %v1020_v59, %v959_v11 }
 0xc92   :  { %1026 = vbcast.lane.b32.xlu1 %v1024_v60, 256  ;;  %1033 = vbcast.lane.b32.xlu0 %v1031_v61, 256 }
 0xcb2   :  { %v963_v16 = vpop.permute.xlu1 %962  ;;  %v956_v62 = vpop.permute.xlu0 %955 }
 0xcb3   :  { %v965_v0 = vmul.f32 %v963_v16, %v1991_v5  ;;  %v964_v2 = vmul.f32 %v956_v62, %v1989_v63 }
 0xcb5   :  { %v974_v6 = vsel %vm966_vm10, %v965_v0, 0.0  ;;  %v967_v7 = vsel %vm966_vm10, %v964_v2, 0.0 }
 0xcb6   :  { %v975_v25 = vrot.slane %v974_v6, 4  ;;  %v968_v8 = vrot.slane %v967_v7, 4 }
 0xcb8   :  { %v976_v9 = vadd.f32 %v975_v25, %v974_v6  ;;  %v969_v10 = vadd.f32 %v968_v8, %v967_v7  ;;  %v1637_v6 = vld [vmem:[%s2096_s6 + $0x20] sm:$0xff]   ;;  %v1638_v7 = vld [vmem:[%s2096_s6 + $0x28] sm:$0xff]   ;;  %s1697_s6 = smov [#allocation2]  }
 0xcb9   :  { %v1424_v8 = vld [vmem:[%s2105_s15] ss:$0 sm:$0xff]  ;;  %s1365_s15 = sshll.u32 %s1697_s6, 4  ;;  %s1366_s15 = int_to_ptr.vmem [resolvable:$true] %s1365_s15 }
 0xcba   :  { %v977_v12 = vrot.slane %v976_v9, 2  ;;  %v970_v14 = vrot.slane %v969_v10, 2  ;;  %s1663_s2 = scalar_lea.vmem %s1366_s15, 32  ;;  %p1668_p1 = scmp.lt.s32.totalorder %s1366_s15, %s1366_s15 }
 0xcbb   :  { %p1664_p0 = scmp.ne.s32.totalorder %s1366_s15, %s1663_s2  ;;  %p1669_p2 = scmp.lt.s32.totalorder %s1663_s2, %s1663_s2 }
 0xcbc   :  { %v978_v18 = vadd.f32 %v977_v12, %v976_v9  ;;  %v971_v13 = vadd.f32 %v970_v14, %v969_v10 }
 0xcbd   :  { %p1670_p3 = por %p1669_p2, %p1668_p1 }
 0xcbe   :  { %v979_v34 = vrot.slane %v978_v18, 1  ;;  %v972_v35 = vrot.slane %v971_v13, 1 }
 0xcbf   :  { %p1671_p4 = pnand %p1670_p3, %p1664_p0 }
 0xcc0   :  { %v973_v28 = vadd.f32 %v972_v35, %v971_v13 }
 0xd04   :  { %v1027_v15 = vpop.permute.xlu1 %1026  ;;  %v1034_v17 = vpop.permute.xlu0 %1033 }
 0xd05   :  { %v1035_v19 = vmul.f32 %v1027_v15, %v1989_v63  ;;  %v1036_v20 = vmul.f32 %v1034_v17, %v1991_v5  ;;  %v980_v5 = vadd.f32 %v979_v34, %v978_v18 }
 0xd07   :  { %v1038_v21 = vsel %vm1037_vm11, %v1035_v19, 0.0  ;;  %v1045_v22 = vsel %vm1037_vm11, %v1036_v20, 0.0  ;;  %v1054_v4 = vsel %vm934_vm7, %v980_v5, %v973_v28 }
 0xd08   :  { %v1039_v24 = vrot.slane %v1038_v21, 4  ;;  %v1046_v27 = vrot.slane %v1045_v22, 4 }
 0xd0a   :  { %v1040_v31 = vadd.f32 %v1039_v24, %v1038_v21  ;;  %v1047_v32 = vadd.f32 %v1046_v27, %v1045_v22 }
 0xd0c   :  { %v1041_v36 = vrot.slane %v1040_v31, 2  ;;  %v1048_v37 = vrot.slane %v1047_v32, 2 }
 0xd0e   :  { %v1042_v63 = vadd.f32 %v1041_v36, %v1040_v31  ;;  %v1049_v26 = vadd.f32 %v1048_v37, %v1047_v32 }
 0xd10   :  { %v1043_v29 = vrot.slane %v1042_v63, 1  ;;  %v1050_v38 = vrot.slane %v1049_v26, 1 }
 0xd12   :  { %v1044_v39 = vadd.f32 %v1043_v29, %v1042_v63  ;;  %v1051_v3 = vadd.f32 %v1050_v38, %v1049_v26 }
 0xd14   :  { %v1060_v40 = vsel %vm934_vm7, %v1051_v3, %v1044_v39 }
 0xd15   :  { %v1615_v41 = vpack.i.bf16 %v1060_v40, %v1054_v4 }
 0xd17   :  { %1616 = vrot.lane.b32.xlu1 %v1615_v41, %s1689_s18 }
 0xd89   :  { %v1617_v42 = vpop.permute.xlu1 %1616 }
 0xd8a   :  { %v1619_v43 = vunpack.i.h.bf16 %v1617_v42  ;;  %v1618_v30 = vunpack.i.l.bf16 %v1617_v42 }
 0xd8c   :  { %v1064_v44 = vsel %vm167_vm2, %v1618_v30, %v1619_v43 }
 0xd8d   :  { %v1065_v45 = vpack.c.bf16 %v1064_v44, %v1064_v44 }
 0xd8f   :  { %1571 = vmatmul.mubr.msk.bf16.vlgmr.msra.gmra.mrb[24].mxu1 %vm117_vm1, %v1065_v45 }
 0xd90   :  { %1586 = vmatprep.mubr.msk.bf16.mxu1 %vm1688_vm0, %v1687_v1  ;;  %1583 = vmatpush3.bf16.msra.mxu1 %v1635_v56 }
 0xd91   :  { %1584 = vmatprep.subr.bf16.mxu1 %v1687_v1 }
 0xd94   :  { %1585 = vmatpush3.bf16.msra.mxu1 %v1636_v57 }
 0xe62   :  { %v1128_v49 = vpop.f32.mrb[24].mxu1 }
 0xe63   :  { %v1129_v51 = vadd.f32 %v1407_v48, %v1128_v49  ;;  %v1572_v52 = vpop.f32.mrb[25].mxu1 }
 0xe64   :  { %v1131_v11 = vpop.f32.mrb[26].mxu1 }
 0xe65   :  { %v1141_v53 = vadd.f32 %v1411_v50, %v1129_v51  ;;  %v1573_v54 = vpop.f32.mrb[27].mxu1 }
 0xe67   :  { %v1142_v55 = vpack.c.bf16 %v1141_v53, %v1141_v53 }
 0xe69   :  { %1579 = vmatmul.mubr.msk.bf16.vlgmr.msra.gmra.mrb[28].mxu0 %vm117_vm1, %v1142_v55 }
 0xe6a   :  { %1594 = vmatprep.mubr.msk.bf16.mxu0 %vm1688_vm0, %v1687_v1  ;;  %1591 = vmatpush3.bf16.msra.mxu0 %v1637_v6 }
 0xe6b   :  { %1592 = vmatprep.subr.bf16.mxu0 %v1687_v1  ;;  %v1430_v1 = vld [vmem:[%s2097_s7 + $0x2] ss:$0 sm:$0xff] }
 0xe6e   :  { %1593 = vmatpush3.bf16.msra.mxu0 %v1638_v7 }
 0xf3c   :  { %v1205_v59 = vpop.f32.mrb[28].mxu0 }
 0xf3d   :  { %v1206_v60 = vadd.f32 %v1417_v58, %v1205_v59  ;;  %v1580_v61 = vpop.f32.mrb[29].mxu0 }
 0xf3e   :  { %v1208_v23 = vpop.f32.mrb[30].mxu0 }
 0xf3f   :  { %v1211_v16 = vmax.f32 %v1206_v60, 0.0  ;;  %v1581_v62 = vpop.f32.mrb[31].mxu0 }
 0xf41   :  { %v1212_v0 = vadd.f32 %v1211_v16, %v1141_v53 }
 0xf43   :  { %v1213_v2 = vpack.c.bf16 %v1212_v0, %v1212_v0 }
 0xf45   :  { %1587 = vmatmul.mubr.msk.bf16.vlgmr.msra.gmra.mrb[28].mxu1 %vm117_vm1, %v1213_v2 }
0x1018   :  { %v1267_v25 = vpop.f32.mrb[28].mxu1 }
0x1019   :  { %v1273_v9 = vadd.f32 %v1267_v25, %v1212_v0  ;;  %v1588_v10 = vpop.f32.mrb[29].mxu1 }
0x101a   :  { %v1270_v12 = vpop.f32.mrb[30].mxu1 }
0x101b   :  { %v1281_v14 = vadd.f32 %v1424_v8, %v1273_v9  ;;  %v1589_v15 = vpop.f32.mrb[31].mxu1 }
0x101d   :  { %v1282_v17 = vpack.c.bf16 %v1281_v14, %v1281_v14 }
0x101f   :  { %1595 = vmatmul.mubr.msk.bf16.vlgmr.msra.gmra.mrb[32].mxu0 %vm117_vm1, %v1282_v17 }
0x10f2   :  { %v1345_v19 = vpop.f32.mrb[32].mxu0 }
0x10f3   :  { %v1346_v20 = vadd.f32 %v1430_v1, %v1345_v19  ;;  %v1596_v21 = vpop.f32.mrb[33].mxu0 }
0x10f4   :  { %v1348_v22 = vpop.f32.mrb[34].mxu0 }
0x10f5   :  { %v1351_v18 = vmax.f32 %v1346_v20, 0.0  ;;  %v1597_v13 = vpop.f32.mrb[35].mxu0 }
0x10f7   :  { %v1352_v24 = vadd.f32 %v1351_v18, %v1281_v14 }
0x10f9   :  { %vm1353_vm12 = vcmp.ne.f32.partialorder %v1352_v24, %v1352_v24 }
0x10fa   :  { %v1354_v27 = vsel %vm1353_vm12, 0.0, %v1352_v24 }
0x10fb   :  { %v1434_v31 = vclamps-f32 %v1354_v27, 3.4028235e+38 }
0x10fd   :  { %1358 = vst.msk [vmem:[#allocation2] sm:$0x3] %vm1357_vm13, %v1434_v31 }
0x10fe   :  { %1674 = shalt.err (!%p1671_p4)
}
0x10ff   :  { %s1675_s12 = scalar_lea.hbm %s2106_s16, 32 }
0x1100   :  { %p1676_p5 = scmp.ne.s32.totalorder %s2106_s16, %s1675_s12  ;;  %p1679_p6 = scmp.lt.u32.totalorder %s1675_s12, %s2106_s16 }
0x1102   :  { %p1681_p7 = pnand %p1679_p6, %p1676_p5 }
0x1104   :  { %1684 = shalt.err (!%p1681_p7)
}
0x1105   :  { %1368 = dma.vmem_to_hbm [thread:$0]  %s1366_s15, 32, %s2106_s16, [#allocation3]  }
0x1106   :  { %1685 = dma.done.wait [#allocation3], 32  }
0x1107   :  { %1686 = vsyncadd [#allocation3], 4294967264 }
0x1108   :  { %1372 = vsyncpa [#allocation3], 1 }

</bundles_post_ra>
